<compile_context>
chip_gen: v5e
topology: v5e:2x2
jax: 0.10.0
libtpu: 0.0.40
codegen_flags: <defaults>
</compile_context>

<pallas_src>
import functools

import jax
import jax.numpy as jnp
from jax.experimental import pallas as pl
from jax.experimental.pallas import tpu as pltpu


def _vmem_limit_bytes():
    # Generation-aware scoped-VMEM budget (v5e/v6e: 128 MiB physical, v7x: 64 MiB).
    try:
        cap = int(pltpu.get_tpu_info().vmem_capacity_bytes)
    except Exception:  # conservative fallback
        cap = 64 * 1024 * 1024
    return int(min(cap // 2, 64 * 1024 * 1024))


# ----------------------------------------------------------------------------
# Pallas kernels
# ----------------------------------------------------------------------------
def _conv3d_tap_kernel(x_ref, w_ref, b_ref, y_ref, s_ref, ss_ref, acc_ref, *,
                       K, Ho, Wo, apply_act, slope):
    """One grid step = (sample n, output depth plane d, depth tap kd).

    x_ref  : (1, 1, Hp, Wp, Cin)  padded input depth-plane  d + kd   (bf16)
    w_ref  : (1, K, K, Cin, Cout) weights of depth-tap kd            (bf16)
    b_ref  : (1, Cout)            bias                               (f32)
    y_ref  : (1, 1, Ho, Wo, Cout) conv output plane d                (f32)
    s_ref  : (1, 1, 1, Cout)      per-plane channel sum  (pre-activation)
    ss_ref : (1, 1, 1, Cout)      per-plane channel sum of squares
    acc_ref: (Ho*Wo, Cout) f32    accumulator carried across the kd taps
    """
    kd = pl.program_id(2)

    @pl.when(kd == 0)
    def _init():
        acc_ref[...] = jnp.zeros_like(acc_ref)

    x = x_ref[0, 0]                      # (Hp, Wp, Cin) bf16, reused by all 2-D taps
    cin = x.shape[-1]
    partial = None
    for kh in range(K):
        for kw in range(K):
            win = x[kh:kh + Ho, kw:kw + Wo, :].reshape(Ho * Wo, cin)
            d = jnp.dot(win, w_ref[0, kh, kw],           # (Ho*Wo,Cin) x (Cin,Cout)
                        preferred_element_type=jnp.float32)
            partial = d if partial is None else partial + d
    acc_ref[...] += partial

    @pl.when(kd == K - 1)
    def _finalize():
        y = acc_ref[...] + b_ref[...]                    # (Ho*Wo, Cout) f32
        # Per-plane statistics for the streaming InstanceNorm (pre-activation).
        s_ref[...] = jnp.sum(y, axis=0).reshape(s_ref.shape)
        ss_ref[...] = jnp.sum(y * y, axis=0).reshape(ss_ref.shape)
        if apply_act:
            y = jnp.where(y >= 0.0, y, slope * y)
        y_ref[...] = y.reshape(y_ref.shape)


def _norm_lrelu_kernel(x_ref, mean_ref, rstd_ref, o_ref, *, slope):
    # x_ref / o_ref: (1, 1, Ho, Wo, C) f32 ; mean_ref / rstd_ref: (1, 1, C) f32
    x = x_ref[...]
    m = mean_ref[...].reshape(1, 1, 1, 1, -1)
    r = rstd_ref[...].reshape(1, 1, 1, 1, -1)
    y = (x - m) * r
    o_ref[...] = jnp.where(y >= 0.0, y, slope * y)


# ----------------------------------------------------------------------------
# Pallas wrappers
# ----------------------------------------------------------------------------
def conv3d(x, w, b, *, padding, stride=1, apply_act, slope=0.2,
           compute_dtype=jnp.bfloat16):
    """3-D convolution + bias (+ optional fused LeakyReLU), stride 1.

    x: (N, D, H, W, Cin) f32 ; w: (K, K, K, Cin, Cout) ; b: (Cout,)
    Returns (y, plane_sum, plane_sumsq):
      y           : (N, Do, Ho, Wo, Cout) f32
      plane_sum   : (N, Do, 1, Cout) f32   sum over (Ho, Wo) of the pre-activation y
      plane_sumsq : (N, Do, 1, Cout) f32
    """
    if stride != 1:
        # TODO(synk): strided Conv3d not implemented (module default stride=1).
        raise NotImplementedError("stride != 1 not supported")
    N, D, H, W, Cin = x.shape
    K = w.shape[0]
    Cout = w.shape[-1]

    xp = jnp.pad(x, ((0, 0), (padding,) * 2, (padding,) * 2, (padding,) * 2, (0, 0)))
    xp = xp.astype(compute_dtype)
    Dp, Hp, Wp = D + 2 * padding, H + 2 * padding, W + 2 * padding
    Do, Ho, Wo = Dp - K + 1, Hp - K + 1, Wp - K + 1

    kernel = functools.partial(_conv3d_tap_kernel, K=K, Ho=Ho, Wo=Wo,
                               apply_act=apply_act, slope=slope)
    out_shape = (
        jax.ShapeDtypeStruct((N, Do, Ho, Wo, Cout), jnp.float32),
        jax.ShapeDtypeStruct((N, Do, 1, Cout), jnp.float32),
        jax.ShapeDtypeStruct((N, Do, 1, Cout), jnp.float32),
    )
    y, s, ss = pl.pallas_call(
        kernel,
        out_shape=out_shape,
        grid=(N, Do, K),
        in_specs=[
            # one padded depth plane per step, halo via the (d + kd) index map
            pl.BlockSpec((1, 1, Hp, Wp, Cin), lambda n, d, kd: (n, d + kd, 0, 0, 0)),
            # only the current depth-tap's weights
            pl.BlockSpec((1, K, K, Cin, Cout), lambda n, d, kd: (kd, 0, 0, 0, 0)),
            pl.BlockSpec((1, Cout), lambda n, d, kd: (0, 0)),
        ],
        out_specs=(
            pl.BlockSpec((1, 1, Ho, Wo, Cout), lambda n, d, kd: (n, d, 0, 0, 0)),
            pl.BlockSpec((1, 1, 1, Cout), lambda n, d, kd: (n, d, 0, 0)),
            pl.BlockSpec((1, 1, 1, Cout), lambda n, d, kd: (n, d, 0, 0)),
        ),
        scratch_shapes=[pltpu.VMEM((Ho * Wo, Cout), jnp.float32)],
        compiler_params=pltpu.CompilerParams(
            dimension_semantics=("parallel", "parallel", "arbitrary"),
            vmem_limit_bytes=_vmem_limit_bytes()),
    )(xp, w.astype(compute_dtype), b.reshape(1, Cout).astype(jnp.float32))
    return y, s, ss


def instnorm_leakyrelu(y, mean, rstd, *, slope=0.2):
    """Streaming InstanceNorm3d (no affine) normalize + LeakyReLU.

    y: (N, D, H, W, C) f32 ; mean, rstd: (N, 1, C) f32 (per sample & channel).
    """
    N, D, H, W, C = y.shape
    return pl.pallas_call(
        functools.partial(_norm_lrelu_kernel, slope=slope),
        out_shape=jax.ShapeDtypeStruct(y.shape, jnp.float32),
        grid=(N, D),
        in_specs=[
            pl.BlockSpec((1, 1, H, W, C), lambda n, d: (n, d, 0, 0, 0)),
            pl.BlockSpec((1, 1, C), lambda n, d: (n, 0, 0)),
            pl.BlockSpec((1, 1, C), lambda n, d: (n, 0, 0)),
        ],
        out_specs=pl.BlockSpec((1, 1, H, W, C), lambda n, d: (n, d, 0, 0, 0)),
        compiler_params=pltpu.CompilerParams(
            dimension_semantics=("parallel", "parallel"),
            vmem_limit_bytes=_vmem_limit_bytes()),
    )(y, mean, rstd)


# ----------------------------------------------------------------------------
# _ConvBlock forward (PyTorch NCDHW in / NCDHW out)
# ----------------------------------------------------------------------------
def conv_block_forward(x_ncdhw, weight, bias, *, stride=1, padding=1,
                       apply_norm=False, eps=1e-5, slope=0.2,
                       compute_dtype=jnp.bfloat16):
    """Forward of _ConvBlock: LeakyReLU(0.2)([InstanceNorm3d](Conv3d(x))).

    x_ncdhw: (N, Cin, D, H, W); weight: (Cout, Cin, K, K, K) (torch layout); bias: (Cout,).
    """
    x = jnp.transpose(x_ncdhw, (0, 2, 3, 4, 1)).astype(jnp.float32)      # NDHWC
    w = jnp.transpose(weight, (2, 3, 4, 1, 0)).astype(jnp.float32)       # (K,K,K,Cin,Cout)

    y, s, ss = conv3d(x, w, bias, padding=padding, stride=stride,
                      apply_act=not apply_norm, slope=slope,
                      compute_dtype=compute_dtype)

    if apply_norm:
        N, Do, Ho, Wo, Cout = y.shape
        count = float(Do * Ho * Wo)
        total = jnp.sum(s, axis=(1, 2))        # (N, Cout) -- tiny reduce in plain JAX
        total_sq = jnp.sum(ss, axis=(1, 2))    # (N, Cout)
        mean = total / count
        # biased variance (PyTorch InstanceNorm3d); f32 accumulators, clamped >= 0
        # to guard against E[x^2]-E[x]^2 cancellation.
        var = jnp.maximum(total_sq / count - mean * mean, 0.0)
        rstd = jax.lax.rsqrt(var + eps)
        y = instnorm_leakyrelu(y, mean.reshape(N, 1, Cout),
                               rstd.reshape(N, 1, Cout), slope=slope)
    return jnp.transpose(y, (0, 4, 1, 2, 3))


# ----------------------------------------------------------------------------
# Pure-JAX reference (same bf16-quantized operands) for a correctness check
# ----------------------------------------------------------------------------
def _reference_forward(x_ncdhw, weight, bias, *, padding, apply_norm,
                       eps=1e-5, slope=0.2, compute_dtype=jnp.bfloat16):
    x = jnp.transpose(x_ncdhw, (0, 2, 3, 4, 1)).astype(compute_dtype).astype(jnp.float32)
    w = jnp.transpose(weight, (2, 3, 4, 1, 0)).astype(compute_dtype).astype(jnp.float32)
    y = jax.lax.conv_general_dilated(
        x, w, window_strides=(1, 1, 1), padding=[(padding, padding)] * 3,
        dimension_numbers=("NDHWC", "DHWIO", "NDHWC"),
        preferred_element_type=jnp.float32)
    y = y + bias.reshape(1, 1, 1, 1, -1)
    if apply_norm:
        mean = jnp.mean(y, axis=(1, 2, 3), keepdims=True)
        var = jnp.mean(jnp.square(y - mean), axis=(1, 2, 3), keepdims=True)
        y = (y - mean) * jax.lax.rsqrt(var + eps)
    y = jnp.where(y >= 0.0, y, slope * y)
    return jnp.transpose(y, (0, 4, 1, 2, 3))


# ----------------------------------------------------------------------------
if __name__ == "__main__":
    key = jax.random.PRNGKey(0)
    kx, kw, kb = jax.random.split(key, 3)

    N, Cin, Cout, S, K, PAD = 2, 4, 8, 16, 3, 1
    x = jax.random.normal(kx, (N, Cin, S, S, S), jnp.float32)
    w = (1.0 / jnp.sqrt(float(Cin * K ** 3))) * jax.random.normal(
        kw, (Cout, Cin, K, K, K), jnp.float32)
    b = 0.05 * jax.random.normal(kb, (Cout,), jnp.float32)

    fwd_norm = jax.jit(functools.partial(conv_block_forward, padding=PAD, apply_norm=True))
    fwd_plain = jax.jit(functools.partial(conv_block_forward, padding=PAD, apply_norm=False))

    out_norm = jax.block_until_ready(fwd_norm(x, w, b))
    out_plain = jax.block_until_ready(fwd_plain(x, w, b))

    assert out_norm.shape == (N, Cout, S, S, S), out_norm.shape
    assert out_plain.shape == (N, Cout, S, S, S), out_plain.shape
    assert bool(jnp.isfinite(out_norm).all())
    assert bool(jnp.isfinite(out_plain).all())

    ref_norm = _reference_forward(x, w, b, padding=PAD, apply_norm=True)
    ref_plain = _reference_forward(x, w, b, padding=PAD, apply_norm=False)
    assert jnp.allclose(out_norm, ref_norm, rtol=1e-2, atol=1e-2), \
        float(jnp.max(jnp.abs(out_norm - ref_norm)))
    assert jnp.allclose(out_plain, ref_plain, rtol=1e-2, atol=1e-2), \
        float(jnp.max(jnp.abs(out_plain - ref_plain)))

    print("KERNEL_OK")
</pallas_src>

<mosaic_0001>
module attributes {stable_mosaic.version = 11 : i64} {
  func.func @_conv3d_tap_kernel(%arg0: i32, %arg1: i32, %arg2: i32, %arg3: memref<1x1x18x18x4xbf16, #tpu.memory_space<vmem>>, %arg4: memref<1x3x3x4x8xbf16, #tpu.memory_space<vmem>>, %arg5: memref<1x8xf32, #tpu.memory_space<vmem>>, %arg6: memref<1x1x16x16x8xf32, #tpu.memory_space<vmem>>, %arg7: memref<1x1x1x8xf32, #tpu.memory_space<vmem>>, %arg8: memref<1x1x1x8xf32, #tpu.memory_space<vmem>>, %arg9: memref<256x8xf32, #tpu.memory_space<vmem>>) attributes {dimension_semantics = [#tpu.dimension_semantics<parallel>, #tpu.dimension_semantics<parallel>, #tpu.dimension_semantics<arbitrary>], iteration_bounds = array<i64: 2, 16, 3>, scalar_prefetch = 0 : i64, scratch_operands = 1 : i64, tpu.core_type = #tpu.core_type<tc>, window_params = [{transform_indices = @transform_0, window_bounds = array<i64: 1, 1, 18, 18, 4>}, {transform_indices = @transform_1, window_bounds = array<i64: 1, 3, 3, 4, 8>}, {pipeline_mode = #tpu.pipeline_mode<synchronous>, transform_indices = @transform_2, window_bounds = array<i64: 1, 8>}, {transform_indices = @transform_3, window_bounds = array<i64: 1, 1, 16, 16, 8>}, {transform_indices = @transform_4, window_bounds = array<i64: 1, 1, 1, 8>}, {transform_indices = @transform_5, window_bounds = array<i64: 1, 1, 1, 8>}]} {
    %c0_i32 = arith.constant 0 : i32
    %0 = arith.cmpi eq, %arg2, %c0_i32 : i32
    %1 = arith.extui %0 : i1 to i32
    %c0_i32_0 = arith.constant 0 : i32
    %2 = arith.cmpi ne, %1, %c0_i32_0 : i32
    scf.if %2 {
      %cst_61 = arith.constant 0.000000e+00 : f32
      %64 = vector.broadcast %cst_61 : f32 to vector<256x8xf32>
      %c0_62 = arith.constant 0 : index
      %c0_63 = arith.constant 0 : index
      %65 = vector.load %arg9[%c0_62, %c0_63] : memref<256x8xf32, #tpu.memory_space<vmem>>, vector<256x8xf32>
      tpu.vector_store %arg9[%c0_62, %c0_63], %64 {strides = array<i32>} : memref<256x8xf32, #tpu.memory_space<vmem>>, vector<256x8xf32>,
    } else {
    }
    %c0 = arith.constant 0 : index
    %c0_1 = arith.constant 0 : index
    %c0_2 = arith.constant 0 : index
    %c0_3 = arith.constant 0 : index
    %c0_4 = arith.constant 0 : index
    %3 = vector.load %arg3[%c0, %c0_1, %c0_2, %c0_3, %c0_4] : memref<1x1x18x18x4xbf16, #tpu.memory_space<vmem>>, vector<1x1x18x18x4xbf16>
    %4 = vector.shape_cast %3 : vector<1x1x18x18x4xbf16> to vector<18x18x4xbf16>
    %5 = vector.extract_strided_slice %4 {offsets = [0, 0, 0], sizes = [16, 16, 4], strides = [1, 1, 1]} : vector<18x18x4xbf16> to vector<16x16x4xbf16>
    %6 = vector.shape_cast %5 : vector<16x16x4xbf16> to vector<256x4xbf16>
    %c0_5 = arith.constant 0 : index
    %c0_6 = arith.constant 0 : index
    %c0_7 = arith.constant 0 : index
    %c0_8 = arith.constant 0 : index
    %c0_9 = arith.constant 0 : index
    %7 = vector.load %arg4[%c0_5, %c0_6, %c0_7, %c0_8, %c0_9] : memref<1x3x3x4x8xbf16, #tpu.memory_space<vmem>>, vector<1x1x1x4x8xbf16>
    %8 = vector.shape_cast %7 : vector<1x1x1x4x8xbf16> to vector<4x8xbf16>
    %cst = arith.constant dense<0.000000e+00> : vector<256x8xf32>
    %9 = tpu.matmul %6, %8, %cst {dimension_numbers = #tpu.dot_dimension_numbers<[1], [0], [0], [1], [0, 0, 1, 1], [], []>} : vector<256x4xbf16>, vector<4x8xbf16>, vector<256x8xf32> -> vector<256x8xf32>
    %10 = vector.extract_strided_slice %4 {offsets = [0, 1, 0], sizes = [16, 16, 4], strides = [1, 1, 1]} : vector<18x18x4xbf16> to vector<16x16x4xbf16>
    %11 = vector.shape_cast %10 : vector<16x16x4xbf16> to vector<256x4xbf16>
    %c0_10 = arith.constant 0 : index
    %c0_11 = arith.constant 0 : index
    %c1 = arith.constant 1 : index
    %c0_12 = arith.constant 0 : index
    %c0_13 = arith.constant 0 : index
    %12 = vector.load %arg4[%c0_10, %c0_11, %c1, %c0_12, %c0_13] : memref<1x3x3x4x8xbf16, #tpu.memory_space<vmem>>, vector<1x1x1x4x8xbf16>
    %13 = vector.shape_cast %12 : vector<1x1x1x4x8xbf16> to vector<4x8xbf16>
    %cst_14 = arith.constant dense<0.000000e+00> : vector<256x8xf32>
    %14 = tpu.matmul %11, %13, %cst_14 {dimension_numbers = #tpu.dot_dimension_numbers<[1], [0], [0], [1], [0, 0, 1, 1], [], []>} : vector<256x4xbf16>, vector<4x8xbf16>, vector<256x8xf32> -> vector<256x8xf32>
    %15 = arith.addf %9, %14 : vector<256x8xf32>
    %16 = vector.extract_strided_slice %4 {offsets = [0, 2, 0], sizes = [16, 16, 4], strides = [1, 1, 1]} : vector<18x18x4xbf16> to vector<16x16x4xbf16>
    %17 = vector.shape_cast %16 : vector<16x16x4xbf16> to vector<256x4xbf16>
    %c0_15 = arith.constant 0 : index
    %c0_16 = arith.constant 0 : index
    %c2 = arith.constant 2 : index
    %c0_17 = arith.constant 0 : index
    %c0_18 = arith.constant 0 : index
    %18 = vector.load %arg4[%c0_15, %c0_16, %c2, %c0_17, %c0_18] : memref<1x3x3x4x8xbf16, #tpu.memory_space<vmem>>, vector<1x1x1x4x8xbf16>
    %19 = vector.shape_cast %18 : vector<1x1x1x4x8xbf16> to vector<4x8xbf16>
    %cst_19 = arith.constant dense<0.000000e+00> : vector<256x8xf32>
    %20 = tpu.matmul %17, %19, %cst_19 {dimension_numbers = #tpu.dot_dimension_numbers<[1], [0], [0], [1], [0, 0, 1, 1], [], []>} : vector<256x4xbf16>, vector<4x8xbf16>, vector<256x8xf32> -> vector<256x8xf32>
    %21 = arith.addf %15, %20 : vector<256x8xf32>
    %22 = vector.extract_strided_slice %4 {offsets = [1, 0, 0], sizes = [16, 16, 4], strides = [1, 1, 1]} : vector<18x18x4xbf16> to vector<16x16x4xbf16>
    %23 = vector.shape_cast %22 : vector<16x16x4xbf16> to vector<256x4xbf16>
    %c0_20 = arith.constant 0 : index
    %c1_21 = arith.constant 1 : index
    %c0_22 = arith.constant 0 : index
    %c0_23 = arith.constant 0 : index
    %c0_24 = arith.constant 0 : index
    %24 = vector.load %arg4[%c0_20, %c1_21, %c0_22, %c0_23, %c0_24] : memref<1x3x3x4x8xbf16, #tpu.memory_space<vmem>>, vector<1x1x1x4x8xbf16>
    %25 = vector.shape_cast %24 : vector<1x1x1x4x8xbf16> to vector<4x8xbf16>
    %cst_25 = arith.constant dense<0.000000e+00> : vector<256x8xf32>
    %26 = tpu.matmul %23, %25, %cst_25 {dimension_numbers = #tpu.dot_dimension_numbers<[1], [0], [0], [1], [0, 0, 1, 1], [], []>} : vector<256x4xbf16>, vector<4x8xbf16>, vector<256x8xf32> -> vector<256x8xf32>
    %27 = arith.addf %21, %26 : vector<256x8xf32>
    %28 = vector.extract_strided_slice %4 {offsets = [1, 1, 0], sizes = [16, 16, 4], strides = [1, 1, 1]} : vector<18x18x4xbf16> to vector<16x16x4xbf16>
    %29 = vector.shape_cast %28 : vector<16x16x4xbf16> to vector<256x4xbf16>
    %c0_26 = arith.constant 0 : index
    %c1_27 = arith.constant 1 : index
    %c1_28 = arith.constant 1 : index
    %c0_29 = arith.constant 0 : index
    %c0_30 = arith.constant 0 : index
    %30 = vector.load %arg4[%c0_26, %c1_27, %c1_28, %c0_29, %c0_30] : memref<1x3x3x4x8xbf16, #tpu.memory_space<vmem>>, vector<1x1x1x4x8xbf16>
    %31 = vector.shape_cast %30 : vector<1x1x1x4x8xbf16> to vector<4x8xbf16>
    %cst_31 = arith.constant dense<0.000000e+00> : vector<256x8xf32>
    %32 = tpu.matmul %29, %31, %cst_31 {dimension_numbers = #tpu.dot_dimension_numbers<[1], [0], [0], [1], [0, 0, 1, 1], [], []>} : vector<256x4xbf16>, vector<4x8xbf16>, vector<256x8xf32> -> vector<256x8xf32>
    %33 = arith.addf %27, %32 : vector<256x8xf32>
    %34 = vector.extract_strided_slice %4 {offsets = [1, 2, 0], sizes = [16, 16, 4], strides = [1, 1, 1]} : vector<18x18x4xbf16> to vector<16x16x4xbf16>
    %35 = vector.shape_cast %34 : vector<16x16x4xbf16> to vector<256x4xbf16>
    %c0_32 = arith.constant 0 : index
    %c1_33 = arith.constant 1 : index
    %c2_34 = arith.constant 2 : index
    %c0_35 = arith.constant 0 : index
    %c0_36 = arith.constant 0 : index
    %36 = vector.load %arg4[%c0_32, %c1_33, %c2_34, %c0_35, %c0_36] : memref<1x3x3x4x8xbf16, #tpu.memory_space<vmem>>, vector<1x1x1x4x8xbf16>
    %37 = vector.shape_cast %36 : vector<1x1x1x4x8xbf16> to vector<4x8xbf16>
    %cst_37 = arith.constant dense<0.000000e+00> : vector<256x8xf32>
    %38 = tpu.matmul %35, %37, %cst_37 {dimension_numbers = #tpu.dot_dimension_numbers<[1], [0], [0], [1], [0, 0, 1, 1], [], []>} : vector<256x4xbf16>, vector<4x8xbf16>, vector<256x8xf32> -> vector<256x8xf32>
    %39 = arith.addf %33, %38 : vector<256x8xf32>
    %40 = vector.extract_strided_slice %4 {offsets = [2, 0, 0], sizes = [16, 16, 4], strides = [1, 1, 1]} : vector<18x18x4xbf16> to vector<16x16x4xbf16>
    %41 = vector.shape_cast %40 : vector<16x16x4xbf16> to vector<256x4xbf16>
    %c0_38 = arith.constant 0 : index
    %c2_39 = arith.constant 2 : index
    %c0_40 = arith.constant 0 : index
    %c0_41 = arith.constant 0 : index
    %c0_42 = arith.constant 0 : index
    %42 = vector.load %arg4[%c0_38, %c2_39, %c0_40, %c0_41, %c0_42] : memref<1x3x3x4x8xbf16, #tpu.memory_space<vmem>>, vector<1x1x1x4x8xbf16>
    %43 = vector.shape_cast %42 : vector<1x1x1x4x8xbf16> to vector<4x8xbf16>
    %cst_43 = arith.constant dense<0.000000e+00> : vector<256x8xf32>
    %44 = tpu.matmul %41, %43, %cst_43 {dimension_numbers = #tpu.dot_dimension_numbers<[1], [0], [0], [1], [0, 0, 1, 1], [], []>} : vector<256x4xbf16>, vector<4x8xbf16>, vector<256x8xf32> -> vector<256x8xf32>
    %45 = arith.addf %39, %44 : vector<256x8xf32>
    %46 = vector.extract_strided_slice %4 {offsets = [2, 1, 0], sizes = [16, 16, 4], strides = [1, 1, 1]} : vector<18x18x4xbf16> to vector<16x16x4xbf16>
    %47 = vector.shape_cast %46 : vector<16x16x4xbf16> to vector<256x4xbf16>
    %c0_44 = arith.constant 0 : index
    %c2_45 = arith.constant 2 : index
    %c1_46 = arith.constant 1 : index
    %c0_47 = arith.constant 0 : index
    %c0_48 = arith.constant 0 : index
    %48 = vector.load %arg4[%c0_44, %c2_45, %c1_46, %c0_47, %c0_48] : memref<1x3x3x4x8xbf16, #tpu.memory_space<vmem>>, vector<1x1x1x4x8xbf16>
    %49 = vector.shape_cast %48 : vector<1x1x1x4x8xbf16> to vector<4x8xbf16>
    %cst_49 = arith.constant dense<0.000000e+00> : vector<256x8xf32>
    %50 = tpu.matmul %47, %49, %cst_49 {dimension_numbers = #tpu.dot_dimension_numbers<[1], [0], [0], [1], [0, 0, 1, 1], [], []>} : vector<256x4xbf16>, vector<4x8xbf16>, vector<256x8xf32> -> vector<256x8xf32>
    %51 = arith.addf %45, %50 : vector<256x8xf32>
    %52 = vector.extract_strided_slice %4 {offsets = [2, 2, 0], sizes = [16, 16, 4], strides = [1, 1, 1]} : vector<18x18x4xbf16> to vector<16x16x4xbf16>
    %53 = vector.shape_cast %52 : vector<16x16x4xbf16> to vector<256x4xbf16>
    %c0_50 = arith.constant 0 : index
    %c2_51 = arith.constant 2 : index
    %c2_52 = arith.constant 2 : index
    %c0_53 = arith.constant 0 : index
    %c0_54 = arith.constant 0 : index
    %54 = vector.load %arg4[%c0_50, %c2_51, %c2_52, %c0_53, %c0_54] : memref<1x3x3x4x8xbf16, #tpu.memory_space<vmem>>, vector<1x1x1x4x8xbf16>
    %55 = vector.shape_cast %54 : vector<1x1x1x4x8xbf16> to vector<4x8xbf16>
    %cst_55 = arith.constant dense<0.000000e+00> : vector<256x8xf32>
    %56 = tpu.matmul %53, %55, %cst_55 {dimension_numbers = #tpu.dot_dimension_numbers<[1], [0], [0], [1], [0, 0, 1, 1], [], []>} : vector<256x4xbf16>, vector<4x8xbf16>, vector<256x8xf32> -> vector<256x8xf32>
    %57 = arith.addf %51, %56 : vector<256x8xf32>
    %c0_56 = arith.constant 0 : index
    %c0_57 = arith.constant 0 : index
    %58 = vector.load %arg9[%c0_56, %c0_57] : memref<256x8xf32, #tpu.memory_space<vmem>>, vector<256x8xf32>
    %59 = arith.addf %58, %57 : vector<256x8xf32>
    %c0_58 = arith.constant 0 : index
    %c0_59 = arith.constant 0 : index
    %60 = vector.load %arg9[%c0_58, %c0_59] : memref<256x8xf32, #tpu.memory_space<vmem>>, vector<256x8xf32>
    tpu.vector_store %arg9[%c0_58, %c0_59], %59 {strides = array<i32>} : memref<256x8xf32, #tpu.memory_space<vmem>>, vector<256x8xf32>,
    %c2_i32 = arith.constant 2 : i32
    %61 = arith.cmpi eq, %arg2, %c2_i32 : i32
    %62 = arith.extui %61 : i1 to i32
    %c0_i32_60 = arith.constant 0 : i32
    %63 = arith.cmpi ne, %62, %c0_i32_60 : i32
    scf.if %63 {
      %c0_61 = arith.constant 0 : index
      %c0_62 = arith.constant 0 : index
      %64 = vector.load %arg9[%c0_61, %c0_62] : memref<256x8xf32, #tpu.memory_space<vmem>>, vector<256x8xf32>
      %c0_63 = arith.constant 0 : index
      %c0_64 = arith.constant 0 : index
      %65 = vector.load %arg5[%c0_63, %c0_64] : memref<1x8xf32, #tpu.memory_space<vmem>>, vector<1x8xf32>
      %66 = vector.broadcast %65 : vector<1x8xf32> to vector<256x8xf32>
      %67 = arith.addf %64, %66 : vector<256x8xf32>
      %cst_65 = arith.constant dense<0.000000e+00> : vector<8xf32>
      %68 = vector.multi_reduction <add>, %67, %cst_65 [0] : vector<256x8xf32> to vector<8xf32>
      %69 = vector.shape_cast %68 : vector<8xf32> to vector<1x1x1x8xf32>
      %c0_66 = arith.constant 0 : index
      %c0_67 = arith.constant 0 : index
      %c0_68 = arith.constant 0 : index
      %c0_69 = arith.constant 0 : index
      %70 = vector.load %arg7[%c0_66, %c0_67, %c0_68, %c0_69] : memref<1x1x1x8xf32, #tpu.memory_space<vmem>>, vector<1x1x1x8xf32>
      tpu.vector_store %arg7[%c0_66, %c0_67, %c0_68, %c0_69], %69 {strides = array<i32>} : memref<1x1x1x8xf32, #tpu.memory_space<vmem>>, vector<1x1x1x8xf32>,
      %71 = arith.mulf %67, %67 : vector<256x8xf32>
      %cst_70 = arith.constant dense<0.000000e+00> : vector<8xf32>
      %72 = vector.multi_reduction <add>, %71, %cst_70 [0] : vector<256x8xf32> to vector<8xf32>
      %73 = vector.shape_cast %72 : vector<8xf32> to vector<1x1x1x8xf32>
      %c0_71 = arith.constant 0 : index
      %c0_72 = arith.constant 0 : index
      %c0_73 = arith.constant 0 : index
      %c0_74 = arith.constant 0 : index
      %74 = vector.load %arg8[%c0_71, %c0_72, %c0_73, %c0_74] : memref<1x1x1x8xf32, #tpu.memory_space<vmem>>, vector<1x1x1x8xf32>
      tpu.vector_store %arg8[%c0_71, %c0_72, %c0_73, %c0_74], %73 {strides = array<i32>} : memref<1x1x1x8xf32, #tpu.memory_space<vmem>>, vector<1x1x1x8xf32>,
      %75 = vector.shape_cast %67 : vector<256x8xf32> to vector<1x1x16x16x8xf32>
      %c0_75 = arith.constant 0 : index
      %c0_76 = arith.constant 0 : index
      %c0_77 = arith.constant 0 : index
      %c0_78 = arith.constant 0 : index
      %c0_79 = arith.constant 0 : index
      %76 = vector.load %arg6[%c0_75, %c0_76, %c0_77, %c0_78, %c0_79] : memref<1x1x16x16x8xf32, #tpu.memory_space<vmem>>, vector<1x1x16x16x8xf32>
      tpu.vector_store %arg6[%c0_75, %c0_76, %c0_77, %c0_78, %c0_79], %75 {strides = array<i32>} : memref<1x1x16x16x8xf32, #tpu.memory_space<vmem>>, vector<1x1x16x16x8xf32>,
    } else {
    }
    return
  }
  func.func @transform_0(%arg0: i32, %arg1: i32, %arg2: i32) -> (i32, i32, i32, i32, i32) {
    %0 = arith.addi %arg1, %arg2 : i32
    %c0_i32 = arith.constant 0 : i32
    %c0_i32_0 = arith.constant 0 : i32
    %c0_i32_1 = arith.constant 0 : i32
    %c0_i32_2 = arith.constant 0 : i32
    return %arg0, %0, %c0_i32, %c0_i32_0, %c0_i32_1 : i32, i32, i32, i32, i32
  }
  func.func @transform_1(%arg0: i32, %arg1: i32, %arg2: i32) -> (i32, i32, i32, i32, i32) {
    %c0_i32 = arith.constant 0 : i32
    %c0_i32_0 = arith.constant 0 : i32
    %c0_i32_1 = arith.constant 0 : i32
    %c0_i32_2 = arith.constant 0 : i32
    %c0_i32_3 = arith.constant 0 : i32
    return %arg2, %c0_i32, %c0_i32_0, %c0_i32_1, %c0_i32_2 : i32, i32, i32, i32, i32
  }
  func.func @transform_2(%arg0: i32, %arg1: i32, %arg2: i32) -> (i32, i32) {
    %c0_i32 = arith.constant 0 : i32
    %c0_i32_0 = arith.constant 0 : i32
    %c0_i32_1 = arith.constant 0 : i32
    return %c0_i32, %c0_i32_0 : i32, i32
  }
  func.func @transform_3(%arg0: i32, %arg1: i32, %arg2: i32) -> (i32, i32, i32, i32, i32) {
    %c0_i32 = arith.constant 0 : i32
    %c0_i32_0 = arith.constant 0 : i32
    %c0_i32_1 = arith.constant 0 : i32
    %c0_i32_2 = arith.constant 0 : i32
    return %arg0, %arg1, %c0_i32, %c0_i32_0, %c0_i32_1 : i32, i32, i32, i32, i32
  }
  func.func @transform_4(%arg0: i32, %arg1: i32, %arg2: i32) -> (i32, i32, i32, i32) {
    %c0_i32 = arith.constant 0 : i32
    %c0_i32_0 = arith.constant 0 : i32
    %c0_i32_1 = arith.constant 0 : i32
    return %arg0, %arg1, %c0_i32, %c0_i32_0 : i32, i32, i32, i32
  }
  func.func @transform_5(%arg0: i32, %arg1: i32, %arg2: i32) -> (i32, i32, i32, i32) {
    %c0_i32 = arith.constant 0 : i32
    %c0_i32_0 = arith.constant 0 : i32
    %c0_i32_1 = arith.constant 0 : i32
    return %arg0, %arg1, %c0_i32, %c0_i32_0 : i32, i32, i32, i32
  }
}

module attributes {stable_mosaic.version = 11 : i64} {
  func.func @_norm_lrelu_kernel(%arg0: i32, %arg1: i32, %arg2: memref<1x1x16x16x8xf32, #tpu.memory_space<vmem>>, %arg3: memref<1x1x8xf32, #tpu.memory_space<vmem>>, %arg4: memref<1x1x8xf32, #tpu.memory_space<vmem>>, %arg5: memref<1x1x16x16x8xf32, #tpu.memory_space<vmem>>) attributes {dimension_semantics = [#tpu.dimension_semantics<parallel>, #tpu.dimension_semantics<parallel>], iteration_bounds = array<i64: 2, 16>, scalar_prefetch = 0 : i64, scratch_operands = 0 : i64, tpu.core_type = #tpu.core_type<tc>, window_params = [{transform_indices = @transform_0, window_bounds = array<i64: 1, 1, 16, 16, 8>}, {transform_indices = @transform_1, window_bounds = array<i64: 1, 1, 8>}, {transform_indices = @transform_2, window_bounds = array<i64: 1, 1, 8>}, {transform_indices = @transform_3, window_bounds = array<i64: 1, 1, 16, 16, 8>}]} {
    %c0 = arith.constant 0 : index
    %c0_0 = arith.constant 0 : index
    %c0_1 = arith.constant 0 : index
    %c0_2 = arith.constant 0 : index
    %c0_3 = arith.constant 0 : index
    %0 = vector.load %arg2[%c0, %c0_0, %c0_1, %c0_2, %c0_3] : memref<1x1x16x16x8xf32, #tpu.memory_space<vmem>>, vector<1x1x16x16x8xf32>
    %c0_4 = arith.constant 0 : index
    %c0_5 = arith.constant 0 : index
    %c0_6 = arith.constant 0 : index
    %1 = vector.load %arg3[%c0_4, %c0_5, %c0_6] : memref<1x1x8xf32, #tpu.memory_space<vmem>>, vector<1x1x8xf32>
    %2 = vector.shape_cast %1 : vector<1x1x8xf32> to vector<1x1x1x1x8xf32>
    %c0_7 = arith.constant 0 : index
    %c0_8 = arith.constant 0 : index
    %c0_9 = arith.constant 0 : index
    %3 = vector.load %arg4[%c0_7, %c0_8, %c0_9] : memref<1x1x8xf32, #tpu.memory_space<vmem>>, vector<1x1x8xf32>
    %4 = vector.shape_cast %3 : vector<1x1x8xf32> to vector<1x1x1x1x8xf32>
    %5 = vector.broadcast %2 : vector<1x1x1x1x8xf32> to vector<1x1x16x16x8xf32>
    %6 = arith.subf %0, %5 : vector<1x1x16x16x8xf32>
    %7 = vector.broadcast %4 : vector<1x1x1x1x8xf32> to vector<1x1x16x16x8xf32>
    %8 = arith.mulf %6, %7 : vector<1x1x16x16x8xf32>
    %cst = arith.constant 0.000000e+00 : f32
    %9 = vector.broadcast %cst : f32 to vector<1x1x16x16x8xf32>
    %10 = arith.cmpf oge, %8, %9 : vector<1x1x16x16x8xf32>
    %cst_10 = arith.constant 2.000000e-01 : f32
    %11 = vector.broadcast %cst_10 : f32 to vector<1x1x16x16x8xf32>
    %12 = arith.mulf %11, %8 : vector<1x1x16x16x8xf32>
    %13 = arith.select %10, %8, %12 : vector<1x1x16x16x8xi1>, vector<1x1x16x16x8xf32>
    %c0_11 = arith.constant 0 : index
    %c0_12 = arith.constant 0 : index
    %c0_13 = arith.constant 0 : index
    %c0_14 = arith.constant 0 : index
    %c0_15 = arith.constant 0 : index
    %14 = vector.load %arg5[%c0_11, %c0_12, %c0_13, %c0_14, %c0_15] : memref<1x1x16x16x8xf32, #tpu.memory_space<vmem>>, vector<1x1x16x16x8xf32>
    tpu.vector_store %arg5[%c0_11, %c0_12, %c0_13, %c0_14, %c0_15], %13 {strides = array<i32>} : memref<1x1x16x16x8xf32, #tpu.memory_space<vmem>>, vector<1x1x16x16x8xf32>,
    return
  }
  func.func @transform_0(%arg0: i32, %arg1: i32) -> (i32, i32, i32, i32, i32) {
    %c0_i32 = arith.constant 0 : i32
    %c0_i32_0 = arith.constant 0 : i32
    %c0_i32_1 = arith.constant 0 : i32
    %c0_i32_2 = arith.constant 0 : i32
    return %arg0, %arg1, %c0_i32, %c0_i32_0, %c0_i32_1 : i32, i32, i32, i32, i32
  }
  func.func @transform_1(%arg0: i32, %arg1: i32) -> (i32, i32, i32) {
    %c0_i32 = arith.constant 0 : i32
    %c0_i32_0 = arith.constant 0 : i32
    %c0_i32_1 = arith.constant 0 : i32
    return %arg0, %c0_i32, %c0_i32_0 : i32, i32, i32
  }
  func.func @transform_2(%arg0: i32, %arg1: i32) -> (i32, i32, i32) {
    %c0_i32 = arith.constant 0 : i32
    %c0_i32_0 = arith.constant 0 : i32
    %c0_i32_1 = arith.constant 0 : i32
    return %arg0, %c0_i32, %c0_i32_0 : i32, i32, i32
  }
  func.func @transform_3(%arg0: i32, %arg1: i32) -> (i32, i32, i32, i32, i32) {
    %c0_i32 = arith.constant 0 : i32
    %c0_i32_0 = arith.constant 0 : i32
    %c0_i32_1 = arith.constant 0 : i32
    %c0_i32_2 = arith.constant 0 : i32
    return %arg0, %arg1, %c0_i32, %c0_i32_0, %c0_i32_1 : i32, i32, i32, i32, i32
  }
}

</mosaic_0001>

<bundles_post_ra>
// kernel: conv_block_forward.3
= control target key start
LH: loop header
LB: loop body
LE: loop exit
PB: predicated region body
PF: predicated region fallthrough
CT: control target
= control target key end

     0   :  { %s696_s12 = smov 0   ;;  %s698_s13 = smov 0   ;;  %s925_s0 = inlined_call_operand.vmem [shape: f32[2,16,16,16,8], index: 0, kind: input, shape index: {}]   ;;  %s926_s1 = inlined_call_operand.vmem [shape: f32[2,1,8], index: 1, kind: input, shape index: {}]   ;;  %s927_s2 = inlined_call_operand.vmem [shape: f32[2,1,8], index: 2, kind: input, shape index: {}]   ;;  %s928_s3 = inlined_call_operand.vmem [shape: f32[2,16,16,16,8], index: 3, kind: output, shape index: {}]  }
   0x1   :  { %s700_s14 = smov 0   ;;  %s702_s15 = smov 0  }
   0x2   :  { %s704_s16 = smov 0  }
   0x3 LB: > { %s22_s17 = sadd.s32 1, %s666_s14  ;;  %s25_s18 = sadd.s32 1, %s670_s15  ;;  %s674_s16 = sphi %s704_s16, %s13_s16   ;;  %s670_s15 = sphi %s702_s15, %s932_s15   ;;  %s666_s14 = sphi %s700_s14, %s931_s14   ;;  %s662_s13 = sphi %s698_s13, %s930_s13   ;;  %s658_s12 = sphi %s696_s12, %s929_s12  }
   0x4   : > { %p23_p0 = scmp.ge.s32.totalorder %s22_s17, 16  ;;  %p585_p1 = scmp.ge.s32.totalorder %s674_s16, 1 }
   0x5   : > { %p173_p2 = scmp.lt.s32.totalorder %s674_s16, 33 }
   0x6   : > { %s934_s17 = smov (%p23_p0, %s22_s17), 0  ;;  %s936_s18 = smov (!%p23_p0, %s25_s18), %s670_s15 }
   0x7   : > { %p174_p3 = pnand %p585_p1, %p173_p2  ;;  %p27_p4 = scmp.ge.s32.totalorder %s936_s18, 2 }
   0x8   : > { %p211_p5 = scmp.lt.s32.totalorder (!%p174_p3), %s662_s13, 1  ;;  %p213_p6 = scmp.lt.s32.totalorder (!%p174_p3), %s658_s12, 15 }
   0x9   : > { %s938_s18 = smov (%p27_p4, %s936_s18), 0  ;;  %177 = sbr.rel (%p174_p3) target bundleno = 65 (0x41), region = 32 }
   0xe   : > { %s940_s13 = smov (!%p211_p5, %s662_s13), 1  ;;  %s942_s12 = smov (!%p213_p6, %s658_s12), 15  ;;  %vm435_vm0 = vcmask 64512  }
   0xf   : > { %s587_s19 = sshll.u32 %s940_s13, 9  ;;  %s222_s22 = scalar_lea.vmem %s926_s1, %s940_s13 }
  0x10   : > { %s586_s23 = sshll.u32 %s942_s12, 5  ;;  %s225_s26 = scalar_lea.vmem %s927_s2, %s940_s13  ;;  %v734_v0 = vld [vmem:[%s222_s22] ss:$0 sm:$0xff] }
  0x11   : > { %s732_s27 = sadd.s32 %s587_s19, %s586_s23  ;;  %v742_v1 = vld [vmem:[%s225_s26] ss:$0 sm:$0xff] }
  0x12   : > { %s588_s28 = sshll.u32 %s732_s27, 3 }
  0x13   : > { %s740_s4 = scalar_lea.vmem %s925_s0, %s588_s28  ;;  %s770_s7 = scalar_lea.vmem %s928_s3, %s588_s28 }
  0x14   : > { %v235_v2 = vld [vmem:[%s740_s4] sm:$0xff]  ;;  %v236_v3 = vld [vmem:[%s740_s4 + $0x8] sm:$0xff]  ;;  %v237_v4 = vld [vmem:[%s740_s4 + $0x10] sm:$0xff] }
  0x15   : > { %v272_v5 = vsub.f32 %v235_v2, %v734_v0  ;;  %v273_v6 = vsub.f32 %v236_v3, %v734_v0  ;;  %v274_v7 = vsub.f32 %v237_v4, %v734_v0  ;;  %v238_v8 = vld [vmem:[%s740_s4 + $0x18] sm:$0xff]  ;;  %v239_v9 = vld [vmem:[%s740_s4 + $0x20] sm:$0xff]  ;;  %v240_v10 = vld [vmem:[%s740_s4 + $0x28] sm:$0xff] }
  0x16   : > { %v275_v11 = vsub.f32 %v238_v8, %v734_v0  ;;  %v276_v12 = vsub.f32 %v239_v9, %v734_v0  ;;  %v277_v13 = vsub.f32 %v240_v10, %v734_v0  ;;  %v241_v14 = vld [vmem:[%s740_s4 + $0x30] sm:$0xff]  ;;  %v242_v15 = vld [vmem:[%s740_s4 + $0x38] sm:$0xff]  ;;  %v243_v24 = vld [vmem:[%s740_s4 + $0x40] sm:$0xff] }
  0x17   : > { %v307_v16 = vmul.f32 %v742_v1, %v272_v5  ;;  %v308_v17 = vmul.f32 %v742_v1, %v273_v6  ;;  %v309_v18 = vmul.f32 %v742_v1, %v274_v7  ;;  %v278_v19 = vsub.f32 %v241_v14, %v734_v0  ;;  %v244_v32 = vld [vmem:[%s740_s4 + $0x48] sm:$0xff]  ;;  %v245_v33 = vld [vmem:[%s740_s4 + $0x50] sm:$0xff]  ;;  %v246_v34 = vld [vmem:[%s740_s4 + $0x58] sm:$0xff] }
  0x18   : > { %v310_v20 = vmul.f32 %v742_v1, %v275_v11  ;;  %v311_v21 = vmul.f32 %v742_v1, %v276_v12  ;;  %v312_v22 = vmul.f32 %v742_v1, %v277_v13  ;;  %v279_v23 = vsub.f32 %v242_v15, %v734_v0  ;;  %v247_v46 = vld [vmem:[%s740_s4 + $0x60] sm:$0xff]  ;;  %v248_v53 = vld [vmem:[%s740_s4 + $0x68] sm:$0xff]  ;;  %v249_v57 = vld [vmem:[%s740_s4 + $0x70] sm:$0xff] }
  0x19   : > { %vm339_vm1 = vcmp.ge.f32.partialorder %v307_v16, 0.0  ;;  %v371_v25 = vmul.f32 0.2, %v307_v16  ;;  %vm340_vm2 = vcmp.ge.f32.partialorder %v308_v17, 0.0  ;;  %v372_v26 = vmul.f32 0.2, %v308_v17 }
  0x1a   : > { %vm341_vm3 = vcmp.ge.f32.partialorder %v309_v18, 0.0  ;;  %v373_v27 = vmul.f32 0.2, %v309_v18  ;;  %vm342_vm4 = vcmp.ge.f32.partialorder %v310_v20, 0.0  ;;  %v374_v28 = vmul.f32 0.2, %v310_v20 }
  0x1b   : > { %v403_v29 = vsel %vm339_vm1, %v307_v16, %v371_v25  ;;  %v404_v30 = vsel %vm340_vm2, %v308_v17, %v372_v26  ;;  %vm343_vm5 = vcmp.ge.f32.partialorder %v311_v21, 0.0  ;;  %v375_v31 = vmul.f32 0.2, %v311_v21  ;;  %v250_v58 = vld [vmem:[%s740_s4 + $0x78] sm:$0xff]  ;;  %v251_v61 = vld [vmem:[%s740_s4 + $0x80] sm:$0xff]  ;;  %v252_v7 = vld [vmem:[%s740_s4 + $0x88] sm:$0xff] }
  0x1c   : > { %436 = vst.msk [vmem:[%s770_s7] sm:$0xff] %vm435_vm0, %v403_v29  ;;  %v405_v35 = vsel %vm341_vm3, %v309_v18, %v373_v27  ;;  %v406_v36 = vsel %vm342_vm4, %v310_v20, %v374_v28  ;;  %vm344_vm6 = vcmp.ge.f32.partialorder %v312_v22, 0.0  ;;  %v376_v37 = vmul.f32 0.2, %v312_v22  ;;  %v253_v8 = vld [vmem:[%s740_s4 + $0x90] sm:$0xff]  ;;  %v255_v29 = vld [vmem:[%s740_s4 + $0xa0] sm:$0xff] }
  0x1d   : > { %437 = vst.msk [vmem:[%s770_s7 + $0x8] sm:$0xff] %vm435_vm0, %v404_v30  ;;  %v407_v38 = vsel %vm343_vm5, %v311_v21, %v375_v31  ;;  %v313_v39 = vmul.f32 %v742_v1, %v278_v19  ;;  %v314_v40 = vmul.f32 %v742_v1, %v279_v23  ;;  %v280_v41 = vsub.f32 %v243_v24, %v734_v0  ;;  %v256_v30 = vld [vmem:[%s740_s4 + $0xa8] sm:$0xff]  ;;  %v257_v31 = vld [vmem:[%s740_s4 + $0xb0] sm:$0xff] }
  0x1e   : > { %438 = vst.msk [vmem:[%s770_s7 + $0x10] sm:$0xff] %vm435_vm0, %v405_v35  ;;  %v408_v42 = vsel %vm344_vm6, %v312_v22, %v376_v37  ;;  %v281_v43 = vsub.f32 %v244_v32, %v734_v0  ;;  %v282_v44 = vsub.f32 %v245_v33, %v734_v0  ;;  %v283_v45 = vsub.f32 %v246_v34, %v734_v0  ;;  %v254_v22 = vld [vmem:[%s740_s4 + $0x98] sm:$0xff] }
  0x1f   : > { %439 = vst.msk [vmem:[%s770_s7 + $0x18] sm:$0xff] %vm435_vm0, %v406_v36  ;;  %vm345_vm7 = vcmp.ge.f32.partialorder %v313_v39, 0.0  ;;  %v377_v47 = vmul.f32 0.2, %v313_v39  ;;  %vm346_vm8 = vcmp.ge.f32.partialorder %v314_v40, 0.0  ;;  %v315_v48 = vmul.f32 %v742_v1, %v280_v41  ;;  %v258_v35 = vld [vmem:[%s740_s4 + $0xb8] sm:$0xff] }
  0x20   : > { %440 = vst.msk [vmem:[%s770_s7 + $0x20] sm:$0xff] %vm435_vm0, %v407_v38  ;;  %v378_v49 = vmul.f32 0.2, %v314_v40  ;;  %v316_v50 = vmul.f32 %v742_v1, %v281_v43  ;;  %v317_v51 = vmul.f32 %v742_v1, %v282_v44  ;;  %v318_v52 = vmul.f32 %v742_v1, %v283_v45  ;;  %v259_v36 = vld [vmem:[%s740_s4 + $0xc0] sm:$0xff] }
  0x21   : > { %441 = vst.msk [vmem:[%s770_s7 + $0x28] sm:$0xff] %vm435_vm0, %v408_v42  ;;  %v409_v54 = vsel %vm345_vm7, %v313_v39, %v377_v47  ;;  %vm347_vm9 = vcmp.ge.f32.partialorder %v315_v48, 0.0  ;;  %v379_v55 = vmul.f32 0.2, %v315_v48  ;;  %v284_v56 = vsub.f32 %v247_v46, %v734_v0 }
  0x22   : > { %442 = vst.msk [vmem:[%s770_s7 + $0x30] sm:$0xff] %vm435_vm0, %v409_v54  ;;  %v410_v59 = vsel %vm346_vm8, %v314_v40, %v378_v49  ;;  %vm348_vm10 = vcmp.ge.f32.partialorder %v316_v50, 0.0  ;;  %v380_v60 = vmul.f32 0.2, %v316_v50  ;;  %vm349_vm11 = vcmp.ge.f32.partialorder %v317_v51, 0.0  ;;  %v260_v40 = vld [vmem:[%s740_s4 + $0xc8] sm:$0xff] }
  0x23   : > { %443 = vst.msk [vmem:[%s770_s7 + $0x38] sm:$0xff] %vm435_vm0, %v410_v59  ;;  %v411_v62 = vsel %vm347_vm9, %v315_v48, %v379_v55  ;;  %v381_v63 = vmul.f32 0.2, %v317_v51  ;;  %vm350_vm12 = vcmp.ge.f32.partialorder %v318_v52, 0.0  ;;  %v382_v2 = vmul.f32 0.2, %v318_v52 }
  0x24   : > { %444 = vst.msk [vmem:[%s770_s7 + $0x40] sm:$0xff] %vm435_vm0, %v411_v62  ;;  %v412_v3 = vsel %vm348_vm10, %v316_v50, %v380_v60  ;;  %v319_v4 = vmul.f32 %v742_v1, %v284_v56  ;;  %v285_v5 = vsub.f32 %v248_v53, %v734_v0  ;;  %v286_v6 = vsub.f32 %v249_v57, %v734_v0  ;;  %v261_v56 = vld [vmem:[%s740_s4 + $0xd0] sm:$0xff]  ;;  %v262_v57 = vld [vmem:[%s740_s4 + $0xd8] sm:$0xff]  ;;  %v263_v62 = vld [vmem:[%s740_s4 + $0xe0] sm:$0xff] }
  0x25   : > { %445 = vst.msk [vmem:[%s770_s7 + $0x48] sm:$0xff] %vm435_vm0, %v412_v3  ;;  %v413_v9 = vsel %vm349_vm11, %v317_v51, %v381_v63  ;;  %v414_v10 = vsel %vm350_vm12, %v318_v52, %v382_v2  ;;  %v287_v11 = vsub.f32 %v250_v58, %v734_v0  ;;  %v288_v12 = vsub.f32 %v251_v61, %v734_v0  ;;  %v264_v63 = vld [vmem:[%s740_s4 + $0xe8] sm:$0xff] }
  0x26   : > { %446 = vst.msk [vmem:[%s770_s7 + $0x50] sm:$0xff] %vm435_vm0, %v413_v9  ;;  %vm351_vm13 = vcmp.ge.f32.partialorder %v319_v4, 0.0  ;;  %v383_v13 = vmul.f32 0.2, %v319_v4  ;;  %v320_v14 = vmul.f32 %v742_v1, %v285_v5  ;;  %v321_v15 = vmul.f32 %v742_v1, %v286_v6  ;;  %v265_v9 = vld [vmem:[%s740_s4 + $0xf0] sm:$0xff] }
  0x27   : > { %447 = vst.msk [vmem:[%s770_s7 + $0x58] sm:$0xff] %vm435_vm0, %v414_v10  ;;  %v322_v16 = vmul.f32 %v742_v1, %v287_v11  ;;  %v323_v17 = vmul.f32 %v742_v1, %v288_v12  ;;  %v289_v18 = vsub.f32 %v252_v7, %v734_v0  ;;  %v290_v19 = vsub.f32 %v253_v8, %v734_v0 }
  0x28   : > { %v415_v20 = vsel %vm351_vm13, %v319_v4, %v383_v13  ;;  %vm352_vm14 = vcmp.ge.f32.partialorder %v320_v14, 0.0  ;;  %v384_v21 = vmul.f32 0.2, %v320_v14  ;;  %vm353_vm15 = vcmp.ge.f32.partialorder %v321_v15, 0.0 }
  0x29   : > { %448 = vst.msk [vmem:[%s770_s7 + $0x60] sm:$0xff] %vm435_vm0, %v415_v20  ;;  %v385_v23 = vmul.f32 0.2, %v321_v15  ;;  %vm354_vm1 = vcmp.ge.f32.partialorder %v322_v16, 0.0  ;;  %v386_v24 = vmul.f32 0.2, %v322_v16  ;;  %v324_v25 = vmul.f32 %v742_v1, %v289_v18 }
  0x2a   : > { %v416_v26 = vsel %vm352_vm14, %v320_v14, %v384_v21  ;;  %vm355_vm2 = vcmp.ge.f32.partialorder %v323_v17, 0.0  ;;  %v387_v27 = vmul.f32 0.2, %v323_v17  ;;  %v325_v28 = vmul.f32 %v742_v1, %v290_v19  ;;  %v266_v14 = vld [vmem:[%s740_s4 + $0xf8] sm:$0xff] }
  0x2b   : > { %449 = vst.msk [vmem:[%s770_s7 + $0x68] sm:$0xff] %vm435_vm0, %v416_v26  ;;  %v417_v32 = vsel %vm353_vm15, %v321_v15, %v385_v23  ;;  %v418_v33 = vsel %vm354_vm1, %v322_v16, %v386_v24  ;;  %vm356_vm3 = vcmp.ge.f32.partialorder %v324_v25, 0.0  ;;  %v388_v34 = vmul.f32 0.2, %v324_v25 }
  0x2c   : > { %450 = vst.msk [vmem:[%s770_s7 + $0x70] sm:$0xff] %vm435_vm0, %v417_v32  ;;  %v419_v37 = vsel %vm355_vm2, %v323_v17, %v387_v27  ;;  %vm357_vm4 = vcmp.ge.f32.partialorder %v325_v28, 0.0  ;;  %v389_v38 = vmul.f32 0.2, %v325_v28  ;;  %v291_v39 = vsub.f32 %v254_v22, %v734_v0 }
  0x2d   : > { %451 = vst.msk [vmem:[%s770_s7 + $0x78] sm:$0xff] %vm435_vm0, %v418_v33  ;;  %v420_v41 = vsel %vm356_vm3, %v324_v25, %v388_v34  ;;  %v292_v42 = vsub.f32 %v255_v29, %v734_v0  ;;  %v293_v43 = vsub.f32 %v256_v30, %v734_v0  ;;  %v294_v44 = vsub.f32 %v257_v31, %v734_v0 }
  0x2e   : > { %452 = vst.msk [vmem:[%s770_s7 + $0x80] sm:$0xff] %vm435_vm0, %v419_v37  ;;  %v421_v45 = vsel %vm357_vm4, %v325_v28, %v389_v38  ;;  %v326_v46 = vmul.f32 %v742_v1, %v291_v39  ;;  %v295_v47 = vsub.f32 %v258_v35, %v734_v0  ;;  %v296_v48 = vsub.f32 %v259_v36, %v734_v0 }
  0x2f   : > { %453 = vst.msk [vmem:[%s770_s7 + $0x88] sm:$0xff] %vm435_vm0, %v420_v41  ;;  %v327_v49 = vmul.f32 %v742_v1, %v292_v42  ;;  %v328_v50 = vmul.f32 %v742_v1, %v293_v43  ;;  %v329_v51 = vmul.f32 %v742_v1, %v294_v44  ;;  %v297_v52 = vsub.f32 %v260_v40, %v734_v0 }
  0x30   : > { %454 = vst.msk [vmem:[%s770_s7 + $0x90] sm:$0xff] %vm435_vm0, %v421_v45  ;;  %vm358_vm5 = vcmp.ge.f32.partialorder %v326_v46, 0.0  ;;  %v390_v53 = vmul.f32 0.2, %v326_v46  ;;  %v330_v54 = vmul.f32 %v742_v1, %v295_v47  ;;  %v331_v55 = vmul.f32 %v742_v1, %v296_v48 }
  0x31   : > { %vm359_vm6 = vcmp.ge.f32.partialorder %v327_v49, 0.0  ;;  %v391_v58 = vmul.f32 0.2, %v327_v49  ;;  %vm360_vm7 = vcmp.ge.f32.partialorder %v328_v50, 0.0  ;;  %v392_v59 = vmul.f32 0.2, %v328_v50 }
  0x32   : > { %v422_v60 = vsel %vm358_vm5, %v326_v46, %v390_v53  ;;  %vm361_vm8 = vcmp.ge.f32.partialorder %v329_v51, 0.0  ;;  %v393_v61 = vmul.f32 0.2, %v329_v51  ;;  %vm362_vm9 = vcmp.ge.f32.partialorder %v330_v54, 0.0 }
  0x33   : > { %455 = vst.msk [vmem:[%s770_s7 + $0x98] sm:$0xff] %vm435_vm0, %v422_v60  ;;  %v423_v2 = vsel %vm359_vm6, %v327_v49, %v391_v58  ;;  %v424_v3 = vsel %vm360_vm7, %v328_v50, %v392_v59  ;;  %v394_v4 = vmul.f32 0.2, %v330_v54  ;;  %vm363_vm10 = vcmp.ge.f32.partialorder %v331_v55, 0.0 }
  0x34   : > { %456 = vst.msk [vmem:[%s770_s7 + $0xa0] sm:$0xff] %vm435_vm0, %v423_v2  ;;  %v425_v5 = vsel %vm361_vm8, %v329_v51, %v393_v61  ;;  %v395_v6 = vmul.f32 0.2, %v331_v55  ;;  %v332_v7 = vmul.f32 %v742_v1, %v297_v52  ;;  %v298_v8 = vsub.f32 %v261_v56, %v734_v0 }
  0x35   : > { %457 = vst.msk [vmem:[%s770_s7 + $0xa8] sm:$0xff] %vm435_vm0, %v424_v3  ;;  %v426_v10 = vsel %vm362_vm9, %v330_v54, %v394_v4  ;;  %v299_v11 = vsub.f32 %v262_v57, %v734_v0  ;;  %v300_v12 = vsub.f32 %v263_v62, %v734_v0  ;;  %v301_v13 = vsub.f32 %v264_v63, %v734_v0 }
  0x36   : > { %458 = vst.msk [vmem:[%s770_s7 + $0xb0] sm:$0xff] %vm435_vm0, %v425_v5  ;;  %v427_v15 = vsel %vm363_vm10, %v331_v55, %v395_v6  ;;  %vm364_vm11 = vcmp.ge.f32.partialorder %v332_v7, 0.0  ;;  %v396_v16 = vmul.f32 0.2, %v332_v7  ;;  %v333_v17 = vmul.f32 %v742_v1, %v298_v8 }
  0x37   : > { %459 = vst.msk [vmem:[%s770_s7 + $0xb8] sm:$0xff] %vm435_vm0, %v426_v10  ;;  %v334_v18 = vmul.f32 %v742_v1, %v299_v11  ;;  %v335_v19 = vmul.f32 %v742_v1, %v300_v12  ;;  %v336_v20 = vmul.f32 %v742_v1, %v301_v13  ;;  %v302_v21 = vsub.f32 %v265_v9, %v734_v0 }
  0x38   : > { %460 = vst.msk [vmem:[%s770_s7 + $0xc0] sm:$0xff] %vm435_vm0, %v427_v15  ;;  %v428_v22 = vsel %vm364_vm11, %v332_v7, %v396_v16  ;;  %vm365_vm12 = vcmp.ge.f32.partialorder %v333_v17, 0.0  ;;  %v397_v23 = vmul.f32 0.2, %v333_v17  ;;  %v303_v24 = vsub.f32 %v266_v14, %v734_v0 }
  0x39   : > { %461 = vst.msk [vmem:[%s770_s7 + $0xc8] sm:$0xff] %vm435_vm0, %v428_v22  ;;  %vm366_vm13 = vcmp.ge.f32.partialorder %v334_v18, 0.0  ;;  %v398_v25 = vmul.f32 0.2, %v334_v18  ;;  %vm367_vm14 = vcmp.ge.f32.partialorder %v335_v19, 0.0  ;;  %vm368_vm15 = vcmp.ge.f32.partialorder %v336_v20, 0.0 }
  0x3a   : > { %v429_v26 = vsel %vm365_vm12, %v333_v17, %v397_v23  ;;  %v399_v27 = vmul.f32 0.2, %v335_v19  ;;  %v400_v28 = vmul.f32 0.2, %v336_v20  ;;  %v337_v29 = vmul.f32 %v742_v1, %v302_v21 }
  0x3b   : > { %462 = vst.msk [vmem:[%s770_s7 + $0xd0] sm:$0xff] %vm435_vm0, %v429_v26  ;;  %v430_v30 = vsel %vm366_vm13, %v334_v18, %v398_v25  ;;  %v338_v0 = vmul.f32 %v742_v1, %v303_v24 }
  0x3c   : > { %463 = vst.msk [vmem:[%s770_s7 + $0xd8] sm:$0xff] %vm435_vm0, %v430_v30  ;;  %v431_v31 = vsel %vm367_vm14, %v335_v19, %v399_v27  ;;  %v432_v32 = vsel %vm368_vm15, %v336_v20, %v400_v28  ;;  %vm369_vm1 = vcmp.ge.f32.partialorder %v337_v29, 0.0  ;;  %v401_v33 = vmul.f32 0.2, %v337_v29 }
  0x3d   : > { %464 = vst.msk [vmem:[%s770_s7 + $0xe0] sm:$0xff] %vm435_vm0, %v431_v31  ;;  %vm370_vm2 = vcmp.ge.f32.partialorder %v338_v0, 0.0  ;;  %v402_v34 = vmul.f32 0.2, %v338_v0 }
  0x3e   : > { %465 = vst.msk [vmem:[%s770_s7 + $0xe8] sm:$0xff] %vm435_vm0, %v432_v32  ;;  %v433_v35 = vsel %vm369_vm1, %v337_v29, %v401_v33 }
  0x3f   : > { %466 = vst.msk [vmem:[%s770_s7 + $0xf0] sm:$0xff] %vm435_vm0, %v433_v35  ;;  %v434_v36 = vsel %vm370_vm2, %v338_v0, %v402_v34 }
  0x40   : > { %467 = vst.msk [vmem:[%s770_s7 + $0xf8] sm:$0xff] %vm435_vm0, %v434_v36 }
  0x41 PF: > { %s13_s16 = sadd.s32 1, %s674_s16   ;;  %s929_s12 = smov %s666_s14 }
  0x42   : > { %p10_p7 = scmp.ge.s32.totalorder %s13_s16, 34   ;;  %s930_s13 = smov %s670_s15 }
  0x43   : > { %s931_s14 = smov %s934_s17  ;;  %s932_s15 = smov %s938_s18 }
  0x44   :  { %12 = sbr.rel (!%p10_p7) target bundleno = 3 (0x3), region = 68 }

// kernel: conv_block_forward.2
= control target key start
LH: loop header
LB: loop body
LE: loop exit
PB: predicated region body
PF: predicated region fallthrough
CT: control target
= control target key end

     0   :  { %s3442_s18 = smov 0   ;;  %s3444_s19 = smov 0   ;;  %s4982_s0 = inlined_call_operand.vmem [shape: bf16[2,18,18,18,4], index: 0, kind: input, shape index: {}]   ;;  %s4983_s1 = inlined_call_operand.vmem [shape: bf16[3,3,3,4,8], index: 1, kind: input, shape index: {}]   ;;  %s4984_s2 = inlined_call_operand.vmem [shape: f32[1,8], index: 2, kind: input, shape index: {}]   ;;  %s4985_s3 = inlined_call_operand.vmem [shape: f32[2,16,16,16,8], index: 3, kind: output, shape index: {0}]   ;;  %s4986_s4 = inlined_call_operand.vmem [shape: f32[2,16,1,8], index: 4, kind: output, shape index: {1}]   ;;  %s4987_s5 = inlined_call_operand.vmem [shape: f32[2,16,1,8], index: 5, kind: output, shape index: {2}]  }
   0x1   :  { %5028 = sst [smem:[#allocation45_spill]] %s4982_s0  ;;  %s3446_s20 = smov 0  }
   0x2   :  { %s3448_s21 = smov 0   ;;  %s3450_s22 = smov 0  }
   0x3   :  { %s3452_s23 = smov 0   ;;  %s3454_s24 = smov 0  }
   0x4 LB: > { %s28_s25 = sadd.s32 1, %s3397_s21  ;;  %s31_s26 = sadd.s32 1, %s3401_s22  ;;  %s3409_s24 = sphi %s3454_s24, %s16_s24   ;;  %s3405_s23 = sphi %s3452_s23, %s5137_s23   ;;  %s3401_s22 = sphi %s3450_s22, %s5136_s22   ;;  %s3397_s21 = sphi %s3448_s21, %s5135_s21   ;;  %s3393_s20 = sphi %s3446_s20, %s5134_s20   ;;  %s3389_s19 = sphi %s3444_s19, %s5133_s19   ;;  %s3385_s18 = sphi %s3442_s18, %s5132_s18  }
   0x5   : > { %p29_p0 = scmp.ge.s32.totalorder %s28_s25, 3  ;;  %p3010_p1 = scmp.ge.s32.totalorder %s3409_s24, 1 }
   0x6   : > { %p237_p2 = scmp.lt.s32.totalorder %s3409_s24, 97  ;;  %s35_s27 = sadd.s32 1, %s3405_s23 }
   0x7   : > { %s5139_s25 = smov (%p29_p0, %s28_s25), 0  ;;  %s5141_s26 = smov (!%p29_p0, %s31_s26), %s3401_s22 }
   0x8   : > { %p238_p3 = pnand %p3010_p1, %p237_p2  ;;  %p33_p4 = scmp.ge.s32.totalorder %s5141_s26, 16 }
   0xa   : > { %s5143_s26 = smov (%p33_p4, %s5141_s26), 0  ;;  %s5145_s27 = smov (!%p33_p4, %s35_s27), %s3405_s23 }
   0xb   : > { %p37_p5 = scmp.ge.s32.totalorder %s5145_s27, 2  ;;  %241 = sbr.rel (%p238_p3) target bundleno = 898 (0x382), region = 32 }
   0xd   : > { %s5147_s27 = smov (%p37_p5, %s5145_s27), 0 }
   0xe   : > { %5029 = sst [smem:[#allocation3_spill]] %s5147_s27 }
  0x10   : > { %s293_s28 = sadd.s32 %s3385_s18, %s3389_s19  ;;  %p294_p6 = scmp.lt.s32.totalorder %s3393_s20, 1 }
  0x11   : > { %p296_p7 = scmp.lt.s32.totalorder %s293_s28, 17  ;;  %p304_p8 = scmp.lt.s32.totalorder %s3385_s18, 2 }
  0x12   : > { %s5149_s20 = smov (!%p294_p6, %s3393_s20), 1  ;;  %p311_p9 = scmp.lt.s32.totalorder %s3389_s19, 15 }
  0x13   : > { %s5151_s28 = smov (!%p296_p7, %s293_s28), 17  ;;  %s3286_s29 = smul.u32 972, %s5149_s20 }
  0x14   : > { %s3285_s30 = smul.u32 54, %s5151_s28  ;;  %s5030_s0 = sld [smem:[#allocation45_spill]] }
  0x15   : > { %s305_s6 = scalar_select %p304_p8, %s3385_s18, 2 }
  0x16   : > { %s300_s7 = sadd.s32 %s3286_s29, %s3285_s30  ;;  %s3014_s13 = sshll.u32 %s5149_s20, 9 }
  0x17   : > { %s3011_s8 = sshll.u32 %s300_s7, 2  ;;  %s3287_s9 = smul.u32 18, %s305_s6 }
  0x18   : > { %s3016_s17 = sshll.u32 %s5149_s20, 4  ;;  %s5153_s19 = smov (!%p311_p9, %s3389_s19), 15 }
  0x19   : > { %s3501_s16 = scalar_lea.vmem %s4983_s1, %s3287_s9  ;;  %s3013_s27 = sshll.u32 %s5153_s19, 5 }
  0x1a   : > { %s3496_s12 = scalar_lea.vmem %s5030_s0, %s3011_s8  ;;  %s3504_s28 = sadd.s32 %s3016_s17, %s5153_s19 }
  0x1b   : > { %s315_s29 = sadd.s32 %s3014_s13, %s3013_s27  ;;  %s324_s7 = scalar_lea.vmem %s4986_s4, %s3504_s28 }
  0x1c   : > { %s3015_s8 = sshll.u32 %s315_s29, 3  ;;  %s331_s0 = scalar_lea.vmem %s4987_s5, %s3504_s28 }
  0x1d   : > { %s3517_s20 = scalar_lea.vmem %s4985_s3, %s3015_s8  ;;  %p3018_p10 = scmp.ne.s32.totalorder %s3385_s18, 0 }
  0x1f   : > { %336 = sbr.rel (%p3018_p10) target bundleno = 69 (0x45), region = 36 }
  0x24   : > { %vm337_vm0 = vcmask 64512   ;;  %v3411_v0 = vmov 0.0  }
  0x25   : > { %338 = vst.msk [vmem:[#allocation2] sm:$0xff] %vm337_vm0, %v3411_v0 }
  0x26   : > { %339 = vst.msk [vmem:[#allocation2 + $0x8] sm:$0xff] %vm337_vm0, %v3411_v0 }
  0x27   : > { %340 = vst.msk [vmem:[#allocation2 + $0x10] sm:$0xff] %vm337_vm0, %v3411_v0 }
  0x28   : > { %341 = vst.msk [vmem:[#allocation2 + $0x18] sm:$0xff] %vm337_vm0, %v3411_v0 }
  0x29   : > { %342 = vst.msk [vmem:[#allocation2 + $0x20] sm:$0xff] %vm337_vm0, %v3411_v0 }
  0x2a   : > { %343 = vst.msk [vmem:[#allocation2 + $0x28] sm:$0xff] %vm337_vm0, %v3411_v0 }
  0x2b   : > { %344 = vst.msk [vmem:[#allocation2 + $0x30] sm:$0xff] %vm337_vm0, %v3411_v0 }
  0x2c   : > { %345 = vst.msk [vmem:[#allocation2 + $0x38] sm:$0xff] %vm337_vm0, %v3411_v0 }
  0x2d   : > { %346 = vst.msk [vmem:[#allocation2 + $0x40] sm:$0xff] %vm337_vm0, %v3411_v0 }
  0x2e   : > { %347 = vst.msk [vmem:[#allocation2 + $0x48] sm:$0xff] %vm337_vm0, %v3411_v0 }
  0x2f   : > { %348 = vst.msk [vmem:[#allocation2 + $0x50] sm:$0xff] %vm337_vm0, %v3411_v0 }
  0x30   : > { %349 = vst.msk [vmem:[#allocation2 + $0x58] sm:$0xff] %vm337_vm0, %v3411_v0 }
  0x31   : > { %350 = vst.msk [vmem:[#allocation2 + $0x60] sm:$0xff] %vm337_vm0, %v3411_v0 }
  0x32   : > { %351 = vst.msk [vmem:[#allocation2 + $0x68] sm:$0xff] %vm337_vm0, %v3411_v0 }
  0x33   : > { %352 = vst.msk [vmem:[#allocation2 + $0x70] sm:$0xff] %vm337_vm0, %v3411_v0 }
  0x34   : > { %353 = vst.msk [vmem:[#allocation2 + $0x78] sm:$0xff] %vm337_vm0, %v3411_v0 }
  0x35   : > { %354 = vst.msk [vmem:[#allocation2 + $0x80] sm:$0xff] %vm337_vm0, %v3411_v0 }
  0x36   : > { %355 = vst.msk [vmem:[#allocation2 + $0x88] sm:$0xff] %vm337_vm0, %v3411_v0 }
  0x37   : > { %356 = vst.msk [vmem:[#allocation2 + $0x90] sm:$0xff] %vm337_vm0, %v3411_v0 }
  0x38   : > { %357 = vst.msk [vmem:[#allocation2 + $0x98] sm:$0xff] %vm337_vm0, %v3411_v0 }
  0x39   : > { %358 = vst.msk [vmem:[#allocation2 + $0xa0] sm:$0xff] %vm337_vm0, %v3411_v0 }
  0x3a   : > { %359 = vst.msk [vmem:[#allocation2 + $0xa8] sm:$0xff] %vm337_vm0, %v3411_v0 }
  0x3b   : > { %360 = vst.msk [vmem:[#allocation2 + $0xb0] sm:$0xff] %vm337_vm0, %v3411_v0 }
  0x3c   : > { %361 = vst.msk [vmem:[#allocation2 + $0xb8] sm:$0xff] %vm337_vm0, %v3411_v0 }
  0x3d   : > { %362 = vst.msk [vmem:[#allocation2 + $0xc0] sm:$0xff] %vm337_vm0, %v3411_v0 }
  0x3e   : > { %363 = vst.msk [vmem:[#allocation2 + $0xc8] sm:$0xff] %vm337_vm0, %v3411_v0 }
  0x3f   : > { %364 = vst.msk [vmem:[#allocation2 + $0xd0] sm:$0xff] %vm337_vm0, %v3411_v0 }
  0x40   : > { %365 = vst.msk [vmem:[#allocation2 + $0xd8] sm:$0xff] %vm337_vm0, %v3411_v0 }
  0x41   : > { %366 = vst.msk [vmem:[#allocation2 + $0xe0] sm:$0xff] %vm337_vm0, %v3411_v0 }
  0x42   : > { %367 = vst.msk [vmem:[#allocation2 + $0xe8] sm:$0xff] %vm337_vm0, %v3411_v0 }
  0x43   : > { %368 = vst.msk [vmem:[#allocation2 + $0xf0] sm:$0xff] %vm337_vm0, %v3411_v0 }
  0x44   : > { %369 = vst.msk [vmem:[#allocation2 + $0xf8] sm:$0xff] %vm337_vm0, %v3411_v0 }
  0x45 PF: > { %v3019_v1 = vld [vmem:[%s3501_s16 + $0x2] sm:$0x3]  ;;  %vm911_vm1 = vcmask 1041408   ;;  %v3554_v2 = vld [vmem:[%s3496_s12 + $0x30] sm:$0xf]  ;;  %vm862_vm4 = vcmask 31744  }
  0x46   : > { %v913_v3 = vsel %vm911_vm1, %v3019_v1, 0  ;;  %v3558_v4 = vld [vmem:[%s3496_s12 + $0x34] sm:$0xf]  ;;  %v3561_v5 = vld [vmem:[%s3496_s12 + $0x38] sm:$0x1]  ;;  %v525_v6 = vshrl.u32 %v3554_v2, 16 }
  0x47   : > { %3282 = vmatpush.bf16.msra.mxu1 %v913_v3  ;;  %3283 = vmatpush.bf16.msra.mxu2 %v913_v3  ;;  %vm425_vm2 = vsmask.f32 3328  ;;  %vm426_vm3 = vsmask.f32 7440  ;;  %v528_v7 = vshll.u32 %v3554_v2, 16  ;;  %v534_v8 = vshll.u32 %v3558_v4, 16 }
  0x48   : > { %3284 = vmatpush.bf16.msra.mxu3 %v913_v3  ;;  %922 = vmatpush.bf16.msra.mxu0 %v913_v3  ;;  %v527_v9 = vrot.slane %v525_v6, 4  ;;  %v538_v10 = vshrl.u32 %v3558_v4, 16  ;;  %v544_v11 = vshll.u32 %v3561_v5, 16  ;;  %v394_v12 = vld [vmem:[%s3496_s12 + $0x60] sm:$0xf]  ;;  %vm3574_vm5 = vmor %vm425_vm2, %vm426_vm3  ;;  %vm1240_vm6 = vcmask 1042432  }
  0x49   : > { %v530_v13 = vrot.slane %v528_v7, 5  ;;  %v536_v14 = vrot.slane %v534_v8, 5  ;;  %v395_v15 = vld [vmem:[%s3496_s12 + $0x64] sm:$0xf]  ;;  %v396_v16 = vld [vmem:[%s3496_s12 + $0x68] sm:$0x1] }
  0x4a   : > { %v540_v17 = vrot.slane %v538_v10, 4  ;;  %v621_v18 = vshrl.u32 %v394_v12, 16  ;;  %v624_v19 = vshll.u32 %v394_v12, 16  ;;  %v630_v21 = vshll.u32 %v395_v15, 16  ;;  %v406_v24 = vld [vmem:[%s3496_s12 + $0x90] sm:$0xf] }
  0x4b   : > { %v531_v20 = vor.u32 %v530_v13, %v527_v9  ;;  %v634_v22 = vshrl.u32 %v395_v15, 16  ;;  %v640_v23 = vshll.u32 %v396_v16, 16  ;;  %v546_v27 = vrot.slane %v544_v11, 5  ;;  %v407_v30 = vld [vmem:[%s3496_s12 + $0x94] sm:$0xf]  ;;  %p3261_p11 = scmp.ne.s32.totalorder %s3385_s18, 2 }
  0x4c   : > { %v541_v26 = vor.u32 %v540_v17, %v536_v14  ;;  %v623_v28 = vrot.slane %v621_v18, 4  ;;  %v626_v29 = vrot.slane %v624_v19, 5  ;;  %v632_v32 = vrot.slane %v630_v21, 5  ;;  %v408_v41 = vld [vmem:[%s3496_s12 + $0x98] sm:$0x1] }
  0x4d   : > { %v532_v31 = vrot.slane %v531_v20, 4  ;;  %v636_v33 = vrot.slane %v634_v22, 4  ;;  %v642_v34 = vrot.slane %v640_v23, 5  ;;  %v717_v37 = vshrl.u32 %v406_v24, 16  ;;  %v3132_v52 = vld [vmem:[%s3501_s16 + $0x4] sm:$0x3] }
  0x4e   : > { %v542_v35 = vrot.slane %v541_v26, 4  ;;  %v627_v36 = vor.u32 %v626_v29, %v623_v28  ;;  %v720_v38 = vshll.u32 %v406_v24, 16  ;;  %v726_v42 = vshll.u32 %v407_v30, 16  ;;  %v3588_v56 = vld [vmem:[%s3496_s12] sm:$0xf] }
  0x4f   : > { %v537_v39 = vsel %vm3574_vm5, %v532_v31, %v536_v14  ;;  %v637_v40 = vor.u32 %v636_v33, %v632_v32  ;;  %v730_v43 = vshrl.u32 %v407_v30, 16  ;;  %v719_v47 = vrot.slane %v717_v37, 4  ;;  %v3591_v57 = vld [vmem:[%s3496_s12 + $0x4] sm:$0xf]  ;;  %v3598_v62 = vld [vmem:[%s3496_s12 + $0x8] sm:$0x1] }
  0x50   : > { %v547_v44 = vsel %vm3574_vm5, %v542_v35, %v546_v27  ;;  %v822_v45 = vunpack.c.l.b16 %v537_v39  ;;  %v628_v46 = vrot.slane %v627_v36, 4  ;;  %v722_v50 = vrot.slane %v720_v38, 5  ;;  %v3149_v6 = vld [vmem:[%s3501_s16 + $0x6] sm:$0x3]  ;;  %v424_v11 = vld [vmem:[%s3501_s16] sm:$0x3] }
  0x51   : > { %v823_v48 = vunpack.c.l.b16 %v547_v44  ;;  %v638_v49 = vrot.slane %v637_v40, 4  ;;  %v728_v51 = vrot.slane %v726_v42, 5  ;;  %v732_v54 = vrot.slane %v730_v43, 4  ;;  %v3170_v16 = vld [vmem:[%s3501_s16 + $0x8] sm:$0x3] }
  0x52   : > { %v633_v53 = vsel %vm3574_vm5, %v628_v46, %v632_v32  ;;  %v736_v55 = vshll.u32 %v408_v41, 16  ;;  %v723_v61 = vor.u32 %v722_v50, %v719_v47  ;;  %v1454_v3 = vsel %vm911_vm1, %v3132_v52, 0  ;;  %v3616_v21 = vld [vmem:[%s3496_s12 + $0x3c] sm:$0xf]  ;;  %v3623_v26 = vld [vmem:[%s3496_s12 + $0x40] sm:$0xf] }
  0x53   : > { %v3593_v58 = vpack.c.b16 %v823_v48, %v822_v45  ;;  %v643_v59 = vsel %vm3574_vm5, %v638_v49, %v642_v34  ;;  %v830_v60 = vunpack.c.l.b16 %v633_v53  ;;  %v733_v0 = vor.u32 %v732_v54, %v728_v51  ;;  %1463 = vmatpush.bf16.msrb.mxu2 %v1454_v3  ;;  %v3627_v31 = vld [vmem:[%s3496_s12 + $0x44] sm:$0x1]  ;;  %v3633_v36 = vld [vmem:[%s3496_s12 + $0x6c] sm:$0xf]  ;;  %v3642_v45 = vld [vmem:[%s3496_s12 + $0x70] sm:$0xf] }
  0x54   : > { %v831_v63 = vunpack.c.l.b16 %v643_v59  ;;  %v738_v1 = vrot.slane %v736_v55, 5  ;;  %v724_v7 = vrot.slane %v723_v61, 4  ;;  %v429_v8 = vshrl.u32 %v3588_v56, 16  ;;  %v3649_v49 = vld [vmem:[%s3496_s12 + $0x74] sm:$0x1] }
  0x55   : > { %3024 = vmatmul.msk.bf16.vlgmr.msra.gmra.mxu1 %vm862_vm4, %v3593_v58  ;;  %v432_v9 = vshll.u32 %v3588_v56, 16  ;;  %v438_v10 = vshll.u32 %v3591_v57, 16  ;;  %v734_v13 = vrot.slane %v733_v0, 4  ;;  %v442_v14 = vshrl.u32 %v3591_v57, 16 }
  0x56   : > { %v3608_v12 = vpack.c.b16 %v831_v63, %v830_v60  ;;  %v448_v15 = vshll.u32 %v3598_v62, 16  ;;  %v729_v17 = vsel %vm3574_vm5, %v724_v7, %v728_v51  ;;  %v431_v18 = vrot.slane %v429_v8, 4 }
  0x57   : > { %v434_v19 = vrot.slane %v432_v9, 5  ;;  %v440_v20 = vrot.slane %v438_v10, 5  ;;  %v739_v22 = vsel %vm3574_vm5, %v734_v13, %v738_v1  ;;  %v838_v23 = vunpack.c.l.b16 %v729_v17  ;;  %v410_v10 = vld [vmem:[%s3496_s12 + $0xa0] sm:$0xf] }
  0x58   : > { %5033 = vst [vmem:[#allocation4_spill] sm:$0xff] %v3608_v12  ;;  %3028 = vmatmul.msk.bf16.vlgmr.msra.gmra.mxu2 %vm862_vm4, %v3608_v12  ;;  %v444_v24 = vrot.slane %v442_v14, 4  ;;  %v839_v27 = vunpack.c.l.b16 %v739_v22  ;;  %v450_v29 = vrot.slane %v448_v15, 5  ;;  %v1588_v30 = vsel %vm911_vm1, %v3149_v6, 0  ;;  %v409_v6 = vld [vmem:[%s3496_s12 + $0x9c] sm:$0xf] }
  0x59   : > { %v435_v28 = vor.u32 %v434_v19, %v431_v18  ;;  %1597 = vmatpush.bf16.msrb.mxu3 %v1588_v30  ;;  %v1133_v33 = vsel %vm911_vm1, %v424_v11, 0  ;;  %v1744_v34 = vsel %vm911_vm1, %v3170_v16, 0  ;;  %v549_v35 = vshrl.u32 %v3616_v21, 16  ;;  %v411_v18 = vld [vmem:[%s3496_s12 + $0xa4] sm:$0x1] }
  0x5a   : > { %v445_v32 = vor.u32 %v444_v24, %v440_v20  ;;  %v3635_v37 = vpack.c.b16 %v839_v27, %v838_v23  ;;  %1142 = vmatpush.bf16.msrb.mxu1 %v1133_v33  ;;  %1753 = vmatpush.bf16.msrb.mxu0 %v1744_v34  ;;  %v552_v39 = vshll.u32 %v3616_v21, 16  ;;  %v558_v40 = vshll.u32 %v3623_v26, 16 }
  0x5b   : > { %v436_v38 = vrot.slane %v435_v28, 4  ;;  %v551_v42 = vrot.slane %v549_v35, 4  ;;  %v562_v43 = vshrl.u32 %v3623_v26, 16  ;;  %v568_v44 = vshll.u32 %v3627_v31, 16 }
  0x5c   : > { %5034 = vst [vmem:[#allocation5_spill] sm:$0xff] %v3635_v37  ;;  %v446_v41 = vrot.slane %v445_v32, 4  ;;  %3032 = vmatmul.msk.bf16.vlgmr.msra.gmra.mxu3 %vm862_vm4, %v3635_v37  ;;  %v554_v47 = vrot.slane %v552_v39, 5  ;;  %v560_v48 = vrot.slane %v558_v40, 5  ;;  %v645_v50 = vshrl.u32 %v3633_v36, 16 }
  0x5d   : > { %v441_v46 = vsel %vm3574_vm5, %v436_v38, %v440_v20  ;;  %v564_v53 = vrot.slane %v562_v43, 4  ;;  %v570_v54 = vrot.slane %v568_v44, 5  ;;  %v648_v61 = vshll.u32 %v3633_v36, 16  ;;  %v3667_v39 = vld [vmem:[%s3496_s12 + $0xc] sm:$0xf] }
  0x5e   : > { %v451_v51 = vsel %vm3574_vm5, %v446_v41, %v450_v29  ;;  %v814_v52 = vunpack.c.l.b16 %v441_v46  ;;  %v555_v59 = vor.u32 %v554_v47, %v551_v42  ;;  %v647_v60 = vrot.slane %v645_v50, 4  ;;  %v3674_v43 = vld [vmem:[%s3496_s12 + $0x10] sm:$0xf]  ;;  %v3677_v44 = vld [vmem:[%s3496_s12 + $0x14] sm:$0x1] }
  0x5f   : > { %v815_v55 = vunpack.c.l.b16 %v451_v51  ;;  %v565_v63 = vor.u32 %v564_v53, %v560_v48  ;;  %v654_v0 = vshll.u32 %v3642_v45, 16  ;;  %v658_v1 = vshrl.u32 %v3642_v45, 16  ;;  %v3226_v37 = vld [vmem:[%s3501_s16 + $0xe] sm:$0x3] }
  0x60   : > { %v664_v3 = vshll.u32 %v3649_v49, 16  ;;  %v556_v8 = vrot.slane %v555_v59, 4  ;;  %v650_v9 = vrot.slane %v648_v61, 5  ;;  %v741_v19 = vshrl.u32 %v409_v6, 16 }
  0x61   : > { %v846_v7 = vpack.c.b16 %v815_v55, %v814_v52  ;;  %v566_v11 = vrot.slane %v565_v63, 4  ;;  %v656_v13 = vrot.slane %v654_v0, 5  ;;  %v660_v14 = vrot.slane %v658_v1, 4  ;;  %v3689_v63 = vld [vmem:[%s3496_s12 + $0x48] sm:$0xf] }
  0x62   : > { %v666_v15 = vrot.slane %v664_v3, 5  ;;  %v561_v16 = vsel %vm3574_vm5, %v556_v8, %v560_v48  ;;  %v651_v17 = vor.u32 %v650_v9, %v647_v60  ;;  %v744_v20 = vshll.u32 %v409_v6, 16 }
  0x63   : > { %3020 = vmatmul.msk.bf16.vlgmr.msra.gmra.mxu0 %vm862_vm4, %v846_v7  ;;  %v571_v22 = vsel %vm3574_vm5, %v566_v11, %v570_v54  ;;  %v824_v23 = vunpack.c.l.b16 %v561_v16  ;;  %v661_v24 = vor.u32 %v660_v14, %v656_v13  ;;  %v750_v27 = vshll.u32 %v410_v10, 16  ;;  %v3696_v7 = vld [vmem:[%s3496_s12 + $0x4c] sm:$0xf] }
  0x64   : > { %v825_v28 = vunpack.c.l.b16 %v571_v22  ;;  %v652_v29 = vrot.slane %v651_v17, 4  ;;  %v743_v30 = vrot.slane %v741_v19, 4  ;;  %v746_v32 = vrot.slane %v744_v20, 5 }
  0x65   : > { %v662_v33 = vrot.slane %v661_v24, 4  ;;  %v752_v34 = vrot.slane %v750_v27, 5  ;;  %v754_v35 = vshrl.u32 %v410_v10, 16  ;;  %v760_v38 = vshll.u32 %v411_v18, 16 }
  0x66   : > { %v3669_v40 = vpack.c.b16 %v825_v28, %v824_v23  ;;  %v657_v41 = vsel %vm3574_vm5, %v652_v29, %v656_v13  ;;  %v747_v42 = vor.u32 %v746_v32, %v743_v30  ;;  %v453_v53 = vshrl.u32 %v3667_v39, 16  ;;  %v3710_v23 = vld [vmem:[%s3496_s12 + $0x78] sm:$0xf] }
  0x67   : > { %v667_v46 = vsel %vm3574_vm5, %v662_v33, %v666_v15  ;;  %v832_v47 = vunpack.c.l.b16 %v657_v41  ;;  %v756_v48 = vrot.slane %v754_v35, 4  ;;  %v762_v50 = vrot.slane %v760_v38, 5  ;;  %v3701_v15 = vld [vmem:[%s3496_s12 + $0x50] sm:$0x1] }
  0x68   : > { %3025 = vmatmul.msk.bf16.gmra.mxu1 %vm862_vm4, %v3669_v40  ;;  %v833_v51 = vunpack.c.l.b16 %v667_v46  ;;  %v748_v52 = vrot.slane %v747_v42, 4  ;;  %v456_v54 = vshll.u32 %v3667_v39, 16  ;;  %v462_v59 = vshll.u32 %v3674_v43, 16  ;;  %v3718_v42 = vld [vmem:[%s3496_s12 + $0x7c] sm:$0xf] }
  0x69   : > { %v757_v55 = vor.u32 %v756_v48, %v752_v34  ;;  %v466_v60 = vshrl.u32 %v3674_v43, 16  ;;  %v472_v61 = vshll.u32 %v3677_v44, 16  ;;  %v455_v3 = vrot.slane %v453_v53, 4  ;;  %v3721_v46 = vld [vmem:[%s3496_s12 + $0x80] sm:$0x1] }
  0x6a   : > { %v3691_v0 = vpack.c.b16 %v833_v51, %v832_v47  ;;  %v753_v1 = vsel %vm3574_vm5, %v748_v52, %v752_v34  ;;  %v458_v6 = vrot.slane %v456_v54, 5  ;;  %v464_v10 = vrot.slane %v462_v59, 5 }
  0x6b   : > { %v758_v8 = vrot.slane %v757_v55, 4  ;;  %v840_v9 = vunpack.c.l.b16 %v753_v1  ;;  %v468_v11 = vrot.slane %v466_v60, 4  ;;  %v474_v14 = vrot.slane %v472_v61, 5 }
  0x6c   : > { %3029 = vmatmul.msk.bf16.gmra.mxu2 %vm862_vm4, %v3691_v0  ;;  %v459_v13 = vor.u32 %v458_v6, %v455_v3  ;;  %v573_v16 = vshrl.u32 %v3689_v63, 16  ;;  %v576_v17 = vshll.u32 %v3689_v63, 16  ;;  %v582_v20 = vshll.u32 %v3696_v7, 16  ;;  %v3733_v6 = vld [vmem:[%s3496_s12 + $0xa8] sm:$0xf] }
  0x6d   : > { %v763_v18 = vsel %vm3574_vm5, %v758_v8, %v762_v50  ;;  %v469_v19 = vor.u32 %v468_v11, %v464_v10  ;;  %v586_v22 = vshrl.u32 %v3696_v7, 16  ;;  %v592_v34 = vshll.u32 %v3701_v15, 16  ;;  %5036 = vst [vmem:[#allocation7_spill] sm:$0xff] %v3733_v6  ;;  %v3740_v11 = vld [vmem:[%s3496_s12 + $0xac] sm:$0xf] }
  0x6e   : > { %v841_v24 = vunpack.c.l.b16 %v763_v18  ;;  %v460_v27 = vrot.slane %v459_v13, 4  ;;  %v575_v28 = vrot.slane %v573_v16, 4  ;;  %v578_v29 = vrot.slane %v576_v17, 5  ;;  %5037 = vst [vmem:[#allocation8_spill] sm:$0xff] %v3740_v11  ;;  %v3745_v18 = vld [vmem:[%s3496_s12 + $0xb0] sm:$0x1] }
  0x6f   : > { %v470_v30 = vrot.slane %v469_v19, 4  ;;  %v584_v32 = vrot.slane %v582_v20, 5  ;;  %v588_v33 = vrot.slane %v586_v22, 4  ;;  %v669_v47 = vshrl.u32 %v3710_v23, 16  ;;  %5038 = vst [vmem:[#allocation9_spill] sm:$0xff] %v3745_v18 }
  0x70   : > { %v3713_v35 = vpack.c.b16 %v841_v24, %v840_v9  ;;  %v465_v38 = vsel %vm3574_vm5, %v460_v27, %v464_v10  ;;  %v579_v41 = vor.u32 %v578_v29, %v575_v28  ;;  %v594_v52 = vrot.slane %v592_v34, 5 }
  0x71   : > { %v475_v48 = vsel %vm3574_vm5, %v470_v30, %v474_v14  ;;  %v816_v50 = vunpack.c.l.b16 %v465_v38  ;;  %v589_v51 = vor.u32 %v588_v33, %v584_v32  ;;  %v671_v55 = vrot.slane %v669_v47, 4 }
  0x72   : > { %5035 = vst [vmem:[#allocation6_spill] sm:$0xff] %v3713_v35  ;;  %3033 = vmatmul.msk.bf16.gmra.mxu3 %vm862_vm4, %v3713_v35  ;;  %v817_v53 = vunpack.c.l.b16 %v475_v48  ;;  %v580_v54 = vrot.slane %v579_v41, 4  ;;  %v672_v59 = vshll.u32 %v3710_v23, 16  ;;  %v678_v61 = vshll.u32 %v3718_v42, 16 }
  0x73   : > { %v590_v60 = vrot.slane %v589_v51, 4  ;;  %v682_v1 = vshrl.u32 %v3718_v42, 16  ;;  %v688_v3 = vshll.u32 %v3721_v46, 16  ;;  %v765_v24 = vshrl.u32 %v3733_v6, 16 }
  0x74   : > { %v3735_v8 = vpack.c.b16 %v817_v53, %v816_v50  ;;  %v585_v9 = vsel %vm3574_vm5, %v580_v54, %v584_v32  ;;  %v674_v10 = vrot.slane %v672_v59, 5  ;;  %v680_v16 = vrot.slane %v678_v61, 5  ;;  %v3754_v32 = vld [vmem:[%s3496_s12 + $0x18] sm:$0xf] }
  0x75   : > { %v595_v13 = vsel %vm3574_vm5, %v590_v60, %v594_v52  ;;  %v826_v14 = vunpack.c.l.b16 %v585_v9  ;;  %v684_v17 = vrot.slane %v682_v1, 4  ;;  %v690_v22 = vrot.slane %v688_v3, 5  ;;  %v3760_v52 = vld [vmem:[%s3496_s12 + $0x1c] sm:$0xf]  ;;  %v3773_v9 = vld [vmem:[%s3496_s12 + $0x54] sm:$0xf] }
  0x76   : > { %3021 = vmatmul.msk.bf16.gmra.mxu0 %vm862_vm4, %v3735_v8  ;;  %v827_v19 = vunpack.c.l.b16 %v595_v13  ;;  %v675_v20 = vor.u32 %v674_v10, %v671_v55  ;;  %v768_v28 = vshll.u32 %v3733_v6, 16  ;;  %v774_v29 = vshll.u32 %v3740_v11, 16  ;;  %v3767_v55 = vld [vmem:[%s3496_s12 + $0x20] sm:$0x1] }
  0x77   : > { %v685_v27 = vor.u32 %v684_v17, %v680_v16  ;;  %v778_v30 = vshrl.u32 %v3740_v11, 16  ;;  %v767_v38 = vrot.slane %v765_v24, 4  ;;  %v784_v41 = vshll.u32 %v3745_v18, 16  ;;  %v3853_v11 = vld [vmem:[%s3496_s12 + $0x2c] sm:$0x1] }
  0x78   : > { %v3756_v33 = vpack.c.b16 %v827_v19, %v826_v14  ;;  %v676_v34 = vrot.slane %v675_v20, 4  ;;  %v770_v48 = vrot.slane %v768_v28, 5  ;;  %v776_v50 = vrot.slane %v774_v29, 5  ;;  %v3782_v29 = vld [vmem:[%s3496_s12 + $0x58] sm:$0xf] }
  0x79   : > { %v686_v47 = vrot.slane %v685_v27, 4  ;;  %v780_v51 = vrot.slane %v778_v30, 4  ;;  %v786_v54 = vrot.slane %v784_v41, 5  ;;  %v477_v59 = vshrl.u32 %v3754_v32, 16 }
  0x7a   : > { %5039 = vst [vmem:[#allocation10_spill] sm:$0xff] %v3756_v33  ;;  %3026 = vmatmul.msk.bf16.gmra.mxu1 %vm862_vm4, %v3756_v33  ;;  %v681_v53 = vsel %vm3574_vm5, %v676_v34, %v680_v16  ;;  %v771_v1 = vor.u32 %v770_v48, %v767_v38  ;;  %v480_v14 = vshll.u32 %v3754_v32, 16  ;;  %v486_v16 = vshll.u32 %v3760_v52, 16  ;;  %v3790_v48 = vld [vmem:[%s3496_s12 + $0x5c] sm:$0x1] }
  0x7b   : > { %v691_v60 = vsel %vm3574_vm5, %v686_v47, %v690_v22  ;;  %v834_v61 = vunpack.c.l.b16 %v681_v53  ;;  %v781_v3 = vor.u32 %v780_v51, %v776_v50  ;;  %v479_v13 = vrot.slane %v477_v59, 4  ;;  %v3793_v51 = vld [vmem:[%s3496_s12 + $0x84] sm:$0xf] }
  0x7c   : > { %v835_v10 = vunpack.c.l.b16 %v691_v60  ;;  %v772_v17 = vrot.slane %v771_v1, 4  ;;  %v490_v20 = vshrl.u32 %v3760_v52, 16  ;;  %v496_v22 = vshll.u32 %v3767_v55, 16  ;;  %5040 = vst [vmem:[#allocation11_spill] sm:$0xff] %v3793_v51 }
  0x7d   : > { %v782_v19 = vrot.slane %v781_v3, 4  ;;  %v482_v27 = vrot.slane %v480_v14, 5  ;;  %v488_v28 = vrot.slane %v486_v16, 5  ;;  %v597_v30 = vshrl.u32 %v3773_v9, 16 }
  0x7e   : > { %v3779_v24 = vpack.c.b16 %v835_v10, %v834_v61  ;;  %v777_v34 = vsel %vm3574_vm5, %v772_v17, %v776_v50  ;;  %v492_v41 = vrot.slane %v490_v20, 4  ;;  %v498_v47 = vrot.slane %v496_v22, 5 }
  0x7f   : > { %v787_v38 = vsel %vm3574_vm5, %v782_v19, %v786_v54  ;;  %v842_v53 = vunpack.c.l.b16 %v777_v34  ;;  %v483_v60 = vor.u32 %v482_v27, %v479_v13  ;;  %v599_v61 = vrot.slane %v597_v30, 4  ;;  %v3805_v27 = vld [vmem:[%s3496_s12 + $0x88] sm:$0xf] }
  0x80   : > { %3030 = vmatmul.msk.bf16.gmra.mxu2 %vm862_vm4, %v3779_v24  ;;  %v843_v59 = vunpack.c.l.b16 %v787_v38  ;;  %v493_v1 = vor.u32 %v492_v41, %v488_v28  ;;  %v600_v50 = vshll.u32 %v3773_v9, 16  ;;  %v606_v54 = vshll.u32 %v3782_v29, 16  ;;  %v3812_v38 = vld [vmem:[%s3496_s12 + $0x8c] sm:$0x1] }
  0x81   : > { %v610_v3 = vshrl.u32 %v3782_v29, 16  ;;  %v484_v14 = vrot.slane %v483_v60, 4  ;;  %v616_v16 = vshll.u32 %v3790_v48, 16  ;;  %v693_v17 = vshrl.u32 %v3793_v51, 16  ;;  %5042 = vst [vmem:[#allocation13_spill] sm:$0xff] %v3812_v38 }
  0x82   : > { %v3800_v10 = vpack.c.b16 %v843_v59, %v842_v53  ;;  %v494_v19 = vrot.slane %v493_v1, 4  ;;  %v602_v20 = vrot.slane %v600_v50, 5  ;;  %v608_v22 = vrot.slane %v606_v54, 5 }
  0x83   : > { %v612_v13 = vrot.slane %v610_v3, 4  ;;  %v489_v30 = vsel %vm3574_vm5, %v484_v14, %v488_v28  ;;  %v618_v34 = vrot.slane %v616_v16, 5  ;;  %v695_v41 = vrot.slane %v693_v17, 4  ;;  %v3820_v14 = vld [vmem:[%s3496_s12 + $0xb4] sm:$0xf] }
  0x84   : > { %5041 = vst [vmem:[#allocation12_spill] sm:$0xff] %v3800_v10  ;;  %3034 = vmatmul.msk.bf16.gmra.mxu3 %vm862_vm4, %v3800_v10  ;;  %v696_v53 = vshll.u32 %v3793_v51, 16  ;;  %v499_v59 = vsel %vm3574_vm5, %v494_v19, %v498_v47  ;;  %v818_v60 = vunpack.c.l.b16 %v489_v30  ;;  %v603_v1 = vor.u32 %v602_v20, %v599_v61  ;;  %v3826_v61 = vld [vmem:[%s3496_s12 + $0xb8] sm:$0xf] }
  0x85   : > { %v613_v50 = vor.u32 %v612_v13, %v608_v22  ;;  %v819_v54 = vunpack.c.l.b16 %v499_v59  ;;  %v702_v10 = vshll.u32 %v3805_v27, 16  ;;  %v706_v28 = vshrl.u32 %v3805_v27, 16  ;;  %5043 = vst [vmem:[#allocation14_spill] sm:$0xff] %v3820_v14  ;;  %v3833_v59 = vld [vmem:[%s3496_s12 + $0xbc] sm:$0x1] }
  0x86   : > { %v698_v3 = vrot.slane %v696_v53, 5  ;;  %v604_v16 = vrot.slane %v603_v1, 4  ;;  %v712_v6 = vshll.u32 %v3812_v38, 16  ;;  %5044 = vst [vmem:[#allocation15_spill] sm:$0xff] %v3826_v61  ;;  %v789_v1 = vshrl.u32 %v3820_v14, 16 }
  0x87   : > { %v614_v17 = vrot.slane %v613_v50, 4  ;;  %v3823_v18 = vpack.c.b16 %v819_v54, %v818_v60  ;;  %v704_v19 = vrot.slane %v702_v10, 5  ;;  %v708_v30 = vrot.slane %v706_v28, 4  ;;  %5045 = vst [vmem:[#allocation16_spill] sm:$0xff] %v3833_v59 }
  0x88   : > { %v699_v47 = vor.u32 %v698_v3, %v695_v41  ;;  %v609_v20 = vsel %vm3574_vm5, %v604_v16, %v608_v22  ;;  %v714_v53 = vrot.slane %v712_v6, 5  ;;  %v791_v54 = vrot.slane %v789_v1, 4 }
  0x89   : > { %v619_v13 = vsel %vm3574_vm5, %v614_v17, %v618_v34  ;;  %3022 = vmatmul.msk.bf16.gmra.mxu0 %vm862_vm4, %v3823_v18  ;;  %v828_v10 = vunpack.c.l.b16 %v609_v20  ;;  %v709_v50 = vor.u32 %v708_v30, %v704_v19  ;;  %v792_v22 = vshll.u32 %v3820_v14, 16  ;;  %v3842_v34 = vld [vmem:[%s3496_s12 + $0x24] sm:$0xf] }
  0x8a   : > { %v829_v41 = vunpack.c.l.b16 %v619_v13  ;;  %v700_v60 = vrot.slane %v699_v47, 4  ;;  %v798_v3 = vshll.u32 %v3826_v61, 16  ;;  %v802_v6 = vshrl.u32 %v3826_v61, 16  ;;  %v3850_v47 = vld [vmem:[%s3496_s12 + $0x28] sm:$0xf] }
  0x8b   : > { %v710_v17 = vrot.slane %v709_v50, 4  ;;  %v808_v20 = vshll.u32 %v3833_v59, 16  ;;  %v794_v13 = vrot.slane %v792_v22, 5  ;;  %v1248_v61 = vrot.slane %v3598_v62, 5 }
  0x8c   : > { %v3844_v28 = vpack.c.b16 %v829_v41, %v828_v10  ;;  %v705_v16 = vsel %vm3574_vm5, %v700_v60, %v704_v19  ;;  %v800_v1 = vrot.slane %v798_v3, 5  ;;  %v804_v14 = vrot.slane %v802_v6, 4 }
  0x8d   : > { %v836_v30 = vunpack.c.l.b16 %v705_v16  ;;  %v715_v19 = vsel %vm3574_vm5, %v710_v17, %v714_v53  ;;  %v810_v10 = vrot.slane %v808_v20, 5  ;;  %v501_v41 = vshrl.u32 %v3842_v34, 16 }
  0x8e   : > { %5046 = vst [vmem:[#allocation17_spill] sm:$0xff] %v3844_v28  ;;  %3027 = vmatmul.msk.bf16.gmra.mxu1 %vm862_vm4, %v3844_v28  ;;  %v837_v60 = vunpack.c.l.b16 %v715_v19  ;;  %v795_v50 = vor.u32 %v794_v13, %v791_v54  ;;  %v805_v22 = vor.u32 %v804_v14, %v800_v1  ;;  %v504_v3 = vshll.u32 %v3842_v34, 16  ;;  %v3205_v19 = vld [vmem:[%s3501_s16 + $0xc] sm:$0x3] }
  0x8f   : > { %v503_v6 = vrot.slane %v501_v41, 4  ;;  %v510_v16 = vshll.u32 %v3850_v47, 16  ;;  %v514_v62 = vshrl.u32 %v3850_v47, 16  ;;  %v520_v59 = vshll.u32 %v3853_v11, 16 }
  0x90   : > { %v3865_v35 = vpack.c.b16 %v837_v60, %v836_v30  ;;  %v796_v53 = vrot.slane %v795_v50, 4  ;;  %v806_v17 = vrot.slane %v805_v22, 4  ;;  %v506_v20 = vrot.slane %v504_v3, 5  ;;  %v3188_v50 = vld [vmem:[%s3501_s16 + $0xa] sm:$0x3] }
  0x91   : > { %v512_v54 = vrot.slane %v510_v16, 5  ;;  %v516_v13 = vrot.slane %v514_v62, 4  ;;  %v522_v14 = vrot.slane %v520_v59, 5  ;;  %vm1241_vm7 = vcmask 1046532   ;;  %v3244_v22 = vld [vmem:[%s3501_s16 + $0x10] sm:$0x3] }
  0x92   : > { %5047 = vst [vmem:[#allocation18_spill] sm:$0xff] %v3865_v35  ;;  %3031 = vmatmul.msk.bf16.gmra.mxu2 %vm862_vm4, %v3865_v35  ;;  %v801_v41 = vsel %vm3574_vm5, %v796_v53, %v800_v1  ;;  %v811_v30 = vsel %vm3574_vm5, %v806_v17, %v810_v10  ;;  %v507_v60 = vor.u32 %v506_v20, %v503_v6  ;;  %vm3877_vm8 = vmor %vm1240_vm6, %vm1241_vm7  ;;  %v3116_v62 = vrot.slane %v3588_v56, 9 }
  0x93   : > { %v844_v3 = vunpack.c.l.b16 %v801_v41  ;;  %v845_v51 = vunpack.c.l.b16 %v811_v30  ;;  %v517_v16 = vor.u32 %v516_v13, %v512_v54  ;;  %v1245_v38 = vrot.slane %v3591_v57, 5 }
  0x94   : > { %v508_v35 = vrot.slane %v507_v60, 4  ;;  %v2018_v1 = vsel %vm911_vm1, %v3205_v19, 0  ;;  %v2174_v10 = vsel %vm911_vm1, %v3226_v37, 0  ;;  %v1884_v17 = vsel %vm911_vm1, %v3188_v50, 0 }
  0x95   : > { %v3885_v6 = vpack.c.b16 %v845_v51, %v844_v3  ;;  %v518_v53 = vrot.slane %v517_v16, 4  ;;  %2027 = vmatpush.bf16.msra.mxu2 %v2018_v1  ;;  %2183 = vmatpush.bf16.msra.mxu3 %v2174_v10  ;;  %v2314_v20 = vsel %vm911_vm1, %v3244_v22, 0  ;;  %v1246_v57 = vsel %vm3877_vm8, %v3116_v62, %v1245_v38  ;;  %v3265_v62 = vld [vmem:[%s3496_s12 + $0xc] sm:$0xff]  ;;  %v3924_v10 = vld [vmem:[%s3496_s12 + $0x18] sm:$0xff] }
  0x96   : > { %v513_v56 = vsel %vm3574_vm5, %v508_v35, %v512_v54  ;;  %v1247_v13 = vrot.slane %v1245_v38, 4  ;;  %1893 = vmatpush.bf16.msra.mxu1 %v1884_v17  ;;  %2323 = vmatpush.bf16.msra.mxu0 %v2314_v20  ;;  %v3117_v37 = vrot.slane %v3667_v39, 9  ;;  %v1357_v41 = vunpack.c.l.b16 %v1246_v57  ;;  %v3264_v54 = vld [vmem:[%s3496_s12] sm:$0xff] }
  0x97   : > { %3035 = vmatmul.msk.bf16.gmra.mxu3 %vm862_vm4, %v3885_v6  ;;  %v523_v51 = vsel %vm3574_vm5, %v518_v53, %v522_v14  ;;  %v820_v19 = vunpack.c.l.b16 %v513_v56  ;;  %v1252_v30 = vrot.slane %v3674_v43, 5  ;;  %v1255_v38 = vrot.slane %v3677_v44, 5 }
  0x98   : > { %v821_v60 = vunpack.c.l.b16 %v523_v51  ;;  %v1249_v35 = vsel %vm3877_vm8, %v1247_v13, %v1248_v61  ;;  %v1259_v1 = vrot.slane %v3760_v52, 5  ;;  %v3118_v53 = vrot.slane %v3754_v32, 9  ;;  %v3944_v13 = vld [vmem:[%s3496_s12 + $0x24] sm:$0xff] }
  0x99   : > { %v1358_v50 = vunpack.c.l.b16 %v1249_v35  ;;  %v1253_v39 = vsel %vm3877_vm8, %v3117_v37, %v1252_v30  ;;  %v1254_v22 = vrot.slane %v1252_v30, 4  ;;  %v1262_v20 = vrot.slane %v3767_v55, 5 }
  0x9a   : > { %v3905_v3 = vpack.c.b16 %v821_v60, %v820_v19  ;;  %v1359_v14 = vunpack.c.l.b16 %v1253_v39  ;;  %v1261_v17 = vrot.slane %v1259_v1, 4  ;;  %v1266_v55 = vrot.slane %v3850_v47, 5 }
  0x9b   : > { %v1389_v16 = vpack.c.b16 %v1358_v50, %v1357_v41  ;;  %v1256_v43 = vsel %vm3877_vm8, %v1254_v22, %v1255_v38  ;;  %v3119_v37 = vrot.slane %v3842_v34, 9  ;;  %v1269_v19 = vrot.slane %v3853_v11, 5  ;;  %v3966_v38 = vld [vmem:[%s3496_s12 + $0x30] sm:$0xff] }
  0x9c   : > { %3023 = vmatmul.msk.bf16.gmra.mxu0 %vm862_vm4, %v3905_v3  ;;  %v1360_v61 = vunpack.c.l.b16 %v1256_v43  ;;  %v1263_v52 = vsel %vm3877_vm8, %v1261_v17, %v1262_v20  ;;  %v1268_v51 = vrot.slane %v1266_v55, 4  ;;  %v1273_v11 = vrot.slane %v3558_v4, 5 }
  0x9d   : > { %v1362_v57 = vunpack.c.l.b16 %v1263_v52  ;;  %v1267_v41 = vsel %vm3877_vm8, %v3119_v37, %v1266_v55  ;;  %v1276_v39 = vrot.slane %v3561_v5, 5  ;;  %v3121_v17 = vrot.slane %v3616_v21, 9 }
  0x9e   : > { %3100 = vmatmul.msk.bf16.vlgmr.msrb.gmra.mxu1 %vm862_vm4, %v3264_v54  ;;  %v3912_v44 = vpack.c.b16 %v1360_v61, %v1359_v14  ;;  %v1270_v47 = vsel %vm3877_vm8, %v1268_v51, %v1269_v19  ;;  %v1363_v30 = vunpack.c.l.b16 %v1267_v41  ;;  %v3120_v54 = vrot.slane %v3554_v2, 9 }
  0x9f   : > { %v1364_v60 = vunpack.c.l.b16 %v1270_v47  ;;  %v1275_v50 = vrot.slane %v1273_v11, 4  ;;  %v1287_v47 = vrot.slane %v3696_v7, 5  ;;  %vm2501_vm9 = vcmask 64512  }
  0xa0   : > { %v1274_v22 = vsel %vm3877_vm8, %v3120_v54, %v1273_v11  ;;  %v3122_v11 = vrot.slane %v3689_v63, 9 }
  0xa1   : > { %v3958_v34 = vpack.c.b16 %v1364_v60, %v1363_v30  ;;  %v1277_v4 = vsel %vm3877_vm8, %v1275_v50, %v1276_v39  ;;  %v1365_v14 = vunpack.c.l.b16 %v1274_v22  ;;  %v4028_v60 = vld [vmem:[%s3496_s12 + $0x48] sm:$0xff]  ;;  %v1289_v54 = vrot.slane %v1287_v47, 4 }
  0xa2   : > { %3133 = vmatmul.msk.bf16.vlgmr.msrb.gmra.mxu2 %vm862_vm4, %v1389_v16  ;;  %v1366_v16 = vunpack.c.l.b16 %v1277_v4  ;;  %v1290_v50 = vrot.slane %v3701_v15, 5  ;;  %v1288_v7 = vsel %vm3877_vm8, %v3122_v11, %v1287_v47  ;;  %v1297_v47 = vrot.slane %v3790_v48, 5 }
  0xa3   : > { %v1369_v63 = vunpack.c.l.b16 %v1288_v7 }
  0xa4   : > { %v3986_v5 = vpack.c.b16 %v1366_v16, %v1365_v14  ;;  %v1291_v4 = vsel %vm3877_vm8, %v1289_v54, %v1290_v50 }
  0xa5   : > { %v1370_v16 = vunpack.c.l.b16 %v1291_v4 }
  0xa7   : > { %3154 = vmatmul.msk.bf16.vlgmr.msrb.gmra.mxu3 %vm862_vm4, %v3265_v62 }
  0xac   : > { %3171 = vmatmul.msk.bf16.vlgmr.msrb.gmra.mxu0 %vm862_vm4, %v3735_v8  ;;  %v1260_v8 = vsel %vm3877_vm8, %v3118_v53, %v1259_v1  ;;  %v3994_v53 = vld [vmem:[%s3496_s12 + $0x3c] sm:$0xff] }
  0xad   : > { %v1361_v56 = vunpack.c.l.b16 %v1260_v8  ;;  %v1283_v8 = vrot.slane %v3627_v31, 5 }
  0xae   : > { %3101 = vmatmul.msk.bf16.gmra.mxu1 %vm862_vm4, %v3265_v62  ;;  %v1280_v62 = vrot.slane %v3623_v26, 5 }
  0xaf   : > { %v3938_v32 = vpack.c.b16 %v1362_v57, %v1361_v56 }
  0xb0   : > { %v1282_v20 = vrot.slane %v1280_v62, 4  ;;  %v1281_v26 = vsel %vm3877_vm8, %v3121_v17, %v1280_v62  ;;  %v4052_v17 = vpack.c.b16 %v1370_v16, %v1369_v63 }
  0xb1   : > { %v1367_v37 = vunpack.c.l.b16 %v1281_v26 }
  0xb2   : > { %3134 = vmatmul.msk.bf16.gmra.mxu2 %vm862_vm4, %v3912_v44  ;;  %v1284_v57 = vsel %vm3877_vm8, %v1282_v20, %v1283_v8  ;;  %5054 = vst [vmem:[#allocation23_spill] sm:$0xff] %v4052_v17  ;;  %v1294_v20 = vrot.slane %v3782_v29, 5 }
  0xb3   : > { %v1368_v31 = vunpack.c.l.b16 %v1284_v57  ;;  %v4062_v57 = vld [vmem:[%s3496_s12 + $0x54] sm:$0xff] }
  0xb4   : > { %5055 = vst [vmem:[#allocation24_spill] sm:$0xff] %v4062_v57 }
  0xb5   : > { %v4018_v19 = vpack.c.b16 %v1368_v31, %v1367_v37  ;;  %v3123_v37 = vrot.slane %v3773_v9, 9  ;;  %v1296_v31 = vrot.slane %v1294_v20, 4 }
  0xb7   : > { %3155 = vmatmul.msk.bf16.gmra.mxu3 %vm862_vm4, %v3924_v10  ;;  %v1295_v29 = vsel %vm3877_vm8, %v3123_v37, %v1294_v20  ;;  %v1298_v50 = vsel %vm3877_vm8, %v1296_v31, %v1297_v47  ;;  %v3345_v20 = vld [vmem:[%s3496_s12 + $0x64] sm:$0xf] }
  0xb8   : > { %v1371_v7 = vunpack.c.l.b16 %v1295_v29  ;;  %v1372_v48 = vunpack.c.l.b16 %v1298_v50  ;;  %v1301_v37 = vrot.slane %v3345_v20, 5  ;;  %v3346_v29 = vld [vmem:[%s3496_s12 + $0x68] sm:$0x1] }
  0xb9   : > { %v1304_v50 = vrot.slane %v3346_v29, 5 }
  0xba   : > { %v4084_v63 = vpack.c.b16 %v1372_v48, %v1371_v7 }
  0xbc   : > { %3172 = vmatmul.msk.bf16.gmra.mxu0 %vm862_vm4, %v3823_v18  ;;  %5057 = vst [vmem:[#allocation26_spill] sm:$0xff] %v4084_v63 }
  0xbe   : > { %3102 = vmatmul.msk.bf16.gmra.mxu1 %vm862_vm4, %v3924_v10 }
  0xc2   : > { %3135 = vmatmul.msk.bf16.gmra.mxu2 %vm862_vm4, %v3938_v32 }
  0xc7   : > { %3156 = vmatmul.msk.bf16.gmra.mxu3 %vm862_vm4, %v3944_v13 }
  0xcc   : > { %3173 = vmatmul.msk.bf16.gmra.mxu0 %vm862_vm4, %v3905_v3 }
  0xce   : > { %3103 = vmatmul.msk.bf16.gmra.mxu1 %vm862_vm4, %v3944_v13 }
  0xd2   : > { %v3961_v35 = vpop.f32.mrf.mxu1  ;;  %3136 = vmatmul.msk.bf16.gmra.mxu2 %vm862_vm4, %v3958_v34 }
  0xd7   : > { %3157 = vmatmul.msk.bf16.gmra.mxu3 %vm862_vm4, %v3966_v38 }
  0xda   : > { %v3978_v61 = vpop.f32.mrf.mxu1 }
  0xdb   : > { %v3976_v43 = vpop.f32.mrf.mxu2 }
  0xdc   : > { %3174 = vmatmul.msk.bf16.gmra.mxu0 %vm862_vm4, %v3593_v58 }
  0xde   : > { %3104 = vmatmul.msk.bf16.gmra.mxu1 %vm862_vm4, %v3966_v38 }
  0xdf   : > { %v3989_v1 = vpop.f32.mrf.mxu3 }
  0xe0   : > { %v3984_v2 = vpop.f32.mrf.mxu0  ;;  %5050 = vst [vmem:[#allocation19_spill] sm:$0xff] %v3989_v1 }
  0xe2   : > { %3137 = vmatmul.msk.bf16.gmra.mxu2 %vm862_vm4, %v3986_v5 }
  0xe3   : > { %v3998_v52 = vpop.f32.mrf.mxu2 }
  0xe5   : > { %v4000_v56 = vpop.f32.mrf.mxu1 }
  0xe7   : > { %3158 = vmatmul.msk.bf16.gmra.mxu3 %vm862_vm4, %v3994_v53  ;;  %v4010_v21 = vpop.f32.mrf.mxu3 }
  0xe8   : > { %v4008_v55 = vpop.f32.mrf.mxu0  ;;  %5051 = vst [vmem:[#allocation20_spill] sm:$0xff] %v4010_v21 }
  0xec   : > { %3175 = vmatmul.msk.bf16.gmra.mxu0 %vm862_vm4, %v3669_v40 }
  0xed   : > { %v4014_v51 = vpop.f32.mrf.mxu1 }
  0xee   : > { %3105 = vmatmul.msk.bf16.gmra.mxu1 %vm862_vm4, %v3994_v53 }
  0xef   : > { %v4020_v41 = vpop.f32.mrf.mxu2 }
  0xf2   : > { %3138 = vmatmul.msk.bf16.gmra.mxu2 %vm862_vm4, %v4018_v19 }
  0xf3   : > { %v4023_v30 = vpop.f32.mrf.mxu0 }
  0xf5   : > { %v4032_v39 = vpop.f32.mrf.mxu3 }
  0xf6   : > { %5052 = vst [vmem:[#allocation21_spill] sm:$0xff] %v4032_v39  ;;  %v1303_v39 = vrot.slane %v1301_v37, 4 }
  0xf7   : > { %v4034_v22 = vpop.f32.mrf.mxu1  ;;  %3159 = vmatmul.msk.bf16.gmra.mxu3 %vm862_vm4, %v4028_v60  ;;  %v4042_v14 = vpop.f32.mrf.mxu2 }
  0xf8   : > { %v1305_v20 = vsel %vm3877_vm8, %v1303_v39, %v1304_v50  ;;  %v1308_v39 = vrot.slane %v3642_v45, 5 }
  0xfb   : > { %v4046_v15 = vpop.f32.mrf.mxu0 }
  0xfc   : > { %3176 = vmatmul.msk.bf16.gmra.mxu0 %vm862_vm4, %v3756_v33 }
  0xfd   : > { %v4048_v62 = vpop.f32.mrf.mxu3 }
  0xfe   : > { %5053 = vst [vmem:[#allocation22_spill] sm:$0xff] %v4048_v62  ;;  %3106 = vmatmul.msk.bf16.gmra.mxu1 %vm862_vm4, %v4028_v60  ;;  %v3347_v62 = vld [vmem:[%s3496_s12 + $0x60] sm:$0xf] }
  0xff   : > { %v4055_v8 = vpop.f32.mrf.mxu1 }
 0x102   : > { %3139 = vmatmul.msk.bf16.gmra.mxu2 %vm862_vm4, %v4052_v17 }
 0x103   : > { %v4059_v26 = vpop.f32.mrf.mxu2 }
 0x106   : > { %v4066_v11 = vpop.f32.mrf.mxu0 }
 0x107   : > { %v4068_v54 = vpop.f32.mrf.mxu3  ;;  %3160 = vmatmul.msk.bf16.gmra.mxu3 %vm862_vm4, %v4062_v57 }
 0x108   : > { %5056 = vst [vmem:[#allocation25_spill] sm:$0xff] %v4068_v54  ;;  %v4097_v54 = vld [vmem:[%s3496_s12 + $0x60] sm:$0xff] }
 0x109   : > { %5059 = vst [vmem:[#allocation28_spill] sm:$0xff] %v4097_v54 }
 0x10b   : > { %v4076_v9 = vpop.f32.mrf.mxu1  ;;  %v4078_v4 = vpop.f32.mrf.mxu2 }
 0x10c   : > { %3177 = vmatmul.msk.bf16.gmra.mxu0 %vm862_vm4, %v3844_v28  ;;  %v3124_v28 = vrot.slane %v3347_v62, 9  ;;  %v1374_v62 = vunpack.c.l.b16 %v1305_v20 }
 0x10e   : > { %3107 = vmatmul.msk.bf16.gmra.mxu1 %vm862_vm4, %v4062_v57  ;;  %v4086_v16 = vpop.f32.mrf.mxu0  ;;  %v1302_v48 = vsel %vm3877_vm8, %v3124_v28, %v1301_v37 }
 0x10f   : > { %v4089_v31 = vpop.f32.mrf.mxu3  ;;  %v1373_v57 = vunpack.c.l.b16 %v1302_v48  ;;  %v4130_v48 = vld [vmem:[%s3496_s12 + $0x6c] sm:$0xff] }
 0x110   : > { %5058 = vst [vmem:[#allocation27_spill] sm:$0xff] %v4089_v31 }
 0x111   : > { %v4119_v28 = vpack.c.b16 %v1374_v62, %v1373_v57  ;;  %v1310_v57 = vrot.slane %v1308_v39, 4 }
 0x112   : > { %3140 = vmatmul.msk.bf16.gmra.mxu2 %vm862_vm4, %v4084_v63 }
 0x113   : > { %v4093_v47 = vpop.f32.mrf.mxu1  ;;  %5061 = vst [vmem:[#allocation30_spill] sm:$0xff] %v4119_v28 }
 0x115   : > { %v4100_v7 = vpop.f32.mrf.mxu2 }
 0x117   : > { %3161 = vmatmul.msk.bf16.gmra.mxu3 %vm862_vm4, %v4097_v54 }
 0x119   : > { %v4108_v31 = vpop.f32.mrf.mxu0 }
 0x11a   : > { %v4110_v29 = vpop.f32.mrf.mxu3 }
 0x11b   : > { %5060 = vst [vmem:[#allocation29_spill] sm:$0xff] %v4110_v29  ;;  %v1144_v63 = vpop.f32.mrf.mxu1  ;;  %v3125_v29 = vrot.slane %v3633_v36, 9 }
 0x11c   : > { %v1145_v21 = vadd.f32 %v1144_v63, %v3984_v2  ;;  %3178 = vmatmul.msk.bf16.gmra.mxu0 %vm862_vm4, %v3608_v12  ;;  %v1311_v63 = vrot.slane %v3649_v49, 5 }
 0x11d   : > { %v4115_v17 = vpop.f32.mrf.mxu2  ;;  %v1309_v45 = vsel %vm3877_vm8, %v3125_v29, %v1308_v39 }
 0x11e   : > { %3108 = vmatmul.msk.bf16.gmra.mxu1 %vm862_vm4, %v4097_v54  ;;  %v1375_v33 = vunpack.c.l.b16 %v1309_v45 }
 0x121   : > { %v4122_v37 = vpop.f32.mrf.mxu0 }
 0x122   : > { %v4124_v50 = vpop.f32.mrf.mxu3  ;;  %3141 = vmatmul.msk.bf16.gmra.mxu2 %vm862_vm4, %v4119_v28 }
 0x123   : > { %5062 = vst [vmem:[#allocation31_spill] sm:$0xff] %v4124_v50  ;;  %v1146_v2 = vpop.f32.mrf.mxu1  ;;  %v1312_v50 = vsel %vm3877_vm8, %v1310_v57, %v1311_v63  ;;  %v1315_v63 = vrot.slane %v3718_v42, 5 }
 0x124   : > { %v1147_v20 = vadd.f32 %v1146_v2, %v4008_v55  ;;  %v1376_v1 = vunpack.c.l.b16 %v1312_v50  ;;  %v1318_v50 = vrot.slane %v3721_v46, 5 }
 0x125   : > { %v1465_v62 = vpop.f32.mrf.mxu2 }
 0x126   : > { %v1545_v12 = vadd.f32 %v1465_v62, %v1145_v21  ;;  %v4147_v2 = vpack.c.b16 %v1376_v1, %v1375_v33  ;;  %v4154_v62 = vld [vmem:[%s3496_s12 + $0x78] sm:$0xff] }
 0x127   : > { %3162 = vmatmul.msk.bf16.gmra.mxu3 %vm862_vm4, %v4130_v48 }
 0x129   : > { %v1755_v28 = vpop.f32.mrf.mxu0 }
 0x12a   : > { %v1599_v49 = vpop.f32.mrf.mxu3 }
 0x12b   : > { %v1149_v54 = vpop.f32.mrf.mxu1  ;;  %v1679_v55 = vadd.f32 %v1599_v49, %v1545_v12 }
 0x12c   : > { %v1150_v36 = vadd.f32 %v1149_v54, %v4023_v30  ;;  %3179 = vmatmul.msk.bf16.gmra.mxu0 %vm862_vm4, %v3691_v0 }
 0x12d   : > { %v1467_v21 = vpop.f32.mrf.mxu2  ;;  %v4145_v29 = vadd.f32 %v1755_v28, %v1679_v55  ;;  %v3126_v28 = vrot.slane %v3710_v23, 9 }
 0x12e   : > { %3109 = vmatmul.msk.bf16.gmra.mxu1 %vm862_vm4, %v4130_v48  ;;  %v1546_v39 = vadd.f32 %v1467_v21, %v1147_v20  ;;  %v1317_v20 = vrot.slane %v1315_v63, 4 }
 0x12f   : > { %v1316_v46 = vsel %vm3877_vm8, %v3126_v28, %v1315_v63 }
 0x130   : > { %v1319_v49 = vsel %vm3877_vm8, %v1317_v20, %v1318_v50  ;;  %v5064_v20 = vld [vmem:[#allocation13_spill] sm:$0xff] }
 0x131   : > { %v1757_v57 = vpop.f32.mrf.mxu0 }
 0x132   : > { %v1601_v12 = vpop.f32.mrf.mxu3  ;;  %3142 = vmatmul.msk.bf16.gmra.mxu2 %vm862_vm4, %v4147_v2 }
 0x133   : > { %v1151_v30 = vpop.f32.mrf.mxu1  ;;  %v1680_v54 = vadd.f32 %v1601_v12, %v1546_v39  ;;  %v1378_v12 = vunpack.c.l.b16 %v1319_v49  ;;  %v4180_v49 = vld [vmem:[%s3496_s12 + $0x84] sm:$0xff] }
 0x134   : > { %v1152_v45 = vadd.f32 %v1151_v30, %v4046_v15  ;;  %v1377_v15 = vunpack.c.l.b16 %v1316_v46 }
 0x135   : > { %v1470_v33 = vpop.f32.mrf.mxu2  ;;  %v4158_v1 = vadd.f32 %v1757_v57, %v1680_v54  ;;  %v1322_v54 = vrot.slane %v3805_v27, 5 }
 0x136   : > { %v1547_v42 = vadd.f32 %v1470_v33, %v1150_v36  ;;  %v4173_v50 = vpack.c.b16 %v1378_v12, %v1377_v15  ;;  %v1325_v33 = vrot.slane %v5064_v20, 5 }
 0x137   : > { %3163 = vmatmul.msk.bf16.gmra.mxu3 %vm862_vm4, %v4154_v62 }
 0x139   : > { %v1760_v55 = vpop.f32.mrf.mxu0 }
 0x13a   : > { %v1604_v21 = vpop.f32.mrf.mxu3 }
 0x13b   : > { %v1154_v39 = vpop.f32.mrf.mxu1  ;;  %v1681_v23 = vadd.f32 %v1604_v21, %v1547_v42 }
 0x13c   : > { %v1155_v57 = vadd.f32 %v1154_v39, %v4066_v11  ;;  %3180 = vmatmul.msk.bf16.gmra.mxu0 %vm862_vm4, %v3779_v24 }
 0x13d   : > { %v1472_v36 = vpop.f32.mrf.mxu2  ;;  %v4171_v63 = vadd.f32 %v1760_v55, %v1681_v23  ;;  %v5065_v55 = vld [vmem:[#allocation11_spill] sm:$0xff] }
 0x13e   : > { %3110 = vmatmul.msk.bf16.gmra.mxu1 %vm862_vm4, %v4154_v62  ;;  %v1548_v30 = vadd.f32 %v1472_v36, %v1152_v45  ;;  %v3127_v39 = vrot.slane %v5065_v55, 9  ;;  %v1324_v45 = vrot.slane %v1322_v54, 4 }
 0x13f   : > { %5063 = vst [vmem:[#allocation32_spill] sm:$0xff] %v4171_v63 }
 0x140   : > { %v1323_v23 = vsel %vm3877_vm8, %v3127_v39, %v1322_v54  ;;  %v1326_v36 = vsel %vm3877_vm8, %v1324_v45, %v1325_v33  ;;  %v3348_v45 = vld [vmem:[%s3496_s12 + $0x94] sm:$0xf] }
 0x141   : > { %v1762_v28 = vpop.f32.mrf.mxu0 }
 0x142   : > { %v1606_v42 = vpop.f32.mrf.mxu3  ;;  %3143 = vmatmul.msk.bf16.gmra.mxu2 %vm862_vm4, %v4173_v50 }
 0x143   : > { %v1156_v11 = vpop.f32.mrf.mxu1  ;;  %v1682_v46 = vadd.f32 %v1606_v42, %v1548_v30  ;;  %v1379_v42 = vunpack.c.l.b16 %v1323_v23 }
 0x144   : > { %v1157_v21 = vadd.f32 %v1156_v11, %v4086_v16  ;;  %v1380_v11 = vunpack.c.l.b16 %v1326_v36 }
 0x145   : > { %v1475_v15 = vpop.f32.mrf.mxu2  ;;  %v4184_v12 = vadd.f32 %v1762_v28, %v1682_v46 }
 0x146   : > { %v1549_v27 = vadd.f32 %v1475_v15, %v1155_v57  ;;  %v5067_v57 = vld [vmem:[#allocation18_spill] sm:$0xff]  ;;  %v4199_v39 = vpack.c.b16 %v1380_v11, %v1379_v42  ;;  %v1329_v15 = vrot.slane %v3348_v45, 5 }
 0x147   : > { %5066 = vst [vmem:[#allocation13_spill] sm:$0xff] %v4184_v12  ;;  %3164 = vmatmul.msk.bf16.gmra.mxu3 %vm862_vm4, %v4180_v49  ;;  %v4206_v12 = vld [vmem:[%s3496_s12 + $0x90] sm:$0xff] }
 0x148   : > { %5069 = vst [vmem:[#allocation33_spill] sm:$0xff] %v4199_v39 }
 0x149   : > { %v1765_v30 = vpop.f32.mrf.mxu0  ;;  %5070 = vst [vmem:[#allocation34_spill] sm:$0xff] %v4206_v12 }
 0x14a   : > { %v1609_v16 = vpop.f32.mrf.mxu3 }
 0x14b   : > { %v1159_v20 = vpop.f32.mrf.mxu1  ;;  %v1683_v55 = vadd.f32 %v1609_v16, %v1549_v27  ;;  %v3349_v27 = vld [vmem:[%s3496_s12 + $0x98] sm:$0x1] }
 0x14c   : > { %v1160_v28 = vadd.f32 %v1159_v20, %v4108_v31  ;;  %3181 = vmatmul.msk.bf16.gmra.mxu0 %vm862_vm4, %v5067_v57  ;;  %v1332_v36 = vrot.slane %v3349_v27, 5 }
 0x14d   : > { %v1477_v46 = vpop.f32.mrf.mxu2  ;;  %v4197_v54 = vadd.f32 %v1765_v30, %v1683_v55  ;;  %v3350_v30 = vld [vmem:[%s3496_s12 + $0x90] sm:$0xf] }
 0x14e   : > { %3111 = vmatmul.msk.bf16.gmra.mxu1 %vm862_vm4, %v4180_v49  ;;  %v1550_v33 = vadd.f32 %v1477_v46, %v1157_v21  ;;  %v3128_v55 = vrot.slane %v3350_v30, 9  ;;  %v1331_v21 = vrot.slane %v1329_v15, 4 }
 0x14f   : > { %5068 = vst [vmem:[#allocation11_spill] sm:$0xff] %v4197_v54 }
 0x150   : > { %v1330_v45 = vsel %vm3877_vm8, %v3128_v55, %v1329_v15  ;;  %v3351_v55 = vld [vmem:[%s3496_s12 + $0xa0] sm:$0xf] }
 0x151   : > { %v1767_v23 = vpop.f32.mrf.mxu0 }
 0x152   : > { %v1611_v31 = vpop.f32.mrf.mxu3  ;;  %3144 = vmatmul.msk.bf16.gmra.mxu2 %vm862_vm4, %v4199_v39  ;;  %v3353_v39 = vld [vmem:[%s3496_s12 + $0x9c] sm:$0xf] }
 0x153   : > { %v1161_v16 = vpop.f32.mrf.mxu1  ;;  %v1684_v20 = vadd.f32 %v1611_v31, %v1550_v33  ;;  %v1333_v33 = vsel %vm3877_vm8, %v1331_v21, %v1332_v36  ;;  %v1336_v21 = vrot.slane %v3351_v55, 5 }
 0x154   : > { %v1162_v57 = vadd.f32 %v1161_v16, %v4122_v37  ;;  %v1381_v16 = vunpack.c.l.b16 %v1330_v45  ;;  %v1382_v30 = vunpack.c.l.b16 %v1333_v33  ;;  %v3352_v33 = vld [vmem:[%s3496_s12 + $0xa4] sm:$0x1] }
 0x155   : > { %v1480_v42 = vpop.f32.mrf.mxu2  ;;  %v4210_v11 = vadd.f32 %v1767_v23, %v1684_v20  ;;  %v5072_v23 = vld [vmem:[#allocation5_spill] sm:$0xff] }
 0x156   : > { %v1551_v46 = vadd.f32 %v1480_v42, %v1160_v28  ;;  %v4224_v36 = vpack.c.b16 %v1382_v30, %v1381_v16 }
 0x157   : > { %5071 = vst [vmem:[#allocation35_spill] sm:$0xff] %v4210_v11  ;;  %3165 = vmatmul.msk.bf16.gmra.mxu3 %vm862_vm4, %v4206_v12 }
 0x158   : > { %5074 = vst [vmem:[#allocation37_spill] sm:$0xff] %v4224_v36 }
 0x159   : > { %v1770_v27 = vpop.f32.mrf.mxu0 }
 0x15a   : > { %v1614_v31 = vpop.f32.mrf.mxu3 }
 0x15b   : > { %v1164_v37 = vpop.f32.mrf.mxu1  ;;  %v1685_v54 = vadd.f32 %v1614_v31, %v1551_v46  ;;  %v1339_v31 = vrot.slane %v3352_v33, 5 }
 0x15c   : > { %3182 = vmatmul.msk.bf16.gmra.mxu0 %vm862_vm4, %v5072_v23  ;;  %v4231_v23 = vld [vmem:[%s3496_s12 + $0x9c] sm:$0xff] }
 0x15d   : > { %v1482_v28 = vpop.f32.mrf.mxu2  ;;  %v4222_v15 = vadd.f32 %v1770_v27, %v1685_v54  ;;  %5075 = vst [vmem:[#allocation38_spill] sm:$0xff] %v4231_v23  ;;  %v1338_v54 = vrot.slane %v1336_v21, 4 }
 0x15e   : > { %3112 = vmatmul.msk.bf16.gmra.mxu1 %vm862_vm4, %v4206_v12  ;;  %v1552_v20 = vadd.f32 %v1482_v28, %v1162_v57  ;;  %v3129_v12 = vrot.slane %v3353_v39, 9  ;;  %v1165_v57 = vadd.f32 %v1164_v37, %v3961_v35  ;;  %v5077_v37 = vld [vmem:[#allocation6_spill] sm:$0xff] }
 0x15f   : > { %5073 = vst [vmem:[#allocation36_spill] sm:$0xff] %v4222_v15 }
 0x160   : > { %v1337_v28 = vsel %vm3877_vm8, %v3129_v12, %v1336_v21 }
 0x161   : > { %v1772_v42 = vpop.f32.mrf.mxu0  ;;  %v1383_v39 = vunpack.c.l.b16 %v1337_v28 }
 0x162   : > { %v1616_v45 = vpop.f32.mrf.mxu3  ;;  %3145 = vmatmul.msk.bf16.gmra.mxu2 %vm862_vm4, %v4224_v36 }
 0x163   : > { %v1166_v46 = vpop.f32.mrf.mxu1  ;;  %v1686_v11 = vadd.f32 %v1616_v45, %v1552_v20  ;;  %v1340_v20 = vsel %vm3877_vm8, %v1338_v54, %v1339_v31  ;;  %v5080_v54 = vld [vmem:[#allocation8_spill] sm:$0xff] }
 0x164   : > { %v1384_v15 = vunpack.c.l.b16 %v1340_v20  ;;  %v5081_v20 = vld [vmem:[#allocation9_spill] sm:$0xff] }
 0x165   : > { %v1485_v27 = vpop.f32.mrf.mxu2  ;;  %v4235_v16 = vadd.f32 %v1772_v42, %v1686_v11  ;;  %v1167_v11 = vadd.f32 %v1166_v46, %v3978_v61  ;;  %v4257_v46 = vld [vmem:[%s3496_s12 + $0xa8] sm:$0xff] }
 0x166   : > { %v1553_v30 = vadd.f32 %v1485_v27, %v1165_v57  ;;  %v4250_v31 = vpack.c.b16 %v1384_v15, %v1383_v39  ;;  %v1343_v57 = vrot.slane %v5080_v54, 5  ;;  %5082 = vst [vmem:[#allocation8_spill] sm:$0xff] %v4257_v46 }
 0x167   : > { %5076 = vst [vmem:[#allocation39_spill] sm:$0xff] %v4235_v16  ;;  %3166 = vmatmul.msk.bf16.gmra.mxu3 %vm862_vm4, %v4231_v23  ;;  %v5083_v16 = vld [vmem:[#allocation7_spill] sm:$0xff] }
 0x168   : > { %5079 = vst [vmem:[#allocation41_spill] sm:$0xff] %v4250_v31 }
 0x169   : > { %v1775_v55 = vpop.f32.mrf.mxu0 }
 0x16a   : > { %v1619_v45 = vpop.f32.mrf.mxu3 }
 0x16b   : > { %v1169_v33 = vpop.f32.mrf.mxu1  ;;  %v1687_v35 = vadd.f32 %v1619_v45, %v1553_v30  ;;  %v1346_v45 = vrot.slane %v5081_v20, 5 }
 0x16c   : > { %3183 = vmatmul.msk.bf16.gmra.mxu0 %vm862_vm4, %v5077_v37  ;;  %v3130_v37 = vrot.slane %v5083_v16, 9 }
 0x16d   : > { %v1487_v42 = vpop.f32.mrf.mxu2  ;;  %v4248_v12 = vadd.f32 %v1775_v55, %v1687_v35  ;;  %v1345_v55 = vrot.slane %v1343_v57, 4  ;;  %v1170_v35 = vadd.f32 %v1169_v33, %v4000_v56 }
 0x16e   : > { %3113 = vmatmul.msk.bf16.gmra.mxu1 %vm862_vm4, %v4231_v23  ;;  %v1554_v21 = vadd.f32 %v1487_v42, %v1167_v11  ;;  %v1344_v42 = vsel %vm3877_vm8, %v3130_v37, %v1343_v57  ;;  %v4275_v37 = vld [vmem:[%s3496_s12 + $0xc0] sm:$0xf] }
 0x16f   : > { %5078 = vst [vmem:[#allocation40_spill] sm:$0xff] %v4248_v12  ;;  %v1385_v20 = vunpack.c.l.b16 %v1344_v42  ;;  %v5085_v12 = vld [vmem:[#allocation12_spill] sm:$0xff]  ;;  %v1712_v42 = vshrl.u32 %v4275_v37, 16 }
 0x170   : > { %5086 = vst [vmem:[#allocation7_spill] sm:$0xff] %v4275_v37 }
 0x171   : > { %v1777_v27 = vpop.f32.mrf.mxu0 }
 0x172   : > { %v1621_v28 = vpop.f32.mrf.mxu3  ;;  %3146 = vmatmul.msk.bf16.gmra.mxu2 %vm862_vm4, %v4250_v31 }
 0x173   : > { %v1171_v30 = vpop.f32.mrf.mxu1  ;;  %v1688_v61 = vadd.f32 %v1621_v28, %v1554_v21  ;;  %v1347_v21 = vsel %vm3877_vm8, %v1345_v55, %v1346_v45 }
 0x174   : > { %v1386_v56 = vunpack.c.l.b16 %v1347_v21 }
 0x175   : > { %v1490_v15 = vpop.f32.mrf.mxu2  ;;  %v4261_v39 = vadd.f32 %v1777_v27, %v1688_v61  ;;  %v1172_v27 = vadd.f32 %v1171_v30, %v4014_v51  ;;  %v1715_v51 = vshll.u32 %v4275_v37, 16 }
 0x176   : > { %v1555_v11 = vadd.f32 %v1490_v15, %v1170_v35  ;;  %v4279_v55 = vpack.c.b16 %v1386_v56, %v1385_v20  ;;  %v4282_v35 = vld [vmem:[%s3496_s12 + $0xc4] sm:$0xf]  ;;  %v5090_v15 = vld [vmem:[#allocation15_spill] sm:$0xff] }
 0x177   : > { %5084 = vst [vmem:[#allocation9_spill] sm:$0xff] %v4261_v39  ;;  %3167 = vmatmul.msk.bf16.gmra.mxu3 %vm862_vm4, %v4257_v46  ;;  %v1721_v30 = vshll.u32 %v4282_v35, 16  ;;  %v5091_v20 = vld [vmem:[#allocation16_spill] sm:$0xff]  ;;  %v1717_v31 = vrot.slane %v1715_v51, 5 }
 0x178   : > { %5088 = vst [vmem:[#allocation43_spill] sm:$0xff] %v4279_v55  ;;  %v1353_v56 = vrot.slane %v5091_v20, 5 }
 0x179   : > { %v1780_v54 = vpop.f32.mrf.mxu0  ;;  %5089 = vst [vmem:[#allocation44_spill] sm:$0xff] %v4282_v35 }
 0x17a   : > { %v1624_v16 = vpop.f32.mrf.mxu3 }
 0x17b   : > { %v1174_v28 = vpop.f32.mrf.mxu1  ;;  %v1689_v33 = vadd.f32 %v1624_v16, %v1555_v11  ;;  %v1350_v11 = vrot.slane %v5090_v15, 5  ;;  %v1725_v16 = vshrl.u32 %v4282_v35, 16  ;;  %v1723_v35 = vrot.slane %v1721_v30, 5 }
 0x17c   : > { %3184 = vmatmul.msk.bf16.gmra.mxu0 %vm862_vm4, %v5085_v12  ;;  %v1175_v37 = vadd.f32 %v1174_v28, %v4034_v22  ;;  %v1714_v12 = vrot.slane %v1712_v42, 4 }
 0x17d   : > { %v1492_v61 = vpop.f32.mrf.mxu2  ;;  %v4277_v57 = vadd.f32 %v1780_v54, %v1689_v33  ;;  %v1727_v23 = vrot.slane %v1725_v16, 4 }
 0x17e   : > { %3114 = vmatmul.msk.bf16.gmra.mxu1 %vm862_vm4, %v4257_v46  ;;  %v1556_v45 = vadd.f32 %v1492_v61, %v1172_v27  ;;  %v4293_v27 = vld [vmem:[%s3496_s12 + $0xb4] sm:$0xff]  ;;  %v1718_v28 = vor.u32 %v1717_v31, %v1714_v12 }
 0x17f   : > { %5087 = vst [vmem:[#allocation42_spill] sm:$0xff] %v4277_v57  ;;  %v5092_v61 = vld [vmem:[#allocation14_spill] sm:$0xff]  ;;  %v1352_v57 = vrot.slane %v1350_v11, 4  ;;  %v1728_v42 = vor.u32 %v1727_v23, %v1723_v35 }
 0x180   : > { %v3131_v15 = vrot.slane %v5092_v61, 9 }
 0x181   : > { %v1782_v21 = vpop.f32.mrf.mxu0  ;;  %v1729_v12 = vrot.slane %v1728_v42, 4 }
 0x182   : > { %v1626_v39 = vpop.f32.mrf.mxu3  ;;  %3147 = vmatmul.msk.bf16.gmra.mxu2 %vm862_vm4, %v4279_v55  ;;  %v4300_v55 = vld [vmem:[%s3496_s12 + $0xc8] sm:$0x1] }
 0x183   : > { %v1176_v54 = vpop.f32.mrf.mxu1  ;;  %v1690_v33 = vadd.f32 %v1626_v39, %v1556_v45  ;;  %v1351_v39 = vsel %vm3877_vm8, %v3131_v15, %v1350_v11  ;;  %v1354_v45 = vsel %vm3877_vm8, %v1352_v57, %v1353_v56  ;;  %v1731_v51 = vshll.u32 %v4300_v55, 16 }
 0x184   : > { %v1387_v16 = vunpack.c.l.b16 %v1351_v39  ;;  %v1177_v20 = vadd.f32 %v1176_v54, %v4055_v8  ;;  %v1719_v57 = vrot.slane %v1718_v28, 4 }
 0x185   : > { %v1495_v46 = vpop.f32.mrf.mxu2  ;;  %v4297_v36 = vadd.f32 %v1782_v21, %v1690_v33  ;;  %v1733_v23 = vrot.slane %v1731_v51, 5 }
 0x186   : > { %v1557_v63 = vadd.f32 %v1495_v46, %v1175_v37  ;;  %v1388_v46 = vunpack.c.l.b16 %v1354_v45  ;;  %v4325_v45 = vld [vmem:[%s3496_s12 + $0xc0] sm:$0xff] }
 0x187   : > { %3168 = vmatmul.msk.bf16.gmra.mxu3 %vm862_vm4, %v4293_v27  ;;  %v1734_v8 = vsel %vm3574_vm5, %v1729_v12, %v1733_v23 }
 0x188   : > { %v4316_v33 = vpack.c.b16 %v1388_v46, %v1387_v16  ;;  %v1738_v42 = vunpack.c.l.b16 %v1734_v8 }
 0x189   : > { %v1785_v22 = vpop.f32.mrf.mxu0 }
 0x18a   : > { %v1629_v30 = vpop.f32.mrf.mxu3 }
 0x18b   : > { %v1179_v21 = vpop.f32.mrf.mxu1  ;;  %v1691_v37 = vadd.f32 %v1629_v30, %v1557_v63  ;;  %v1724_v63 = vsel %vm3574_vm5, %v1719_v57, %v1723_v35 }
 0x18c   : > { %3185 = vmatmul.msk.bf16.gmra.mxu0 %vm862_vm4, %v3885_v6  ;;  %v1737_v28 = vunpack.c.l.b16 %v1724_v63 }
 0x18d   : > { %v1497_v11 = vpop.f32.mrf.mxu2  ;;  %v4314_v31 = vadd.f32 %v1785_v22, %v1691_v37  ;;  %v1180_v22 = vadd.f32 %v1179_v21, %v4076_v9 }
 0x18e   : > { %3115 = vmatmul.msk.bf16.gmra.mxu1 %vm862_vm4, %v4293_v27  ;;  %v1558_v56 = vadd.f32 %v1497_v11, %v1177_v20  ;;  %v4332_v35 = vpack.c.b16 %v1738_v42, %v1737_v28 }
 0x191   : > { %v1787_v61 = vpop.f32.mrf.mxu0 }
 0x192   : > { %v1631_v54 = vpop.f32.mrf.mxu3  ;;  %3148 = vmatmul.msk.bf16.gmra.mxu2 %vm862_vm4, %v4316_v33 }
 0x193   : > { %v1181_v15 = vpop.f32.mrf.mxu1  ;;  %v1692_v39 = vadd.f32 %v1631_v54, %v1558_v56 }
 0x194   : > { %v1182_v9 = vadd.f32 %v1181_v15, %v4093_v47 }
 0x195   : > { %v1500_v51 = vpop.f32.mrf.mxu2  ;;  %v4328_v30 = vadd.f32 %v1787_v61, %v1692_v39 }
 0x196   : > { %v1559_v16 = vadd.f32 %v1500_v51, %v1180_v22 }
 0x197   : > { %3169 = vmatmul.msk.bf16.gmra.mxu3 %vm862_vm4, %v4325_v45 }
 0x199   : > { %v1790_v46 = vpop.f32.mrf.mxu0 }
 0x19a   : > { %v1634_v37 = vpop.f32.mrf.mxu3 }
 0x19b   : > { %v1184_v20 = vpop.f32.mrf.mxu1  ;;  %v1693_v11 = vadd.f32 %v1634_v37, %v1559_v16 }
 0x19c   : > { %3186 = vmatmul.msk.bf16.gmra.mxu0 %vm862_vm4, %v4332_v35  ;;  %v1185_v8 = vadd.f32 %v1184_v20, %v3976_v43 }
 0x19d   : > { %v1502_v21 = vpop.f32.mrf.mxu2  ;;  %v4339_v57 = vadd.f32 %v1790_v46, %v1693_v11 }
 0x19e   : > { %3189 = vmatmul.msk.bf16.vlgmr.msra.gmra.mxu1 %vm862_vm4, %v3912_v44  ;;  %v1560_v12 = vadd.f32 %v1502_v21, %v1182_v9 }
 0x1a1   : > { %v1792_v23 = vpop.f32.mrf.mxu0 }
 0x1a2   : > { %v1636_v56 = vpop.f32.mrf.mxu3  ;;  %3210 = vmatmul.msk.bf16.vlgmr.msra.gmra.mxu2 %vm862_vm4, %v3924_v10 }
 0x1a3   : > { %v1186_v61 = vpop.f32.mrf.mxu1  ;;  %v1694_v63 = vadd.f32 %v1636_v56, %v1560_v12 }
 0x1a4   : > { %v1187_v10 = vadd.f32 %v1186_v61, %v3998_v52 }
 0x1a5   : > { %v1505_v54 = vpop.f32.mrf.mxu2  ;;  %v4344_v39 = vadd.f32 %v1792_v23, %v1694_v63 }
 0x1a6   : > { %v1561_v47 = vadd.f32 %v1505_v54, %v1185_v8 }
 0x1a7   : > { %3227 = vmatmul.msk.bf16.vlgmr.msra.gmra.mxu3 %vm862_vm4, %v3823_v18 }
 0x1a9   : > { %v1795_v44 = vpop.f32.mrf.mxu0 }
 0x1aa   : > { %v1639_v15 = vpop.f32.mrf.mxu3 }
 0x1ab   : > { %v1189_v22 = vpop.f32.mrf.mxu1  ;;  %v1695_v28 = vadd.f32 %v1639_v15, %v1561_v47 }
 0x1ac   : > { %3245 = vmatmul.msk.bf16.vlgmr.msra.gmra.mxu0 %vm862_vm4, %v3938_v32  ;;  %v1190_v20 = vadd.f32 %v1189_v22, %v4020_v41 }
 0x1ad   : > { %v1507_v42 = vpop.f32.mrf.mxu2  ;;  %v4353_v43 = vadd.f32 %v1795_v44, %v1695_v28 }
 0x1ae   : > { %3190 = vmatmul.msk.bf16.gmra.mxu1 %vm862_vm4, %v3938_v32  ;;  %v1562_v51 = vadd.f32 %v1507_v42, %v1187_v10 }
 0x1b1   : > { %v1797_v16 = vpop.f32.mrf.mxu0 }
 0x1b2   : > { %v1641_v46 = vpop.f32.mrf.mxu3  ;;  %3211 = vmatmul.msk.bf16.gmra.mxu2 %vm862_vm4, %v3944_v13 }
 0x1b3   : > { %v1191_v18 = vpop.f32.mrf.mxu1  ;;  %v1696_v37 = vadd.f32 %v1641_v46, %v1562_v51 }
 0x1b4   : > { %v1192_v13 = vadd.f32 %v1191_v18, %v4042_v14 }
 0x1b5   : > { %v1510_v11 = vpop.f32.mrf.mxu2  ;;  %v4358_v9 = vadd.f32 %v1797_v16, %v1696_v37 }
 0x1b6   : > { %v1563_v52 = vadd.f32 %v1510_v11, %v1190_v20 }
 0x1b7   : > { %3228 = vmatmul.msk.bf16.gmra.mxu3 %vm862_vm4, %v3905_v3 }
 0x1b9   : > { %v1800_v32 = vpop.f32.mrf.mxu0 }
 0x1ba   : > { %v1644_v21 = vpop.f32.mrf.mxu3 }
 0x1bb   : > { %v1194_v12 = vpop.f32.mrf.mxu1  ;;  %v1697_v23 = vadd.f32 %v1644_v21, %v1563_v52 }
 0x1bc   : > { %3246 = vmatmul.msk.bf16.gmra.mxu0 %vm862_vm4, %v3958_v34  ;;  %v1195_v47 = vadd.f32 %v1194_v12, %v4059_v26 }
 0x1bd   : > { %v1512_v56 = vpop.f32.mrf.mxu2  ;;  %v4367_v41 = vadd.f32 %v1800_v32, %v1697_v23 }
 0x1be   : > { %3191 = vmatmul.msk.bf16.gmra.mxu1 %vm862_vm4, %v3958_v34  ;;  %v1564_v61 = vadd.f32 %v1512_v56, %v1192_v13 }
 0x1c1   : > { %v1802_v63 = vpop.f32.mrf.mxu0 }
 0x1c2   : > { %v1646_v8 = vpop.f32.mrf.mxu3  ;;  %3212 = vmatmul.msk.bf16.gmra.mxu2 %vm862_vm4, %v3966_v38 }
 0x1c3   : > { %v1196_v3 = vpop.f32.mrf.mxu1  ;;  %v1698_v54 = vadd.f32 %v1646_v8, %v1564_v61 }
 0x1c4   : > { %v1197_v38 = vadd.f32 %v1196_v3, %v4078_v4 }
 0x1c5   : > { %v1515_v44 = vpop.f32.mrf.mxu2  ;;  %v4372_v15 = vadd.f32 %v1802_v63, %v1698_v54  ;;  %v5093_v63 = vld [vmem:[#allocation19_spill] sm:$0xff] }
 0x1c6   : > { %v1565_v14 = vadd.f32 %v1515_v44, %v1195_v47  ;;  %v5094_v47 = vld [vmem:[#allocation10_spill] sm:$0xff] }
 0x1c7   : > { %3229 = vmatmul.msk.bf16.gmra.mxu3 %vm862_vm4, %v3593_v58 }
 0x1c9   : > { %v1805_v34 = vpop.f32.mrf.mxu0 }
 0x1ca   : > { %v1649_v22 = vpop.f32.mrf.mxu3 }
 0x1cb   : > { %v1199_v28 = vpop.f32.mrf.mxu1  ;;  %v1699_v10 = vadd.f32 %v1649_v22, %v1565_v14  ;;  %v5095_v22 = vld [vmem:[#allocation23_spill] sm:$0xff] }
 0x1cc   : > { %3247 = vmatmul.msk.bf16.gmra.mxu0 %vm862_vm4, %v3986_v5  ;;  %v1200_v37 = vadd.f32 %v1199_v28, %v4100_v7  ;;  %v5096_v28 = vld [vmem:[#allocation20_spill] sm:$0xff] }
 0x1cd   : > { %v1517_v42 = vpop.f32.mrf.mxu2  ;;  %v4381_v26 = vadd.f32 %v1805_v34, %v1699_v10 }
 0x1ce   : > { %3192 = vmatmul.msk.bf16.gmra.mxu1 %vm862_vm4, %v3986_v5  ;;  %v1566_v51 = vadd.f32 %v1517_v42, %v1197_v38 }
 0x1d1   : > { %v1807_v16 = vpop.f32.mrf.mxu0 }
 0x1d2   : > { %v1651_v46 = vpop.f32.mrf.mxu3  ;;  %3213 = vmatmul.msk.bf16.gmra.mxu2 %vm862_vm4, %v3994_v53 }
 0x1d3   : > { %v1201_v58 = vpop.f32.mrf.mxu1  ;;  %v1700_v18 = vadd.f32 %v1651_v46, %v1566_v51  ;;  %v5097_v46 = vld [vmem:[#allocation24_spill] sm:$0xff] }
 0x1d4   : > { %v1202_v53 = vadd.f32 %v1201_v58, %v4115_v17 }
 0x1d5   : > { %v1520_v20 = vpop.f32.mrf.mxu2  ;;  %v4386_v11 = vadd.f32 %v1807_v16, %v1700_v18 }
 0x1d6   : > { %v1567_v4 = vadd.f32 %v1520_v20, %v1200_v37  ;;  %v5098_v37 = vld [vmem:[#allocation21_spill] sm:$0xff] }
 0x1d7   : > { %3230 = vmatmul.msk.bf16.gmra.mxu3 %vm862_vm4, %v3669_v40 }
 0x1d9   : > { %v1810_v5 = vpop.f32.mrf.mxu0 }
 0x1da   : > { %v1654_v52 = vpop.f32.mrf.mxu3 }
 0x1db   : > { %v1204_v32 = vpop.f32.mrf.mxu1  ;;  %v1701_v21 = vadd.f32 %v1654_v52, %v1567_v4 }
 0x1dc   : > { %3248 = vmatmul.msk.bf16.gmra.mxu0 %vm862_vm4, %v4018_v19  ;;  %v1205_v8 = vadd.f32 %v1204_v32, %v5093_v63  ;;  %v5099_v32 = vld [vmem:[#allocation17_spill] sm:$0xff] }
 0x1dd   : > { %v1522_v12 = vpop.f32.mrf.mxu2  ;;  %v4395_v7 = vadd.f32 %v1810_v5, %v1701_v21 }
 0x1de   : > { %3193 = vmatmul.msk.bf16.gmra.mxu1 %vm862_vm4, %v4018_v19  ;;  %v1568_v23 = vadd.f32 %v1522_v12, %v1202_v53 }
 0x1e1   : > { %v1812_v13 = vpop.f32.mrf.mxu0 }
 0x1e2   : > { %v1656_v56 = vpop.f32.mrf.mxu3  ;;  %3214 = vmatmul.msk.bf16.gmra.mxu2 %vm862_vm4, %v4028_v60 }
 0x1e3   : > { %v1206_v40 = vpop.f32.mrf.mxu1  ;;  %v1702_v61 = vadd.f32 %v1656_v56, %v1568_v23  ;;  %v5101_v56 = vld [vmem:[#allocation22_spill] sm:$0xff] }
 0x1e4   : > { %v1207_v60 = vadd.f32 %v1206_v40, %v5096_v28 }
 0x1e5   : > { %v1525_v3 = vpop.f32.mrf.mxu2  ;;  %v4400_v54 = vadd.f32 %v1812_v13, %v1702_v61  ;;  %v5100_v13 = vld [vmem:[#allocation26_spill] sm:$0xff] }
 0x1e6   : > { %v1569_v17 = vadd.f32 %v1525_v3, %v1205_v8 }
 0x1e7   : > { %3231 = vmatmul.msk.bf16.gmra.mxu3 %vm862_vm4, %v5094_v47  ;;  %v5102_v47 = vld [vmem:[#allocation28_spill] sm:$0xff] }
 0x1e9   : > { %v1815_v19 = vpop.f32.mrf.mxu0 }
 0x1ea   : > { %v1659_v44 = vpop.f32.mrf.mxu3 }
 0x1eb   : > { %v1209_v14 = vpop.f32.mrf.mxu1  ;;  %v1703_v34 = vadd.f32 %v1659_v44, %v1569_v17 }
 0x1ec   : > { %3249 = vmatmul.msk.bf16.gmra.mxu0 %vm862_vm4, %v5095_v22  ;;  %v1210_v20 = vadd.f32 %v1209_v14, %v5098_v37  ;;  %v5103_v14 = vld [vmem:[#allocation25_spill] sm:$0xff] }
 0x1ed   : > { %v1527_v10 = vpop.f32.mrf.mxu2  ;;  %v4409_v38 = vadd.f32 %v1815_v19, %v1703_v34 }
 0x1ee   : > { %3194 = vmatmul.msk.bf16.gmra.mxu1 %vm862_vm4, %v5095_v22  ;;  %v1570_v42 = vadd.f32 %v1527_v10, %v1207_v60  ;;  %v5104_v10 = vld [vmem:[#allocation4_spill] sm:$0xff] }
 0x1f1   : > { %v1817_v51 = vpop.f32.mrf.mxu0 }
 0x1f2   : > { %v1661_v16 = vpop.f32.mrf.mxu3  ;;  %3215 = vmatmul.msk.bf16.gmra.mxu2 %vm862_vm4, %v5097_v46 }
 0x1f3   : > { %v1211_v58 = vpop.f32.mrf.mxu1  ;;  %v1704_v18 = vadd.f32 %v1661_v16, %v1570_v42 }
 0x1f4   : > { %v1212_v40 = vadd.f32 %v1211_v58, %v5101_v56  ;;  %v5105_v58 = vld [vmem:[#allocation30_spill] sm:$0xff] }
 0x1f5   : > { %v1530_v4 = vpop.f32.mrf.mxu2  ;;  %v4414_v5 = vadd.f32 %v1817_v51, %v1704_v18  ;;  %v5106_v18 = vld [vmem:[#allocation27_spill] sm:$0xff] }
 0x1f6   : > { %v1571_v52 = vadd.f32 %v1530_v4, %v1210_v20 }
 0x1f7   : > { %3232 = vmatmul.msk.bf16.gmra.mxu3 %vm862_vm4, %v5099_v32 }
 0x1f9   : > { %v1820_v21 = vpop.f32.mrf.mxu0 }
 0x1fa   : > { %v1664_v53 = vpop.f32.mrf.mxu3 }
 0x1fb   : > { %v1214_v12 = vpop.f32.mrf.mxu1  ;;  %v1705_v23 = vadd.f32 %v1664_v53, %v1571_v52 }
 0x1fc   : > { %3250 = vmatmul.msk.bf16.gmra.mxu0 %vm862_vm4, %v5100_v13  ;;  %v1215_v34 = vadd.f32 %v1214_v12, %v5103_v14 }
 0x1fd   : > { %v1532_v61 = vpop.f32.mrf.mxu2  ;;  %v4423_v63 = vadd.f32 %v1820_v21, %v1705_v23  ;;  %v5107_v23 = vld [vmem:[#allocation29_spill] sm:$0xff] }
 0x1fe   : > { %3195 = vmatmul.msk.bf16.gmra.mxu1 %vm862_vm4, %v5100_v13  ;;  %v1572_v8 = vadd.f32 %v1532_v61, %v1212_v40 }
 0x201   : > { %v1822_v3 = vpop.f32.mrf.mxu0 }
 0x202   : > { %v1666_v17 = vpop.f32.mrf.mxu3  ;;  %3216 = vmatmul.msk.bf16.gmra.mxu2 %vm862_vm4, %v5102_v47 }
 0x203   : > { %v1216_v19 = vpop.f32.mrf.mxu1  ;;  %v1706_v44 = vadd.f32 %v1666_v17, %v1572_v8 }
 0x204   : > { %v1217_v37 = vadd.f32 %v1216_v19, %v5106_v18  ;;  %v5108_v19 = vld [vmem:[#allocation31_spill] sm:$0xff] }
 0x205   : > { %v1535_v22 = vpop.f32.mrf.mxu2  ;;  %v4428_v28 = vadd.f32 %v1822_v3, %v1706_v44 }
 0x206   : > { %v1573_v60 = vadd.f32 %v1535_v22, %v1215_v34 }
 0x207   : > { %3233 = vmatmul.msk.bf16.gmra.mxu3 %vm862_vm4, %v5104_v10 }
 0x209   : > { %v1825_v42 = vpop.f32.mrf.mxu0 }
 0x20a   : > { %v1669_v51 = vpop.f32.mrf.mxu3 }
 0x20b   : > { %v1219_v16 = vpop.f32.mrf.mxu1  ;;  %v1707_v46 = vadd.f32 %v1669_v51, %v1573_v60 }
 0x20c   : > { %3251 = vmatmul.msk.bf16.gmra.mxu0 %vm862_vm4, %v5105_v58  ;;  %v1220_v13 = vadd.f32 %v1219_v16, %v5107_v23 }
 0x20d   : > { %v1537_v20 = vpop.f32.mrf.mxu2  ;;  %v4437_v4 = vadd.f32 %v1825_v42, %v1707_v46 }
 0x20e   : > { %3196 = vmatmul.msk.bf16.gmra.mxu1 %vm862_vm4, %v5105_v58  ;;  %v1574_v52 = vadd.f32 %v1537_v20, %v1217_v37  ;;  %v2437_v20 = vld [vmem:[#allocation2] sm:$0xff] }
 0x211   : > { %v1827_v32 = vpop.f32.mrf.mxu0 }
 0x212   : > { %v1671_v21 = vpop.f32.mrf.mxu3  ;;  %3217 = vmatmul.msk.bf16.gmra.mxu2 %vm862_vm4, %v4130_v48 }
 0x213   : > { %v1221_v53 = vpop.f32.mrf.mxu1  ;;  %v1708_v12 = vadd.f32 %v1671_v21, %v1574_v52 }
 0x214   : > { %v1222_v48 = vadd.f32 %v1221_v53, %v5108_v19 }
 0x215   : > { %v1540_v56 = vpop.f32.mrf.mxu2  ;;  %v4442_v40 = vadd.f32 %v1827_v32, %v1708_v12 }
 0x216   : > { %v1575_v61 = vadd.f32 %v1540_v56, %v1220_v13  ;;  %v2438_v13 = vld [vmem:[#allocation2 + $0x8] sm:$0xff] }
 0x217   : > { %3234 = vmatmul.msk.bf16.gmra.mxu3 %vm862_vm4, %v3691_v0 }
 0x219   : > { %v1830_v8 = vpop.f32.mrf.mxu0 }
 0x21a   : > { %v1674_v3 = vpop.f32.mrf.mxu3 }
 0x21b   : > { %v1895_v17 = vpop.f32.mrf.mxu1  ;;  %v1709_v47 = vadd.f32 %v1674_v3, %v1575_v61  ;;  %v5109_v61 = vld [vmem:[#allocation32_spill] sm:$0xff] }
 0x21c   : > { %3252 = vmatmul.msk.bf16.gmra.mxu0 %vm862_vm4, %v4147_v2  ;;  %v1975_v42 = vadd.f32 %v1895_v17, %v4145_v29  ;;  %v5110_v17 = vld [vmem:[#allocation18_spill] sm:$0xff] }
 0x21d   : > { %v1542_v44 = vpop.f32.mrf.mxu2  ;;  %v4451_v14 = vadd.f32 %v1830_v8, %v1709_v47 }
 0x21e   : > { %3197 = vmatmul.msk.bf16.gmra.mxu1 %vm862_vm4, %v4147_v2  ;;  %v1576_v34 = vadd.f32 %v1542_v44, %v1222_v48 }
 0x221   : > { %v1832_v22 = vpop.f32.mrf.mxu0 }
 0x222   : > { %v1676_v60 = vpop.f32.mrf.mxu3  ;;  %3218 = vmatmul.msk.bf16.gmra.mxu2 %vm862_vm4, %v4154_v62 }
 0x223   : > { %v1897_v0 = vpop.f32.mrf.mxu1  ;;  %v1710_v10 = vadd.f32 %v1676_v60, %v1576_v34  ;;  %v5111_v34 = vld [vmem:[#allocation33_spill] sm:$0xff] }
 0x224   : > { %v1976_v52 = vadd.f32 %v1897_v0, %v4158_v1  ;;  %v5112_v60 = vld [vmem:[#allocation13_spill] sm:$0xff] }
 0x225   : > { %v2029_v51 = vpop.f32.mrf.mxu2  ;;  %v4456_v16 = vadd.f32 %v1832_v22, %v1710_v10 }
 0x226   : > { %v2109_v46 = vadd.f32 %v2029_v51, %v1975_v42 }
 0x227   : > { %3235 = vmatmul.msk.bf16.gmra.mxu3 %vm862_vm4, %v3779_v24 }
 0x229   : > { %v2325_v2 = vpop.f32.mrf.mxu0 }
 0x22a   : > { %v2185_v58 = vpop.f32.mrf.mxu3 }
 0x22b   : > { %v1900_v18 = vpop.f32.mrf.mxu1  ;;  %v2265_v37 = vadd.f32 %v2185_v58, %v2109_v46  ;;  %v5113_v58 = vld [vmem:[#allocation34_spill] sm:$0xff] }
 0x22c   : > { %3253 = vmatmul.msk.bf16.gmra.mxu0 %vm862_vm4, %v4173_v50  ;;  %v1977_v1 = vadd.f32 %v1900_v18, %v5109_v61  ;;  %v5116_v61 = vld [vmem:[#allocation37_spill] sm:$0xff] }
 0x22d   : > { %v2405_v62 = vadd.f32 %v2325_v2, %v2265_v37  ;;  %v2031_v32 = vpop.f32.mrf.mxu2 }
 0x22e   : > { %3198 = vmatmul.msk.bf16.gmra.mxu1 %vm862_vm4, %v4173_v50  ;;  %v2110_v21 = vadd.f32 %v2031_v32, %v1976_v52  ;;  %v5114_v52 = vld [vmem:[#allocation11_spill] sm:$0xff] }
 0x22f   : > { %v2469_v29 = vadd.f32 %v2437_v20, %v2405_v62  ;;  %v2440_v20 = vld [vmem:[#allocation2 + $0x18] sm:$0xff] }
 0x231   : > { %2502 = vst.msk [vmem:[#allocation2] sm:$0xff] %vm2501_vm9, %v2469_v29  ;;  %v2327_v24 = vpop.f32.mrf.mxu0 }
 0x232   : > { %v2187_v53 = vpop.f32.mrf.mxu3  ;;  %3219 = vmatmul.msk.bf16.gmra.mxu2 %vm862_vm4, %v4180_v49  ;;  %v2439_v49 = vld [vmem:[#allocation2 + $0x10] sm:$0xff] }
 0x233   : > { %v1902_v12 = vpop.f32.mrf.mxu1  ;;  %v2266_v23 = vadd.f32 %v2187_v53, %v2110_v21 }
 0x234   : > { %v1978_v0 = vadd.f32 %v1902_v12, %v5112_v60  ;;  %v2442_v60 = vld [vmem:[#allocation2 + $0x28] sm:$0xff] }
 0x235   : > { %v2406_v56 = vadd.f32 %v2327_v24, %v2266_v23  ;;  %v2034_v8 = vpop.f32.mrf.mxu2  ;;  %v5115_v24 = vld [vmem:[#allocation5_spill] sm:$0xff] }
 0x236   : > { %v2111_v50 = vadd.f32 %v2034_v8, %v1977_v1  ;;  %v2441_v1 = vld [vmem:[#allocation2 + $0x20] sm:$0xff] }
 0x237   : > { %v2470_v3 = vadd.f32 %v2438_v13, %v2406_v56  ;;  %3236 = vmatmul.msk.bf16.gmra.mxu3 %vm862_vm4, %v5110_v17 }
 0x239   : > { %2503 = vst.msk [vmem:[#allocation2 + $0x8] sm:$0xff] %vm2501_vm9, %v2470_v3  ;;  %v2330_v47 = vpop.f32.mrf.mxu0  ;;  %v5117_v3 = vld [vmem:[#allocation35_spill] sm:$0xff] }
 0x23a   : > { %v2190_v19 = vpop.f32.mrf.mxu3 }
 0x23b   : > { %v1905_v48 = vpop.f32.mrf.mxu1  ;;  %v2267_v44 = vadd.f32 %v2190_v19, %v2111_v50 }
 0x23c   : > { %3254 = vmatmul.msk.bf16.gmra.mxu0 %vm862_vm4, %v5111_v34  ;;  %v1979_v32 = vadd.f32 %v1905_v48, %v5114_v52  ;;  %v5121_v52 = vld [vmem:[#allocation41_spill] sm:$0xff] }
 0x23d   : > { %v2407_v22 = vadd.f32 %v2330_v47, %v2267_v44  ;;  %v2036_v10 = vpop.f32.mrf.mxu2 }
 0x23e   : > { %3199 = vmatmul.msk.bf16.gmra.mxu1 %vm862_vm4, %v5111_v34  ;;  %v2112_v51 = vadd.f32 %v2036_v10, %v1978_v0  ;;  %v5118_v34 = vld [vmem:[#allocation38_spill] sm:$0xff]  ;;  %v5119_v10 = vld [vmem:[#allocation36_spill] sm:$0xff] }
 0x23f   : > { %v2471_v42 = vadd.f32 %v2439_v49, %v2407_v22 }
 0x241   : > { %2504 = vst.msk [vmem:[#allocation2 + $0x10] sm:$0xff] %vm2501_vm9, %v2471_v42  ;;  %v2332_v46 = vpop.f32.mrf.mxu0 }
 0x242   : > { %v2192_v2 = vpop.f32.mrf.mxu3  ;;  %3220 = vmatmul.msk.bf16.gmra.mxu2 %vm862_vm4, %v5113_v58 }
 0x243   : > { %v1907_v18 = vpop.f32.mrf.mxu1  ;;  %v2268_v37 = vadd.f32 %v2192_v2, %v2112_v51  ;;  %v5120_v2 = vld [vmem:[#allocation6_spill] sm:$0xff] }
 0x244   : > { %v1980_v17 = vadd.f32 %v1907_v18, %v5117_v3  ;;  %v2444_v3 = vld [vmem:[#allocation2 + $0x38] sm:$0xff] }
 0x245   : > { %v2408_v62 = vadd.f32 %v2332_v46, %v2268_v37  ;;  %v2039_v29 = vpop.f32.mrf.mxu2 }
 0x246   : > { %v2113_v53 = vadd.f32 %v2039_v29, %v1979_v32  ;;  %v2443_v32 = vld [vmem:[#allocation2 + $0x30] sm:$0xff] }
 0x247   : > { %v2472_v21 = vadd.f32 %v2440_v20, %v2408_v62  ;;  %3237 = vmatmul.msk.bf16.gmra.mxu3 %vm862_vm4, %v5115_v24 }
 0x249   : > { %2505 = vst.msk [vmem:[#allocation2 + $0x18] sm:$0xff] %vm2501_vm9, %v2472_v21  ;;  %v2335_v12 = vpop.f32.mrf.mxu0  ;;  %v5122_v21 = vld [vmem:[#allocation39_spill] sm:$0xff] }
 0x24a   : > { %v2195_v23 = vpop.f32.mrf.mxu3 }
 0x24b   : > { %v1910_v13 = vpop.f32.mrf.mxu1  ;;  %v2269_v56 = vadd.f32 %v2195_v23, %v2113_v53 }
 0x24c   : > { %3255 = vmatmul.msk.bf16.gmra.mxu0 %vm862_vm4, %v5116_v61  ;;  %v1981_v42 = vadd.f32 %v1910_v13, %v5119_v10  ;;  %v5126_v10 = vld [vmem:[#allocation43_spill] sm:$0xff] }
 0x24d   : > { %v2409_v8 = vadd.f32 %v2335_v12, %v2269_v56  ;;  %v2041_v50 = vpop.f32.mrf.mxu2 }
 0x24e   : > { %3200 = vmatmul.msk.bf16.gmra.mxu1 %vm862_vm4, %v5116_v61  ;;  %v2114_v19 = vadd.f32 %v2041_v50, %v1980_v17  ;;  %v5123_v61 = vld [vmem:[#allocation8_spill] sm:$0xff] }
 0x24f   : > { %v2473_v47 = vadd.f32 %v2441_v1, %v2409_v8  ;;  %v5124_v50 = vld [vmem:[#allocation40_spill] sm:$0xff] }
 0x251   : > { %2506 = vst.msk [vmem:[#allocation2 + $0x20] sm:$0xff] %vm2501_vm9, %v2473_v47  ;;  %v2337_v48 = vpop.f32.mrf.mxu0 }
 0x252   : > { %v2197_v44 = vpop.f32.mrf.mxu3  ;;  %3221 = vmatmul.msk.bf16.gmra.mxu2 %vm862_vm4, %v5118_v34 }
 0x253   : > { %v1912_v49 = vpop.f32.mrf.mxu1  ;;  %v2270_v22 = vadd.f32 %v2197_v44, %v2114_v19  ;;  %v5125_v44 = vld [vmem:[#allocation12_spill] sm:$0xff] }
 0x254   : > { %v1982_v24 = vadd.f32 %v1912_v49, %v5122_v21 }
 0x255   : > { %v2410_v0 = vadd.f32 %v2337_v48, %v2270_v22  ;;  %v2044_v51 = vpop.f32.mrf.mxu2 }
 0x256   : > { %v2115_v58 = vadd.f32 %v2044_v51, %v1981_v42  ;;  %v2445_v42 = vld [vmem:[#allocation2 + $0x40] sm:$0xff] }
 0x257   : > { %v2474_v46 = vadd.f32 %v2442_v60, %v2410_v0  ;;  %3238 = vmatmul.msk.bf16.gmra.mxu3 %vm862_vm4, %v5120_v2 }
 0x259   : > { %2507 = vst.msk [vmem:[#allocation2 + $0x28] sm:$0xff] %vm2501_vm9, %v2474_v46  ;;  %v2340_v18 = vpop.f32.mrf.mxu0  ;;  %v5127_v46 = vld [vmem:[#allocation9_spill] sm:$0xff] }
 0x25a   : > { %v2200_v37 = vpop.f32.mrf.mxu3 }
 0x25b   : > { %v1915_v20 = vpop.f32.mrf.mxu1  ;;  %v2271_v62 = vadd.f32 %v2200_v37, %v2115_v58 }
 0x25c   : > { %3256 = vmatmul.msk.bf16.gmra.mxu0 %vm862_vm4, %v5121_v52  ;;  %v1983_v47 = vadd.f32 %v1915_v20, %v5124_v50 }
 0x25d   : > { %v2411_v29 = vadd.f32 %v2340_v18, %v2271_v62  ;;  %v2046_v53 = vpop.f32.mrf.mxu2 }
 0x25e   : > { %3201 = vmatmul.msk.bf16.gmra.mxu1 %vm862_vm4, %v5121_v52  ;;  %v2116_v23 = vadd.f32 %v2046_v53, %v1982_v24  ;;  %v5128_v24 = vld [vmem:[#allocation42_spill] sm:$0xff] }
 0x25f   : > { %v2475_v12 = vadd.f32 %v2443_v32, %v2411_v29  ;;  %v2446_v29 = vld [vmem:[#allocation2 + $0x48] sm:$0xff] }
 0x261   : > { %2508 = vst.msk [vmem:[#allocation2 + $0x30] sm:$0xff] %vm2501_vm9, %v2475_v12  ;;  %v2342_v13 = vpop.f32.mrf.mxu0 }
 0x262   : > { %v2202_v56 = vpop.f32.mrf.mxu3  ;;  %3222 = vmatmul.msk.bf16.gmra.mxu2 %vm862_vm4, %v5123_v61  ;;  %v5129_v61 = vld [vmem:[#allocation44_spill] sm:$0xff] }
 0x263   : > { %v1917_v1 = vpop.f32.mrf.mxu1  ;;  %v2272_v8 = vadd.f32 %v2202_v56, %v2116_v23 }
 0x264   : > { %v1984_v2 = vadd.f32 %v1917_v1, %v5127_v46  ;;  %v1870_v1 = vrot.slane %v5129_v61, 5 }
 0x265   : > { %v2412_v17 = vadd.f32 %v2342_v13, %v2272_v8  ;;  %v2049_v19 = vpop.f32.mrf.mxu2  ;;  %v4522_v8 = vld [vmem:[%s3496_s12 + $0xcc] sm:$0xf] }
 0x266   : > { %v2117_v34 = vadd.f32 %v2049_v19, %v1983_v47  ;;  %v5130_v47 = vld [vmem:[#allocation7_spill] sm:$0xff] }
 0x267   : > { %v2476_v48 = vadd.f32 %v2444_v3, %v2412_v17  ;;  %3239 = vmatmul.msk.bf16.gmra.mxu3 %vm862_vm4, %v5125_v44  ;;  %v3187_v19 = vrot.slane %v5130_v47, 9  ;;  %v2145_v44 = vshll.u32 %v4522_v8, 16 }
 0x269   : > { %2509 = vst.msk [vmem:[#allocation2 + $0x38] sm:$0xff] %vm2501_vm9, %v2476_v48  ;;  %v2345_v49 = vpop.f32.mrf.mxu0  ;;  %v2447_v48 = vld [vmem:[#allocation2 + $0x50] sm:$0xff] }
 0x26a   : > { %v2205_v22 = vpop.f32.mrf.mxu3 }
 0x26b   : > { %v1920_v60 = vpop.f32.mrf.mxu1  ;;  %v2273_v0 = vadd.f32 %v2205_v22, %v2117_v34 }
 0x26c   : > { %3257 = vmatmul.msk.bf16.gmra.mxu0 %vm862_vm4, %v5126_v10  ;;  %v1985_v53 = vadd.f32 %v1920_v60, %v5128_v24 }
 0x26d   : > { %v2413_v51 = vadd.f32 %v2345_v49, %v2273_v0  ;;  %v2051_v58 = vpop.f32.mrf.mxu2 }
 0x26e   : > { %3202 = vmatmul.msk.bf16.gmra.mxu1 %vm862_vm4, %v5126_v10  ;;  %v2118_v37 = vadd.f32 %v2051_v58, %v1984_v2  ;;  %v1872_v10 = vrot.slane %v1870_v1, 4  ;;  %v1871_v2 = vsel %vm3877_vm8, %v3187_v19, %v1870_v1 }
 0x26f   : > { %v2477_v18 = vadd.f32 %v2445_v42, %v2413_v51  ;;  %v1873_v42 = vrot.slane %v4300_v55, 5 }
 0x271   : > { %2510 = vst.msk [vmem:[#allocation2 + $0x40] sm:$0xff] %vm2501_vm9, %v2477_v18  ;;  %v2347_v20 = vpop.f32.mrf.mxu0  ;;  %v2147_v18 = vrot.slane %v2145_v44, 5 }
 0x272   : > { %v2207_v62 = vpop.f32.mrf.mxu3  ;;  %3223 = vmatmul.msk.bf16.gmra.mxu2 %vm862_vm4, %v4293_v27  ;;  %v4525_v27 = vld [vmem:[%s3496_s12 + $0xd0] sm:$0xf] }
 0x273   : > { %v1922_v52 = vpop.f32.mrf.mxu1  ;;  %v2274_v32 = vadd.f32 %v2207_v62, %v2118_v37  ;;  %v2151_v34 = vshll.u32 %v4525_v27, 16  ;;  %v2155_v49 = vshrl.u32 %v4525_v27, 16 }
 0x274   : > { %v1986_v60 = vadd.f32 %v1922_v52, %v4297_v36  ;;  %v1874_v36 = vsel %vm3877_vm8, %v1872_v10, %v1873_v42  ;;  %v423_v52 = vld [vmem:[%s3496_s12 + $0xd4] sm:$0x1] }
 0x275   : > { %v2414_v21 = vadd.f32 %v2347_v20, %v2274_v32  ;;  %v2054_v12 = vpop.f32.mrf.mxu2  ;;  %v2153_v37 = vrot.slane %v2151_v34, 5  ;;  %v2157_v20 = vrot.slane %v2155_v49, 4  ;;  %v1878_v24 = vunpack.c.l.b16 %v1874_v36 }
 0x276   : > { %v2119_v13 = vadd.f32 %v2054_v12, %v1985_v53  ;;  %v2303_v42 = vrot.slane %v423_v52, 5 }
 0x277   : > { %v2478_v23 = vadd.f32 %v2446_v29, %v2414_v21  ;;  %3240 = vmatmul.msk.bf16.gmra.mxu3 %vm862_vm4, %v3885_v6  ;;  %v2142_v6 = vshrl.u32 %v4522_v8, 16  ;;  %v1877_v29 = vunpack.c.l.b16 %v1871_v2  ;;  %v2448_v21 = vld [vmem:[#allocation2 + $0x58] sm:$0xff]  ;;  %v2158_v12 = vor.u32 %v2157_v20, %v2153_v37 }
 0x279   : > { %2511 = vst.msk [vmem:[#allocation2 + $0x48] sm:$0xff] %vm2501_vm9, %v2478_v23  ;;  %v2350_v56 = vpop.f32.mrf.mxu0  ;;  %v2144_v58 = vrot.slane %v2142_v6, 4  ;;  %v2161_v23 = vshll.u32 %v423_v52, 16  ;;  %v2300_v6 = vrot.slane %v4525_v27, 5  ;;  %v2450_v52 = vld [vmem:[#allocation2 + $0x68] sm:$0xff] }
 0x27a   : > { %v2210_v3 = vpop.f32.mrf.mxu3 }
 0x27b   : > { %v1925_v17 = vpop.f32.mrf.mxu1  ;;  %v2275_v50 = vadd.f32 %v2210_v3, %v2119_v13  ;;  %v2148_v53 = vor.u32 %v2147_v18, %v2144_v58  ;;  %v2163_v19 = vrot.slane %v2161_v23, 5  ;;  %v2302_v27 = vrot.slane %v2300_v6, 4 }
 0x27c   : > { %3258 = vmatmul.msk.bf16.gmra.mxu0 %vm862_vm4, %v4316_v33 }
 0x27d   : > { %v2415_v22 = vadd.f32 %v2350_v56, %v2275_v50  ;;  %v2056_v0 = vpop.f32.mrf.mxu2  ;;  %v1987_v56 = vadd.f32 %v1925_v17, %v4314_v31  ;;  %v1879_v50 = vpack.c.b16 %v1878_v24, %v1877_v29  ;;  %v2149_v47 = vrot.slane %v2148_v53, 4  ;;  %v2449_v31 = vld [vmem:[#allocation2 + $0x60] sm:$0xff] }
 0x27e   : > { %3203 = vmatmul.msk.bf16.gmra.mxu1 %vm862_vm4, %v4316_v33  ;;  %v2120_v46 = vadd.f32 %v2056_v0, %v1986_v60 }
 0x27f   : > { %v2479_v51 = vadd.f32 %v2447_v48, %v2415_v22  ;;  %v3243_v22 = vrot.slane %v4522_v8, 9  ;;  %v2304_v8 = vsel %vm3877_vm8, %v2302_v27, %v2303_v42 }
 0x281   : > { %2512 = vst.msk [vmem:[#allocation2 + $0x50] sm:$0xff] %vm2501_vm9, %v2479_v51  ;;  %v2352_v62 = vpop.f32.mrf.mxu0  ;;  %v3281_v51 = vld [vmem:[%s3496_s12 + $0xcc] sm:$0xff]  ;;  %v2301_v25 = vsel %vm3877_vm8, %v3243_v22, %v2300_v6 }
 0x282   : > { %v2212_v33 = vpop.f32.mrf.mxu3  ;;  %3224 = vmatmul.msk.bf16.gmra.mxu2 %vm862_vm4, %v4325_v45  ;;  %v2159_v45 = vrot.slane %v2158_v12, 4 }
 0x283   : > { %v1927_v55 = vpop.f32.mrf.mxu1  ;;  %v2276_v32 = vadd.f32 %v2212_v33, %v2120_v46  ;;  %v2307_v33 = vunpack.c.l.b16 %v2301_v25  ;;  %v2454_v25 = vld [vmem:[#allocation2 + $0x88] sm:$0xff] }
 0x284   : > { %v2164_v17 = vsel %vm3574_vm5, %v2159_v45, %v2163_v19  ;;  %v1988_v0 = vadd.f32 %v1927_v55, %v4328_v30  ;;  %v2308_v55 = vunpack.c.l.b16 %v2304_v8 }
 0x285   : > { %v2416_v13 = vadd.f32 %v2352_v62, %v2276_v32  ;;  %v2059_v61 = vpop.f32.mrf.mxu2  ;;  %v2168_v18 = vunpack.c.l.b16 %v2164_v17 }
 0x286   : > { %v2121_v3 = vadd.f32 %v2059_v61, %v1987_v56  ;;  %v2309_v12 = vpack.c.b16 %v2308_v55, %v2307_v33  ;;  %v2451_v61 = vld [vmem:[#allocation2 + $0x70] sm:$0xff] }
 0x287   : > { %v2480_v1 = vadd.f32 %v2448_v21, %v2416_v13  ;;  %3241 = vmatmul.msk.bf16.gmra.mxu3 %vm862_vm4, %v4332_v35  ;;  %v2154_v35 = vsel %vm3574_vm5, %v2149_v47, %v2153_v37 }
 0x288   : > { %v2167_v58 = vunpack.c.l.b16 %v2154_v35 }
 0x289   : > { %2513 = vst.msk [vmem:[#allocation2 + $0x58] sm:$0xff] %vm2501_vm9, %v2480_v1  ;;  %v2355_v48 = vpop.f32.mrf.mxu0 }
 0x28a   : > { %v2215_v44 = vpop.f32.mrf.mxu3  ;;  %v2169_v36 = vpack.c.b16 %v2168_v18, %v2167_v58 }
 0x28b   : > { %v1930_v34 = vpop.f32.mrf.mxu1  ;;  %v2277_v49 = vadd.f32 %v2215_v44, %v2121_v3  ;;  %v2452_v44 = vld [vmem:[#allocation2 + $0x78] sm:$0xff] }
 0x28c   : > { %3259 = vmatmul.msk.bf16.gmra.mxu0 %vm862_vm4, %v1879_v50  ;;  %v1989_v29 = vadd.f32 %v1930_v34, %v4339_v57 }
 0x28d   : > { %v2417_v60 = vadd.f32 %v2355_v48, %v2277_v49  ;;  %v2061_v10 = vpop.f32.mrf.mxu2 }
 0x28e   : > { %3204 = vmatmul.msk.bf16.gmra.mxu1 %vm862_vm4, %v1879_v50  ;;  %v2122_v2 = vadd.f32 %v2061_v10, %v1988_v0  ;;  %v2453_v10 = vld [vmem:[#allocation2 + $0x80] sm:$0xff] }
 0x28f   : > { %v2481_v46 = vadd.f32 %v2449_v31, %v2417_v60 }
 0x291   : > { %2514 = vst.msk [vmem:[#allocation2 + $0x60] sm:$0xff] %vm2501_vm9, %v2481_v46  ;;  %v2357_v37 = vpop.f32.mrf.mxu0 }
 0x292   : > { %v2217_v30 = vpop.f32.mrf.mxu3  ;;  %3225 = vmatmul.msk.bf16.gmra.mxu2 %vm862_vm4, %v3281_v51 }
 0x293   : > { %v1932_v20 = vpop.f32.mrf.mxu1  ;;  %v2278_v62 = vadd.f32 %v2217_v30, %v2122_v2 }
 0x294   : > { %v1990_v3 = vadd.f32 %v1932_v20, %v4344_v39 }
 0x295   : > { %v2418_v32 = vadd.f32 %v2357_v37, %v2278_v62  ;;  %v2064_v21 = vpop.f32.mrf.mxu2 }
 0x296   : > { %v2123_v53 = vadd.f32 %v2064_v21, %v1989_v29 }
 0x297   : > { %v2482_v24 = vadd.f32 %v2450_v52, %v2418_v32  ;;  %3242 = vmatmul.msk.bf16.gmra.mxu3 %vm862_vm4, %v2169_v36  ;;  %v2455_v32 = vld [vmem:[#allocation2 + $0x90] sm:$0xff] }
 0x299   : > { %2515 = vst.msk [vmem:[#allocation2 + $0x68] sm:$0xff] %vm2501_vm9, %v2482_v24  ;;  %v2360_v59 = vpop.f32.mrf.mxu0 }
 0x29a   : > { %v2220_v23 = vpop.f32.mrf.mxu3 }
 0x29b   : > { %v1935_v13 = vpop.f32.mrf.mxu1  ;;  %v2279_v56 = vadd.f32 %v2220_v23, %v2123_v53 }
 0x29c   : > { %3260 = vmatmul.msk.bf16.gmra.mxu0 %vm862_vm4, %v2309_v12  ;;  %v1991_v49 = vadd.f32 %v1935_v13, %v4353_v43 }
 0x29d   : > { %v2419_v1 = vadd.f32 %v2360_v59, %v2279_v56  ;;  %v2066_v50 = vpop.f32.mrf.mxu2  ;;  %v2456_v56 = vld [vmem:[#allocation2 + $0x98] sm:$0xff] }
 0x29e   : > { %v2124_v47 = vadd.f32 %v2066_v50, %v1990_v3 }
 0x29f   : > { %v2483_v57 = vadd.f32 %v2451_v61, %v2419_v1 }
 0x2a1   : > { %2516 = vst.msk [vmem:[#allocation2 + $0x70] sm:$0xff] %vm2501_vm9, %v2483_v57  ;;  %v2362_v45 = vpop.f32.mrf.mxu0 }
 0x2a2   : > { %v2222_v19 = vpop.f32.mrf.mxu3 }
 0x2a3   : > { %v1937_v48 = vpop.f32.mrf.mxu1  ;;  %v2280_v6 = vadd.f32 %v2222_v19, %v2124_v47 }
 0x2a4   : > { %v1992_v42 = vadd.f32 %v1937_v48, %v4358_v9  ;;  %v2457_v48 = vld [vmem:[#allocation2 + $0xa0] sm:$0xff] }
 0x2a5   : > { %v2420_v34 = vadd.f32 %v2362_v45, %v2280_v6  ;;  %v2069_v31 = vpop.f32.mrf.mxu2 }
 0x2a6   : > { %v2125_v17 = vadd.f32 %v2069_v31, %v1991_v49 }
 0x2a7   : > { %v2484_v35 = vadd.f32 %v2452_v44, %v2420_v34 }
 0x2a9   : > { %2517 = vst.msk [vmem:[#allocation2 + $0x78] sm:$0xff] %vm2501_vm9, %v2484_v35  ;;  %v2365_v22 = vpop.f32.mrf.mxu0 }
 0x2aa   : > { %v2225_v39 = vpop.f32.mrf.mxu3 }
 0x2ab   : > { %v1940_v60 = vpop.f32.mrf.mxu1  ;;  %v2281_v0 = vadd.f32 %v2225_v39, %v2125_v17  ;;  %v2458_v39 = vld [vmem:[#allocation2 + $0xa8] sm:$0xff] }
 0x2ac   : > { %v1993_v30 = vadd.f32 %v1940_v60, %v4367_v41 }
 0x2ad   : > { %v2421_v27 = vadd.f32 %v2365_v22, %v2281_v0  ;;  %v2071_v51 = vpop.f32.mrf.mxu2 }
 0x2ae   : > { %v2126_v2 = vadd.f32 %v2071_v51, %v1992_v42 }
 0x2af   : > { %v2485_v46 = vadd.f32 %v2453_v10, %v2421_v27 }
 0x2b1   : > { %2518 = vst.msk [vmem:[#allocation2 + $0x80] sm:$0xff] %vm2501_vm9, %v2485_v46  ;;  %v2367_v58 = vpop.f32.mrf.mxu0 }
 0x2b2   : > { %v2227_v43 = vpop.f32.mrf.mxu3 }
 0x2b3   : > { %v1942_v18 = vpop.f32.mrf.mxu1  ;;  %v2282_v37 = vadd.f32 %v2227_v43, %v2126_v2 }
 0x2b4   : > { %v1994_v21 = vadd.f32 %v1942_v18, %v4372_v15 }
 0x2b5   : > { %v2422_v8 = vadd.f32 %v2367_v58, %v2282_v37  ;;  %v2074_v20 = vpop.f32.mrf.mxu2  ;;  %v2459_v58 = vld [vmem:[#allocation2 + $0xb0] sm:$0xff] }
 0x2b6   : > { %v2127_v36 = vadd.f32 %v2074_v20, %v1993_v30 }
 0x2b7   : > { %v2486_v62 = vadd.f32 %v2454_v25, %v2422_v8 }
 0x2b9   : > { %2519 = vst.msk [vmem:[#allocation2 + $0x88] sm:$0xff] %vm2501_vm9, %v2486_v62  ;;  %v2370_v52 = vpop.f32.mrf.mxu0 }
 0x2ba   : > { %v2230_v9 = vpop.f32.mrf.mxu3 }
 0x2bb   : > { %v1945_v33 = vpop.f32.mrf.mxu1  ;;  %v2283_v55 = vadd.f32 %v2230_v9, %v2127_v36  ;;  %v2460_v36 = vld [vmem:[#allocation2 + $0xb8] sm:$0xff] }
 0x2bc   : > { %v1995_v1 = vadd.f32 %v1945_v33, %v4381_v26 }
 0x2bd   : > { %v2423_v29 = vadd.f32 %v2370_v52, %v2283_v55  ;;  %v2076_v24 = vpop.f32.mrf.mxu2 }
 0x2be   : > { %v2128_v12 = vadd.f32 %v2076_v24, %v1994_v21 }
 0x2bf   : > { %v2487_v53 = vadd.f32 %v2455_v32, %v2423_v29 }
 0x2c1   : > { %2520 = vst.msk [vmem:[#allocation2 + $0x90] sm:$0xff] %vm2501_vm9, %v2487_v53  ;;  %v2372_v59 = vpop.f32.mrf.mxu0  ;;  %v2461_v53 = vld [vmem:[#allocation2 + $0xc0] sm:$0xff] }
 0x2c2   : > { %v2232_v41 = vpop.f32.mrf.mxu3 }
 0x2c3   : > { %v1947_v23 = vpop.f32.mrf.mxu1  ;;  %v2284_v13 = vadd.f32 %v2232_v41, %v2128_v12 }
 0x2c4   : > { %v1996_v44 = vadd.f32 %v1947_v23, %v4386_v11 }
 0x2c5   : > { %v2424_v61 = vadd.f32 %v2372_v59, %v2284_v13  ;;  %v2079_v3 = vpop.f32.mrf.mxu2 }
 0x2c6   : > { %v2129_v57 = vadd.f32 %v2079_v3, %v1995_v1  ;;  %v2462_v3 = vld [vmem:[#allocation2 + $0xc8] sm:$0xff] }
 0x2c7   : > { %v2488_v50 = vadd.f32 %v2456_v56, %v2424_v61 }
 0x2c9   : > { %2521 = vst.msk [vmem:[#allocation2 + $0x98] sm:$0xff] %vm2501_vm9, %v2488_v50  ;;  %v2375_v47 = vpop.f32.mrf.mxu0 }
 0x2ca   : > { %v2235_v15 = vpop.f32.mrf.mxu3 }
 0x2cb   : > { %v1950_v45 = vpop.f32.mrf.mxu1  ;;  %v2285_v19 = vadd.f32 %v2235_v15, %v2129_v57 }
 0x2cc   : > { %v1997_v0 = vadd.f32 %v1950_v45, %v4395_v7 }
 0x2cd   : > { %v2425_v6 = vadd.f32 %v2375_v47, %v2285_v19  ;;  %v2081_v34 = vpop.f32.mrf.mxu2 }
 0x2ce   : > { %v2130_v31 = vadd.f32 %v2081_v34, %v1996_v44  ;;  %v2463_v44 = vld [vmem:[#allocation2 + $0xd0] sm:$0xff] }
 0x2cf   : > { %v2489_v49 = vadd.f32 %v2457_v48, %v2425_v6 }
 0x2d1   : > { %2522 = vst.msk [vmem:[#allocation2 + $0xa0] sm:$0xff] %vm2501_vm9, %v2489_v49  ;;  %v2377_v35 = vpop.f32.mrf.mxu0 }
 0x2d2   : > { %v2237_v26 = vpop.f32.mrf.mxu3 }
 0x2d3   : > { %v1952_v17 = vpop.f32.mrf.mxu1  ;;  %v2286_v22 = vadd.f32 %v2237_v26, %v2130_v31 }
 0x2d4   : > { %v1998_v18 = vadd.f32 %v1952_v17, %v4400_v54 }
 0x2d5   : > { %v2426_v60 = vadd.f32 %v2377_v35, %v2286_v22  ;;  %v2084_v10 = vpop.f32.mrf.mxu2 }
 0x2d6   : > { %v2131_v42 = vadd.f32 %v2084_v10, %v1997_v0 }
 0x2d7   : > { %v2490_v27 = vadd.f32 %v2458_v39, %v2426_v60  ;;  %v2464_v39 = vld [vmem:[#allocation2 + $0xd8] sm:$0xff] }
 0x2d9   : > { %2523 = vst.msk [vmem:[#allocation2 + $0xa8] sm:$0xff] %vm2501_vm9, %v2490_v27  ;;  %v2380_v51 = vpop.f32.mrf.mxu0 }
 0x2da   : > { %v2240_v11 = vpop.f32.mrf.mxu3 }
 0x2db   : > { %v1955_v46 = vpop.f32.mrf.mxu1  ;;  %v2287_v2 = vadd.f32 %v2240_v11, %v2131_v42 }
 0x2dc   : > { %v1999_v9 = vadd.f32 %v1955_v46, %v4409_v38 }
 0x2dd   : > { %v2427_v43 = vadd.f32 %v2380_v51, %v2287_v2  ;;  %v2086_v37 = vpop.f32.mrf.mxu2  ;;  %v2465_v2 = vld [vmem:[#allocation2 + $0xe0] sm:$0xff] }
 0x2de   : > { %v2132_v8 = vadd.f32 %v2086_v37, %v1998_v18 }
 0x2df   : > { %v2491_v25 = vadd.f32 %v2459_v58, %v2427_v43 }
 0x2e1   : > { %2524 = vst.msk [vmem:[#allocation2 + $0xb0] sm:$0xff] %vm2501_vm9, %v2491_v25  ;;  %v2382_v30 = vpop.f32.mrf.mxu0 }
 0x2e2   : > { %v2242_v7 = vpop.f32.mrf.mxu3 }
 0x2e3   : > { %v1957_v20 = vpop.f32.mrf.mxu1  ;;  %v2288_v62 = vadd.f32 %v2242_v7, %v2132_v8 }
 0x2e4   : > { %v2000_v59 = vadd.f32 %v1957_v20, %v4414_v5  ;;  %v2466_v20 = vld [vmem:[#allocation2 + $0xe8] sm:$0xff] }
 0x2e5   : > { %v2428_v52 = vadd.f32 %v2382_v30, %v2288_v62  ;;  %v2089_v33 = vpop.f32.mrf.mxu2 }
 0x2e6   : > { %v2133_v32 = vadd.f32 %v2089_v33, %v1999_v9 }
 0x2e7   : > { %v2492_v55 = vadd.f32 %v2460_v36, %v2428_v52 }
 0x2e9   : > { %2525 = vst.msk [vmem:[#allocation2 + $0xb8] sm:$0xff] %vm2501_vm9, %v2492_v55  ;;  %v2385_v29 = vpop.f32.mrf.mxu0 }
 0x2ea   : > { %v2245_v54 = vpop.f32.mrf.mxu3 }
 0x2eb   : > { %v1960_v21 = vpop.f32.mrf.mxu1  ;;  %v2289_v24 = vadd.f32 %v2245_v54, %v2133_v32  ;;  %v2467_v54 = vld [vmem:[#allocation2 + $0xf0] sm:$0xff] }
 0x2ec   : > { %v2001_v57 = vadd.f32 %v1960_v21, %v4423_v63 }
 0x2ed   : > { %v2429_v12 = vadd.f32 %v2385_v29, %v2289_v24  ;;  %v2091_v41 = vpop.f32.mrf.mxu2 }
 0x2ee   : > { %v2134_v13 = vadd.f32 %v2091_v41, %v2000_v59 }
 0x2ef   : > { %v2493_v23 = vadd.f32 %v2461_v53, %v2429_v12 }
 0x2f1   : > { %2526 = vst.msk [vmem:[#allocation2 + $0xc0] sm:$0xff] %vm2501_vm9, %v2493_v23  ;;  %v2387_v56 = vpop.f32.mrf.mxu0 }
 0x2f2   : > { %v2247_v38 = vpop.f32.mrf.mxu3 }
 0x2f3   : > { %v1962_v61 = vpop.f32.mrf.mxu1  ;;  %v2290_v1 = vadd.f32 %v2247_v38, %v2134_v13  ;;  %v2468_v13 = vld [vmem:[#allocation2 + $0xf8] sm:$0xff] }
 0x2f4   : > { %v2002_v49 = vadd.f32 %v1962_v61, %v4428_v28 }
 0x2f5   : > { %v2430_v50 = vadd.f32 %v2387_v56, %v2290_v1  ;;  %v2094_v47 = vpop.f32.mrf.mxu2 }
 0x2f6   : > { %v2135_v45 = vadd.f32 %v2094_v47, %v2001_v57 }
 0x2f7   : > { %v2494_v15 = vadd.f32 %v2462_v3, %v2430_v50 }
 0x2f9   : > { %2527 = vst.msk [vmem:[#allocation2 + $0xc8] sm:$0xff] %vm2501_vm9, %v2494_v15  ;;  %v2390_v19 = vpop.f32.mrf.mxu0 }
 0x2fa   : > { %v2250_v5 = vpop.f32.mrf.mxu3 }
 0x2fb   : > { %v2291_v48 = vadd.f32 %v2250_v5, %v2135_v45  ;;  %v1965_v6 = vpop.f32.mrf.mxu1 }
 0x2fc   : > { %v2003_v0 = vadd.f32 %v1965_v6, %v4437_v4 }
 0x2fd   : > { %v2431_v34 = vadd.f32 %v2390_v19, %v2291_v48  ;;  %v2096_v31 = vpop.f32.mrf.mxu2 }
 0x2fe   : > { %v2136_v26 = vadd.f32 %v2096_v31, %v2002_v49 }
 0x2ff   : > { %v2495_v35 = vadd.f32 %v2463_v44, %v2431_v34 }
 0x301   : > { %2528 = vst.msk [vmem:[#allocation2 + $0xd0] sm:$0xff] %vm2501_vm9, %v2495_v35  ;;  %v2392_v17 = vpop.f32.mrf.mxu0 }
 0x302   : > { %v2252_v63 = vpop.f32.mrf.mxu3 }
 0x303   : > { %v2292_v22 = vadd.f32 %v2252_v63, %v2136_v26  ;;  %v1967_v27 = vpop.f32.mrf.mxu1 }
 0x304   : > { %v2004_v43 = vadd.f32 %v1967_v27, %v4442_v40 }
 0x305   : > { %v2432_v60 = vadd.f32 %v2392_v17, %v2292_v22  ;;  %v2099_v10 = vpop.f32.mrf.mxu2 }
 0x306   : > { %v2137_v51 = vadd.f32 %v2099_v10, %v2003_v0 }
 0x307   : > { %v2496_v42 = vadd.f32 %v2464_v39, %v2432_v60 }
 0x309   : > { %2529 = vst.msk [vmem:[#allocation2 + $0xd8] sm:$0xff] %vm2501_vm9, %v2496_v42  ;;  %v2395_v11 = vpop.f32.mrf.mxu0 }
 0x30a   : > { %v2255_v28 = vpop.f32.mrf.mxu3 }
 0x30b   : > { %v2293_v46 = vadd.f32 %v2255_v28, %v2137_v51  ;;  %v1970_v8 = vpop.f32.mrf.mxu1 }
 0x30c   : > { %v2005_v36 = vadd.f32 %v1970_v8, %v4451_v14 }
 0x30d   : > { %v2433_v58 = vadd.f32 %v2395_v11, %v2293_v46  ;;  %v2101_v18 = vpop.f32.mrf.mxu2 }
 0x30e   : > { %v2138_v25 = vadd.f32 %v2101_v18, %v2004_v43 }
 0x30f   : > { %v2497_v37 = vadd.f32 %v2465_v2, %v2433_v58 }
 0x311   : > { %2530 = vst.msk [vmem:[#allocation2 + $0xe0] sm:$0xff] %vm2501_vm9, %v2497_v37  ;;  %v2397_v4 = vpop.f32.mrf.mxu0 }
 0x312   : > { %v2257_v30 = vpop.f32.mrf.mxu3 }
 0x313   : > { %v2294_v7 = vadd.f32 %v2257_v30, %v2138_v25  ;;  %v1972_v55 = vpop.f32.mrf.mxu1 }
 0x314   : > { %v2006_v24 = vadd.f32 %v1972_v55, %v4456_v16 }
 0x315   : > { %v2434_v62 = vadd.f32 %v2397_v4, %v2294_v7  ;;  %v2104_v52 = vpop.f32.mrf.mxu2 }
 0x316   : > { %v2139_v33 = vadd.f32 %v2104_v52, %v2005_v36 }
 0x317   : > { %v2498_v9 = vadd.f32 %v2466_v20, %v2434_v62 }
 0x319   : > { %2531 = vst.msk [vmem:[#allocation2 + $0xe8] sm:$0xff] %vm2501_vm9, %v2498_v9  ;;  %v2400_v40 = vpop.f32.mrf.mxu0 }
 0x31a   : > { %v2260_v32 = vpop.f32.mrf.mxu3 }
 0x31b   : > { %v2295_v29 = vadd.f32 %v2260_v32, %v2139_v33 }
 0x31d   : > { %v2435_v21 = vadd.f32 %v2400_v40, %v2295_v29  ;;  %v2106_v53 = vpop.f32.mrf.mxu2 }
 0x31e   : > { %v2140_v59 = vadd.f32 %v2106_v53, %v2006_v24 }
 0x31f   : > { %v2499_v12 = vadd.f32 %v2467_v54, %v2435_v21 }
 0x321   : > { %2532 = vst.msk [vmem:[#allocation2 + $0xf0] sm:$0xff] %vm2501_vm9, %v2499_v12  ;;  %v2402_v23 = vpop.f32.mrf.mxu0 }
 0x322   : > { %v2262_v41 = vpop.f32.mrf.mxu3 }
 0x323   : > { %v2296_v14 = vadd.f32 %v2262_v41, %v2140_v59 }
 0x325   : > { %v2436_v56 = vadd.f32 %v2402_v23, %v2296_v14  ;;  %2537 = sbr.rel (%p3261_p11) target bundleno = 898 (0x382), region = 40 }
 0x327   : > { %v2500_v38 = vadd.f32 %v2468_v13, %v2436_v56 }
 0x329   : > { %2533 = vst.msk [vmem:[#allocation2 + $0xf8] sm:$0xff] %vm2501_vm9, %v2500_v38 }
 0x32a   : > { %v2538_v61 = vld [vmem:[#allocation2] sm:$0xff]  ;;  %v2539_v16 = vld [vmem:[#allocation2 + $0x8] sm:$0xff]  ;;  %v2540_v3 = vld [vmem:[#allocation2 + $0x10] sm:$0xff]  ;;  %vm2675_vm10 = vcmask 57344  }
 0x32b   : > { %v4609_v1 = vld [vmem:[%s4984_s2] ss:$0 sm:$0xff]  ;;  %v2541_v50 = vld [vmem:[#allocation2 + $0x18] sm:$0xff]  ;;  %v2543_v45 = vld [vmem:[#allocation2 + $0x28] sm:$0xff] }
 0x32c   : > { %v2574_v57 = vadd.f32 %v4609_v1, %v2538_v61  ;;  %v2542_v47 = vld [vmem:[#allocation2 + $0x20] sm:$0xff]  ;;  %v4613_v15 = vadd.f32 %v4609_v1, %v2539_v16  ;;  %v2576_v19 = vadd.f32 %v4609_v1, %v2540_v3  ;;  %v2544_v5 = vld [vmem:[#allocation2 + $0x30] sm:$0xff]  ;;  %v4619_v48 = vadd.f32 %v4609_v1, %v2541_v50  ;;  %v2545_v6 = vld [vmem:[#allocation2 + $0x38] sm:$0xff] }
 0x32d   : > { %v4625_v44 = vadd.f32 %v4609_v1, %v2542_v47  ;;  %v2546_v34 = vld [vmem:[#allocation2 + $0x40] sm:$0xff]  ;;  %v4630_v49 = vadd.f32 %v4609_v1, %v2543_v45  ;;  %v2547_v31 = vld [vmem:[#allocation2 + $0x48] sm:$0xff]  ;;  %v4636_v35 = vadd.f32 %v4609_v1, %v2544_v5  ;;  %v2548_v26 = vld [vmem:[#allocation2 + $0x50] sm:$0xff]  ;;  %v4642_v17 = vadd.f32 %v4609_v1, %v2545_v6 }
 0x32e   : > { %2779 = vst.msk [vmem:[%s3517_s20] sm:$0xff] %vm2501_vm9, %v2574_v57  ;;  %v2549_v63 = vld [vmem:[#allocation2 + $0x58] sm:$0xff]  ;;  %v4648_v22 = vadd.f32 %v4609_v1, %v2546_v34  ;;  %v2606_v39 = vsel %vm2501_vm9, %v2574_v57, 0.0  ;;  %v2607_v60 = vsel %vm2501_vm9, %v4613_v15, 0.0  ;;  %v2609_v0 = vsel %vm2501_vm9, %v2576_v19, 0.0  ;;  %v2550_v10 = vld [vmem:[#allocation2 + $0x60] sm:$0xff] }
 0x32f   : > { %2780 = vst.msk [vmem:[%s3517_s20 + $0x8] sm:$0xff] %vm2501_vm9, %v4613_v15  ;;  %v4658_v27 = vadd.f32 %v4609_v1, %v2547_v31  ;;  %v2608_v42 = vadd.f32 %v2607_v60, %v2606_v39  ;;  %v2551_v51 = vld [vmem:[#allocation2 + $0x68] sm:$0xff]  ;;  %v4664_v11 = vadd.f32 %v4609_v1, %v2548_v26  ;;  %v2611_v28 = vsel %vm2501_vm9, %v4619_v48, 0.0  ;;  %v2552_v46 = vld [vmem:[#allocation2 + $0x70] sm:$0xff]  ;;  %v2553_v43 = vld [vmem:[#allocation2 + $0x78] sm:$0xff] }
 0x330   : > { %2781 = vst.msk [vmem:[%s3517_s20 + $0x10] sm:$0xff] %vm2501_vm9, %v2576_v19  ;;  %v4672_v2 = vadd.f32 %v4609_v1, %v2549_v63  ;;  %v4678_v18 = vadd.f32 %v4609_v1, %v2550_v10  ;;  %v2613_v37 = vsel %vm2501_vm9, %v4625_v44, 0.0  ;;  %v2554_v25 = vld [vmem:[#allocation2 + $0x80] sm:$0xff]  ;;  %v4686_v8 = vadd.f32 %v4609_v1, %v2551_v51  ;;  %v2555_v30 = vld [vmem:[#allocation2 + $0x88] sm:$0xff]  ;;  %v2556_v62 = vld [vmem:[#allocation2 + $0x90] sm:$0xff] }
 0x331   : > { %2782 = vst.msk [vmem:[%s3517_s20 + $0x18] sm:$0xff] %vm2501_vm9, %v4619_v48  ;;  %v2610_v58 = vadd.f32 %v2609_v0, %v2608_v42  ;;  %v4692_v7 = vadd.f32 %v4609_v1, %v2552_v46  ;;  %v2615_v20 = vsel %vm2501_vm9, %v4630_v49, 0.0  ;;  %v4700_v36 = vadd.f32 %v4609_v1, %v2553_v43  ;;  %v2557_v9 = vld [vmem:[#allocation2 + $0x98] sm:$0xff]  ;;  %v2558_v32 = vld [vmem:[#allocation2 + $0xa0] sm:$0xff]  ;;  %v2559_v29 = vld [vmem:[#allocation2 + $0xa8] sm:$0xff] }
 0x332   : > { %2783 = vst.msk [vmem:[%s3517_s20 + $0x20] sm:$0xff] %vm2501_vm9, %v4625_v44  ;;  %v4706_v33 = vadd.f32 %v4609_v1, %v2554_v25  ;;  %v2617_v55 = vsel %vm2501_vm9, %v4636_v35, 0.0  ;;  %v2677_v40 = vmul.f32 %v2574_v57, %v2574_v57  ;;  %v4714_v54 = vadd.f32 %v4609_v1, %v2555_v30  ;;  %v2560_v41 = vld [vmem:[#allocation2 + $0xb0] sm:$0xff]  ;;  %v2561_v56 = vld [vmem:[#allocation2 + $0xb8] sm:$0xff]  ;;  %v2562_v50 = vld [vmem:[#allocation2 + $0xc0] sm:$0xff] }
 0x333   : > { %2784 = vst.msk [vmem:[%s3517_s20 + $0x28] sm:$0xff] %vm2501_vm9, %v4630_v49  ;;  %v2612_v4 = vadd.f32 %v2611_v28, %v2610_v58  ;;  %v2678_v24 = vmul.f32 %v4613_v15, %v4613_v15  ;;  %v2679_v53 = vmul.f32 %v2576_v19, %v2576_v19  ;;  %v4722_v12 = vadd.f32 %v4609_v1, %v2556_v62  ;;  %v2563_v19 = vld [vmem:[#allocation2 + $0xc8] sm:$0xff]  ;;  %v2564_v34 = vld [vmem:[#allocation2 + $0xd0] sm:$0xff]  ;;  %v2565_v39 = vld [vmem:[#allocation2 + $0xd8] sm:$0xff] }
 0x334   : > { %2785 = vst.msk [vmem:[%s3517_s20 + $0x30] sm:$0xff] %vm2501_vm9, %v4636_v35  ;;  %v2619_v59 = vsel %vm2501_vm9, %v4642_v17, 0.0  ;;  %v4730_v14 = vadd.f32 %v4609_v1, %v2557_v9  ;;  %v2680_v13 = vmul.f32 %v4619_v48, %v4619_v48  ;;  %v4738_v38 = vadd.f32 %v4609_v1, %v2558_v32  ;;  %v2566_v42 = vld [vmem:[#allocation2 + $0xe0] sm:$0xff]  ;;  %v2567_v58 = vld [vmem:[#allocation2 + $0xe8] sm:$0xff] }
 0x335   : > { %2786 = vst.msk [vmem:[%s3517_s20 + $0x38] sm:$0xff] %vm2501_vm9, %v4642_v17  ;;  %v2614_v52 = vadd.f32 %v2613_v37, %v2612_v4  ;;  %v4741_v61 = vadd.f32 %v4609_v1, %v2559_v29  ;;  %v2621_v16 = vsel %vm2501_vm9, %v4648_v22, 0.0  ;;  %v2709_v3 = vsel %vm2501_vm9, %v2677_v40, 0.0  ;;  %v2568_v4 = vld [vmem:[#allocation2 + $0xf0] sm:$0xff] }
 0x336   : > { %2787 = vst.msk [vmem:[%s3517_s20 + $0x40] sm:$0xff] %vm2501_vm9, %v4648_v22  ;;  %v2681_v47 = vmul.f32 %v4625_v44, %v4625_v44  ;;  %v2710_v15 = vsel %vm2501_vm9, %v2678_v24, 0.0  ;;  %v2712_v45 = vsel %vm2501_vm9, %v2679_v53, 0.0  ;;  %v4757_v5 = vadd.f32 %v4609_v1, %v2560_v41 }
 0x337   : > { %2788 = vst.msk [vmem:[%s3517_s20 + $0x48] sm:$0xff] %vm2501_vm9, %v4658_v27  ;;  %v2616_v21 = vadd.f32 %v2615_v20, %v2614_v52  ;;  %v2623_v48 = vsel %vm2501_vm9, %v4658_v27, 0.0  ;;  %v2711_v6 = vadd.f32 %v2710_v15, %v2709_v3  ;;  %v4765_v44 = vadd.f32 %v4609_v1, %v2561_v56  ;;  %v2569_v52 = vld [vmem:[#allocation2 + $0xf8] sm:$0xff] }
 0x338   : > { %2789 = vst.msk [vmem:[%s3517_s20 + $0x50] sm:$0xff] %vm2501_vm9, %v4664_v11  ;;  %v2682_v26 = vmul.f32 %v4630_v49, %v4630_v49  ;;  %v2714_v63 = vsel %vm2501_vm9, %v2680_v13, 0.0  ;;  %v4774_v60 = vadd.f32 %v4609_v1, %v2562_v50  ;;  %v2625_v0 = vsel %vm2501_vm9, %v4664_v11, 0.0 }
 0x339   : > { %2790 = vst.msk [vmem:[%s3517_s20 + $0x58] sm:$0xff] %vm2501_vm9, %v4672_v2  ;;  %v2618_v23 = vadd.f32 %v2617_v55, %v2616_v21  ;;  %v2713_v10 = vadd.f32 %v2712_v45, %v2711_v6  ;;  %v4782_v51 = vadd.f32 %v4609_v1, %v2563_v19  ;;  %v2683_v28 = vmul.f32 %v4636_v35, %v4636_v35 }
 0x33a   : > { %2791 = vst.msk [vmem:[%s3517_s20 + $0x60] sm:$0xff] %vm2501_vm9, %v4678_v18  ;;  %v2716_v46 = vsel %vm2501_vm9, %v2681_v47, 0.0  ;;  %v4791_v43 = vadd.f32 %v4609_v1, %v2564_v34  ;;  %v2627_v37 = vsel %vm2501_vm9, %v4672_v2, 0.0  ;;  %v4799_v30 = vadd.f32 %v4609_v1, %v2565_v39 }
 0x33b   : > { %2792 = vst.msk [vmem:[%s3517_s20 + $0x68] sm:$0xff] %vm2501_vm9, %v4686_v8  ;;  %v2620_v57 = vadd.f32 %v2619_v59, %v2618_v23  ;;  %v2715_v25 = vadd.f32 %v2714_v63, %v2713_v10  ;;  %v2684_v20 = vmul.f32 %v4642_v17, %v4642_v17  ;;  %v2718_v62 = vsel %vm2501_vm9, %v2682_v26, 0.0 }
 0x33c   : > { %2793 = vst.msk [vmem:[%s3517_s20 + $0x70] sm:$0xff] %vm2501_vm9, %v4692_v7  ;;  %v4808_v9 = vadd.f32 %v4609_v1, %v2566_v42  ;;  %v2629_v55 = vsel %vm2501_vm9, %v4678_v18, 0.0  ;;  %v4816_v32 = vadd.f32 %v4609_v1, %v2567_v58  ;;  %v2685_v17 = vmul.f32 %v4648_v22, %v4648_v22 }
 0x33d   : > { %2794 = vst.msk [vmem:[%s3517_s20 + $0x78] sm:$0xff] %vm2501_vm9, %v4700_v36  ;;  %v2622_v31 = vadd.f32 %v2621_v16, %v2620_v57  ;;  %v2717_v40 = vadd.f32 %v2716_v46, %v2715_v25  ;;  %v2720_v21 = vsel %vm2501_vm9, %v2683_v28, 0.0  ;;  %v4825_v24 = vadd.f32 %v4609_v1, %v2568_v4 }
 0x33e   : > { %2795 = vst.msk [vmem:[%s3517_s20 + $0x80] sm:$0xff] %vm2501_vm9, %v4706_v33  ;;  %v2631_v53 = vsel %vm2501_vm9, %v4686_v8, 0.0  ;;  %v4833_v41 = vadd.f32 %v4609_v1, %v2569_v52  ;;  %v2686_v22 = vmul.f32 %v4658_v27, %v4658_v27  ;;  %v2722_v13 = vsel %vm2501_vm9, %v2684_v20, 0.0 }
 0x33f   : > { %2796 = vst.msk [vmem:[%s3517_s20 + $0x88] sm:$0xff] %vm2501_vm9, %v4714_v54  ;;  %v2624_v49 = vadd.f32 %v2623_v48, %v2622_v31  ;;  %v2719_v59 = vadd.f32 %v2718_v62, %v2717_v40  ;;  %v2633_v56 = vsel %vm2501_vm9, %v4692_v7, 0.0  ;;  %v2687_v1 = vmul.f32 %v4664_v11, %v4664_v11 }
 0x340   : > { %2797 = vst.msk [vmem:[%s3517_s20 + $0x90] sm:$0xff] %vm2501_vm9, %v4722_v12  ;;  %v2724_v50 = vsel %vm2501_vm9, %v2685_v17, 0.0  ;;  %v2635_v27 = vsel %vm2501_vm9, %v4700_v36, 0.0  ;;  %v2688_v15 = vmul.f32 %v4672_v2, %v4672_v2  ;;  %v2726_v45 = vsel %vm2501_vm9, %v2686_v22, 0.0 }
 0x341   : > { %2798 = vst.msk [vmem:[%s3517_s20 + $0x98] sm:$0xff] %vm2501_vm9, %v4730_v14  ;;  %v2626_v35 = vadd.f32 %v2625_v0, %v2624_v49  ;;  %v2721_v16 = vadd.f32 %v2720_v21, %v2719_v59  ;;  %v2637_v19 = vsel %vm2501_vm9, %v4706_v33, 0.0  ;;  %v2689_v11 = vmul.f32 %v4678_v18, %v4678_v18 }
 0x342   : > { %2799 = vst.msk [vmem:[%s3517_s20 + $0xa0] sm:$0xff] %vm2501_vm9, %v4738_v38  ;;  %v2728_v34 = vsel %vm2501_vm9, %v2687_v1, 0.0  ;;  %v2639_v31 = vsel %vm2501_vm9, %v4714_v54, 0.0  ;;  %v2690_v2 = vmul.f32 %v4686_v8, %v4686_v8  ;;  %v2730_v39 = vsel %vm2501_vm9, %v2688_v15, 0.0 }
 0x343   : > { %2800 = vst.msk [vmem:[%s3517_s20 + $0xa8] sm:$0xff] %vm2501_vm9, %v4741_v61  ;;  %v2628_v29 = vadd.f32 %v2627_v37, %v2626_v35  ;;  %v2723_v57 = vadd.f32 %v2722_v13, %v2721_v16  ;;  %v2641_v0 = vsel %vm2501_vm9, %v4722_v12, 0.0  ;;  %v2691_v18 = vmul.f32 %v4692_v7, %v4692_v7 }
 0x344   : > { %2801 = vst.msk [vmem:[%s3517_s20 + $0xb0] sm:$0xff] %vm2501_vm9, %v4757_v5  ;;  %v2732_v49 = vsel %vm2501_vm9, %v2689_v11, 0.0  ;;  %v2643_v28 = vsel %vm2501_vm9, %v4730_v14, 0.0  ;;  %v2692_v8 = vmul.f32 %v4700_v36, %v4700_v36  ;;  %v2734_v37 = vsel %vm2501_vm9, %v2690_v2, 0.0 }
 0x345   : > { %2802 = vst.msk [vmem:[%s3517_s20 + $0xb8] sm:$0xff] %vm2501_vm9, %v4765_v44  ;;  %v2630_v23 = vadd.f32 %v2629_v55, %v2628_v29  ;;  %v2725_v48 = vadd.f32 %v2724_v50, %v2723_v57  ;;  %v2645_v25 = vsel %vm2501_vm9, %v4738_v38, 0.0  ;;  %v2693_v7 = vmul.f32 %v4706_v33, %v4706_v33 }
 0x346   : > { %2803 = vst.msk [vmem:[%s3517_s20 + $0xc0] sm:$0xff] %vm2501_vm9, %v4774_v60  ;;  %v2736_v20 = vsel %vm2501_vm9, %v2691_v18, 0.0  ;;  %v2647_v62 = vsel %vm2501_vm9, %v4741_v61, 0.0  ;;  %v2694_v36 = vmul.f32 %v4714_v54, %v4714_v54  ;;  %v2738_v40 = vsel %vm2501_vm9, %v2692_v8, 0.0 }
 0x347   : > { %2804 = vst.msk [vmem:[%s3517_s20 + $0xc8] sm:$0xff] %vm2501_vm9, %v4782_v51  ;;  %v2632_v3 = vadd.f32 %v2631_v53, %v2630_v23  ;;  %v2727_v26 = vadd.f32 %v2726_v45, %v2725_v48  ;;  %v2649_v29 = vsel %vm2501_vm9, %v4757_v5, 0.0  ;;  %v2695_v33 = vmul.f32 %v4722_v12, %v4722_v12 }
 0x348   : > { %2805 = vst.msk [vmem:[%s3517_s20 + $0xd0] sm:$0xff] %vm2501_vm9, %v4791_v43  ;;  %v2740_v53 = vsel %vm2501_vm9, %v2693_v7, 0.0  ;;  %v2651_v59 = vsel %vm2501_vm9, %v4765_v44, 0.0  ;;  %v2696_v54 = vmul.f32 %v4730_v14, %v4730_v14  ;;  %v2742_v13 = vsel %vm2501_vm9, %v2694_v36, 0.0 }
 0x349   : > { %2806 = vst.msk [vmem:[%s3517_s20 + $0xd8] sm:$0xff] %vm2501_vm9, %v4799_v30  ;;  %v2634_v47 = vadd.f32 %v2633_v56, %v2632_v3  ;;  %v2729_v10 = vadd.f32 %v2728_v34, %v2727_v26  ;;  %v2653_v56 = vsel %vm2501_vm9, %v4774_v60, 0.0  ;;  %v2697_v12 = vmul.f32 %v4738_v38, %v4738_v38 }
 0x34a   : > { %2807 = vst.msk [vmem:[%s3517_s20 + $0xe0] sm:$0xff] %vm2501_vm9, %v4808_v9  ;;  %v2744_v1 = vsel %vm2501_vm9, %v2695_v33, 0.0  ;;  %v2655_v50 = vsel %vm2501_vm9, %v4782_v51, 0.0  ;;  %v2698_v14 = vmul.f32 %v4741_v61, %v4741_v61  ;;  %v2657_v15 = vsel %vm2501_vm9, %v4791_v43, 0.0 }
 0x34b   : > { %2808 = vst.msk [vmem:[%s3517_s20 + $0xe8] sm:$0xff] %vm2501_vm9, %v4816_v32  ;;  %v2636_v6 = vadd.f32 %v2635_v27, %v2634_v47  ;;  %v2731_v46 = vadd.f32 %v2730_v39, %v2729_v10  ;;  %v2746_v47 = vsel %vm2501_vm9, %v2696_v54, 0.0  ;;  %v2699_v38 = vmul.f32 %v4757_v5, %v4757_v5 }
 0x34c   : > { %2809 = vst.msk [vmem:[%s3517_s20 + $0xf0] sm:$0xff] %vm2501_vm9, %v4825_v24  ;;  %v2748_v48 = vsel %vm2501_vm9, %v2697_v12, 0.0  ;;  %v2700_v61 = vmul.f32 %v4765_v44, %v4765_v44  ;;  %v2661_v26 = vsel %vm2501_vm9, %v4808_v9, 0.0  ;;  %v2701_v5 = vmul.f32 %v4774_v60, %v4774_v60 }
 0x34d   : > { %2810 = vst.msk [vmem:[%s3517_s20 + $0xf8] sm:$0xff] %vm2501_vm9, %v4833_v41  ;;  %v2638_v63 = vadd.f32 %v2637_v19, %v2636_v6  ;;  %v2733_v4 = vadd.f32 %v2732_v49, %v2731_v46  ;;  %v2659_v6 = vsel %vm2501_vm9, %v4799_v30, 0.0  ;;  %v2752_v39 = vsel %vm2501_vm9, %v2699_v38, 0.0 }
 0x34e   : > { %v2702_v44 = vmul.f32 %v4782_v51, %v4782_v51  ;;  %v2754_v18 = vsel %vm2501_vm9, %v2700_v61, 0.0  ;;  %v2665_v49 = vsel %vm2501_vm9, %v4825_v24, 0.0  ;;  %v2703_v60 = vmul.f32 %v4791_v43, %v4791_v43 }
 0x34f   : > { %v2640_v42 = vadd.f32 %v2639_v31, %v2638_v63  ;;  %v2735_v52 = vadd.f32 %v2734_v37, %v2733_v4  ;;  %v2750_v31 = vsel %vm2501_vm9, %v2698_v14, 0.0  ;;  %v2667_v8 = vsel %vm2501_vm9, %v4833_v41, 0.0 }
 0x350   : > { %v2704_v51 = vmul.f32 %v4799_v30, %v4799_v30  ;;  %v2758_v4 = vsel %vm2501_vm9, %v2702_v44, 0.0  ;;  %v2707_v30 = vmul.f32 %v4825_v24, %v4825_v24 }
 0x351   : > { %v2642_v58 = vadd.f32 %v2641_v0, %v2640_v42  ;;  %v2737_v17 = vadd.f32 %v2736_v20, %v2735_v52  ;;  %v2663_v0 = vsel %vm2501_vm9, %v4816_v32, 0.0  ;;  %v2705_v20 = vmul.f32 %v4808_v9, %v4808_v9 }
 0x352   : > { %v2762_v36 = vsel %vm2501_vm9, %v2704_v51, 0.0  ;;  %v2708_v9 = vmul.f32 %v4833_v41, %v4833_v41 }
 0x353   : > { %v2644_v35 = vadd.f32 %v2643_v28, %v2642_v58  ;;  %v2739_v23 = vadd.f32 %v2738_v40, %v2737_v17  ;;  %v2756_v58 = vsel %vm2501_vm9, %v2701_v5, 0.0  ;;  %v2764_v17 = vsel %vm2501_vm9, %v2705_v20, 0.0 }
 0x355   : > { %v2646_v55 = vadd.f32 %v2645_v25, %v2644_v35  ;;  %v2741_v16 = vadd.f32 %v2740_v53, %v2739_v23 }
 0x357   : > { %v2648_v21 = vadd.f32 %v2647_v62, %v2646_v55  ;;  %v2743_v27 = vadd.f32 %v2742_v13, %v2741_v16  ;;  %v2760_v62 = vsel %vm2501_vm9, %v2703_v60, 0.0  ;;  %v2706_v55 = vmul.f32 %v4816_v32, %v4816_v32 }
 0x358   : > { %v2768_v32 = vsel %vm2501_vm9, %v2707_v30, 0.0  ;;  %v2770_v13 = vsel %vm2501_vm9, %v2708_v9, 0.0 }
 0x359   : > { %v2650_v22 = vadd.f32 %v2649_v29, %v2648_v21  ;;  %v2745_v45 = vadd.f32 %v2744_v1, %v2743_v27  ;;  %v2766_v53 = vsel %vm2501_vm9, %v2706_v55, 0.0 }
 0x35b   : > { %v2652_v3 = vadd.f32 %v2651_v59, %v2650_v22  ;;  %v2747_v11 = vadd.f32 %v2746_v47, %v2745_v45 }
 0x35d   : > { %v2654_v57 = vadd.f32 %v2653_v56, %v2652_v3  ;;  %v2749_v63 = vadd.f32 %v2748_v48, %v2747_v11 }
 0x35f   : > { %v2656_v19 = vadd.f32 %v2655_v50, %v2654_v57  ;;  %v2751_v10 = vadd.f32 %v2750_v31, %v2749_v63 }
 0x361   : > { %v2658_v34 = vadd.f32 %v2657_v15, %v2656_v19  ;;  %v2753_v28 = vadd.f32 %v2752_v39, %v2751_v10 }
 0x363   : > { %v2660_v2 = vadd.f32 %v2659_v6, %v2658_v34  ;;  %v2755_v37 = vadd.f32 %v2754_v18, %v2753_v28 }
 0x365   : > { %v2662_v42 = vadd.f32 %v2661_v26, %v2660_v2  ;;  %v2757_v35 = vadd.f32 %v2756_v58, %v2755_v37 }
 0x367   : > { %v2664_v46 = vadd.f32 %v2663_v0, %v2662_v42  ;;  %v2759_v43 = vadd.f32 %v2758_v4, %v2757_v35 }
 0x369   : > { %v2666_v25 = vadd.f32 %v2665_v49, %v2664_v46  ;;  %v2761_v40 = vadd.f32 %v2760_v62, %v2759_v43 }
 0x36b   : > { %v2668_v7 = vadd.f32 %v2667_v8, %v2666_v25  ;;  %v2763_v21 = vadd.f32 %v2762_v36, %v2761_v40 }
 0x36d   : > { %v2669_v52 = vrot.slane %v2668_v7, 4  ;;  %v2765_v59 = vadd.f32 %v2764_v17, %v2763_v21 }
 0x36f   : > { %v2670_v29 = vadd.f32 %v2669_v52, %v2668_v7  ;;  %v2767_v22 = vadd.f32 %v2766_v53, %v2765_v59 }
 0x371   : > { %v2671_v33 = vrot.slane %v2670_v29, 2  ;;  %v2769_v24 = vadd.f32 %v2768_v32, %v2767_v22 }
 0x373   : > { %v2672_v23 = vadd.f32 %v2671_v33, %v2670_v29  ;;  %v2771_v16 = vadd.f32 %v2770_v13, %v2769_v24 }
 0x375   : > { %v2673_v54 = vrot.slane %v2672_v23, 1  ;;  %v2772_v41 = vrot.slane %v2771_v16, 4 }
 0x377   : > { %v2674_v56 = vadd.f32 %v2673_v54, %v2672_v23  ;;  %v2773_v3 = vadd.f32 %v2772_v41, %v2771_v16 }
 0x379   : > { %2676 = vst.msk [vmem:[%s324_s7] sm:$0x1] %vm2675_vm10, %v2674_v56  ;;  %v2774_v12 = vrot.slane %v2773_v3, 2 }
 0x37b   : > { %v2775_v1 = vadd.f32 %v2774_v12, %v2773_v3 }
 0x37d   : > { %v2776_v50 = vrot.slane %v2775_v1, 1 }
 0x37f   : > { %v2777_v27 = vadd.f32 %v2776_v50, %v2775_v1 }
 0x381   : > { %2778 = vst.msk [vmem:[%s331_s0] sm:$0x1] %vm2675_vm10, %v2777_v27 }
 0x382 PF: > { %s16_s24 = sadd.s32 1, %s3409_s24   ;;  %s5131_s16 = sld [smem:[#allocation3_spill]] }
 0x383   : > { %p13_p12 = scmp.ge.s32.totalorder %s16_s24, 98   ;;  %s5132_s18 = smov %s3397_s21 }
 0x384   : > { %s5133_s19 = smov %s3401_s22  ;;  %s5134_s20 = smov %s3405_s23 }
 0x385   : > { %s5135_s21 = smov %s5139_s25  ;;  %s5136_s22 = smov %s5143_s26 }
 0x386   :  { %15 = sbr.rel (!%p13_p12) target bundleno = 4 (0x4), region = 105 }
 0x388   : > { %s5137_s23 = smov %s5131_s16 }

</bundles_post_ra>
